<compile_context>
chip_gen: v6e
topology: v6e:2x2x1
jax: 0.10.0
libtpu: 0.0.40
codegen_flags: <defaults>
</compile_context>

<pallas_src>
from functools import partial

import jax
import jax.numpy as jnp
from jax.experimental import pallas as pl
from jax.experimental.pallas import tpu as pltpu

L = 8              # lattice extent
NS = 2             # spinor components
NV = L * L * NS    # 128
NV2 = 2 * NV       # 256: re/im-interleaved lane width
TB_MAX = 32        # batches per grid step


def ddopt(x, U1, kappa):
    """2D Wilson-Dirac operator with U(1) gauge links (plain-JAX glue, tiny stencil).

    x: [B, L, L, 2] complex64    U1: [B, 2, L, L] complex64
    """
    sigma = (
        jnp.array([[0.0, 1.0], [1.0, 0.0]], dtype=jnp.complex64),      # sigma_x (mu = 0)
        jnp.array([[0.0, -1.0j], [1.0j, 0.0]], dtype=jnp.complex64),   # sigma_y (mu = 1)
    )
    eye = jnp.eye(NS, dtype=jnp.complex64)
    hop = jnp.zeros_like(x)
    for mu, axis in ((0, 1), (1, 2)):
        U = U1[:, mu]                                          # [B, L, L]
        # forward hop: (1 - sigma_mu) U_mu(n) x(n + mu)
        x_fwd = jnp.roll(x, shift=-1, axis=axis)
        fwd = jnp.einsum("st,blmt->blms", eye - sigma[mu], U[..., None] * x_fwd)
        # backward hop: (1 + sigma_mu) U_mu^dagger(n - mu) x(n - mu)
        U_bwd = jnp.roll(jnp.conj(U), shift=1, axis=axis)
        x_bwd = jnp.roll(x, shift=1, axis=axis)
        bwd = jnp.einsum("st,blmt->blms", eye + sigma[mu], U_bwd[..., None] * x_bwd)
        hop = hop + fwd + bwd
    return x - kappa * hop


def _maxloss_kernel(pred_ref, rhs_ref, vri_ref, out_ref, *, tb):
    """Per-block partial of sum(residual.re**2 + residual.im**2).

    pred_ref: (TB, 128, 256) f32  -- pred[b] with re/im interleaved along the last dim
    rhs_ref:  (TB, 256, 2)   f32  -- col0 = interleave(Av_re, -Av_im), col1 = interleave(Av_im, Av_re)
    vri_ref:  (TB, 128, 2)   f32  -- [v_re | v_im]
    out_ref:  (1, 1, 128)    f32  -- block partial sum, broadcast (wrapper reads [0, 0, 0])
    """
    hp = jax.lax.Precision.HIGHEST

    def body(i, acc):
        # (128,256) @ (256,2): column 0 = Re(pred[b] @ Av[b]), column 1 = Im(pred[b] @ Av[b])
        m = jnp.dot(pred_ref[i], rhs_ref[i],
                    preferred_element_type=jnp.float32, precision=hp)
        r = m - vri_ref[i]
        return acc + jnp.sum(r * r, keepdims=True)

    acc = jax.lax.fori_loop(0, tb, body, jnp.zeros((1, 1), jnp.float32),
                            unroll=min(tb, 8))
    out_ref[...] = jnp.broadcast_to(acc, out_ref.shape)


def maxloss_pallas(v, pred, U1, kappa):
    """v: [B,128] c64, pred: [B,128,128] c64, U1: [B,2,8,8] c64, kappa: scalar (ignored)."""
    del kappa  # the torch module hardcodes 0.276
    B = v.shape[0]
    Av = ddopt(v.reshape(-1, L, L, NS), U1, 0.276).reshape(B, NV)   # glue stencil

    # pred re-expressed as f32 with re/im interleaved in the lane dim (single fused XLA pass,
    # no transpose): pred_f32[b, i, 2j] = Re pred[b,i,j], pred_f32[b, i, 2j+1] = Im pred[b,i,j].
    pred_f32 = jnp.stack((jnp.real(pred), jnp.imag(pred)), axis=-1)
    pred_f32 = pred_f32.astype(jnp.float32).reshape(B, NV, NV2)

    ar = jnp.real(Av).astype(jnp.float32)                      # (B, 128)
    ai = jnp.imag(Av).astype(jnp.float32)
    col_re = jnp.stack((ar, -ai), axis=-1).reshape(B, NV2)     # -> Re(pred @ Av)
    col_im = jnp.stack((ai, ar), axis=-1).reshape(B, NV2)      # -> Im(pred @ Av)
    rhs = jnp.stack((col_re, col_im), axis=-1)                 # (B, 256, 2)
    vri = jnp.stack((jnp.real(v), jnp.imag(v)), axis=-1).astype(jnp.float32)  # (B, 128, 2)

    tb = min(TB_MAX, B)
    num_blocks = pl.cdiv(B, tb)
    b_pad = num_blocks * tb
    if b_pad != B:
        # zero-padded batches contribute exactly 0 to the residual sum -> mean stays exact
        pad = ((0, b_pad - B), (0, 0), (0, 0))
        pred_f32 = jnp.pad(pred_f32, pad)
        rhs = jnp.pad(rhs, pad)
        vri = jnp.pad(vri, pad)

    partials = pl.pallas_call(
        partial(_maxloss_kernel, tb=tb),
        out_shape=jax.ShapeDtypeStruct((num_blocks, 1, NV), jnp.float32),
        grid_spec=pltpu.PrefetchScalarGridSpec(
            num_scalar_prefetch=0,
            grid=(num_blocks,),
            in_specs=[
                pl.BlockSpec((tb, NV, NV2), lambda g: (g, 0, 0)),
                pl.BlockSpec((tb, NV2, 2), lambda g: (g, 0, 0)),
                pl.BlockSpec((tb, NV, 2), lambda g: (g, 0, 0)),
            ],
            out_specs=pl.BlockSpec((1, 1, NV), lambda g: (g, 0, 0)),
        ),
        compiler_params=pltpu.CompilerParams(dimension_semantics=("parallel",)),
    )(pred_f32, rhs, vri)

    # mean(re^2) + mean(im^2) == sum(re^2 + im^2) / (B * 128)  (true B, not padded)
    return jnp.sum(partials[:, 0, 0]) * (1.0 / float(B * NV))


def maxloss_ref(v, pred, U1, kappa):
    """Pure-JAX reference mirroring the torch forward."""
    del kappa
    Av = ddopt(v.reshape(-1, L, L, NS), U1, 0.276)
    M_invAv = jnp.einsum("bij,bj->bi", pred, Av.reshape(Av.shape[0], -1),
                         precision=jax.lax.Precision.HIGHEST)
    residual = M_invAv - v
    return jnp.mean(jnp.real(residual) ** 2) + jnp.mean(jnp.imag(residual) ** 2)


if __name__ == "__main__":
    B = 2
    key = jax.random.PRNGKey(0)
    k1, k2, k3, k4, k5 = jax.random.split(key, 5)

    v = (jax.random.normal(k1, (B, NV)) + 1j * jax.random.normal(k2, (B, NV))).astype(jnp.complex64)
    pred = (jax.random.normal(k3, (B, NV, NV))
            + 1j * jax.random.normal(k4, (B, NV, NV))).astype(jnp.complex64)
    theta = jax.random.uniform(k5, (B, 2, L, L), minval=-jnp.pi, maxval=jnp.pi)
    U1 = jnp.exp(1j * theta).astype(jnp.complex64)
    kappa = 0.276

    loss = jax.block_until_ready(jax.jit(maxloss_pallas)(v, pred, U1, kappa))
    ref = jax.block_until_ready(jax.jit(maxloss_ref)(v, pred, U1, kappa))
    assert jnp.allclose(loss, ref, rtol=1e-3, atol=1e-3), (loss, ref)
    print("KERNEL_OK")
</pallas_src>

<mosaic_0001>
module attributes {stable_mosaic.version = 11 : i64} {
  func.func @_maxloss_kernel(%arg0: i32, %arg1: memref<2x128x256xf32, #tpu.memory_space<vmem>>, %arg2: memref<2x256x2xf32, #tpu.memory_space<vmem>>, %arg3: memref<2x128x2xf32, #tpu.memory_space<vmem>>, %arg4: memref<1x1x128xf32, #tpu.memory_space<vmem>>) attributes {dimension_semantics = [#tpu.dimension_semantics<parallel>], iteration_bounds = array<i64: 1>, scalar_prefetch = 0 : i64, scratch_operands = 0 : i64, tpu.core_type = #tpu.core_type<tc>, window_params = [{transform_indices = @transform_0, window_bounds = array<i64: 2, 128, 256>}, {transform_indices = @transform_1, window_bounds = array<i64: 2, 256, 2>}, {transform_indices = @transform_2, window_bounds = array<i64: 2, 128, 2>}, {transform_indices = @transform_3, window_bounds = array<i64: 1, 1, 128>}]} {
    %cst = arith.constant 0.000000e+00 : f32
    %0 = vector.broadcast %cst : f32 to vector<1x1xf32>
    %c0_i32 = arith.constant 0 : i32
    %1 = arith.index_cast %c0_i32 : i32 to index
    %c0 = arith.constant 0 : index
    %c0_0 = arith.constant 0 : index
    %2 = vector.load %arg1[%1, %c0, %c0_0] : memref<2x128x256xf32, #tpu.memory_space<vmem>>, vector<1x128x256xf32>
    %3 = vector.shape_cast %2 : vector<1x128x256xf32> to vector<128x256xf32>
    %4 = arith.index_cast %c0_i32 : i32 to index
    %c0_1 = arith.constant 0 : index
    %c0_2 = arith.constant 0 : index
    %5 = vector.load %arg2[%4, %c0_1, %c0_2] : memref<2x256x2xf32, #tpu.memory_space<vmem>>, vector<1x256x2xf32>
    %6 = vector.shape_cast %5 : vector<1x256x2xf32> to vector<256x2xf32>
    %cst_3 = arith.constant dense<0.000000e+00> : vector<128x2xf32>
    %7 = tpu.matmul %3, %6, %cst_3 {dimension_numbers = #tpu.dot_dimension_numbers<[1], [0], [0], [1], [0, 0, 1, 1], [], []>, precision = #tpu.contract_precision<fp32>} : vector<128x256xf32>, vector<256x2xf32>, vector<128x2xf32> -> vector<128x2xf32>
    %8 = arith.index_cast %c0_i32 : i32 to index
    %c0_4 = arith.constant 0 : index
    %c0_5 = arith.constant 0 : index
    %9 = vector.load %arg3[%8, %c0_4, %c0_5] : memref<2x128x2xf32, #tpu.memory_space<vmem>>, vector<1x128x2xf32>
    %10 = vector.shape_cast %9 : vector<1x128x2xf32> to vector<128x2xf32>
    %11 = arith.subf %7, %10 : vector<128x2xf32>
    %12 = arith.mulf %11, %11 : vector<128x2xf32>
    %13 = vector.shape_cast %12 : vector<128x2xf32> to vector<1x128x2xf32>
    %cst_6 = arith.constant dense<0.000000e+00> : vector<1xf32>
    %14 = vector.multi_reduction <add>, %13, %cst_6 [1, 2] : vector<1x128x2xf32> to vector<1xf32>
    %15 = vector.shape_cast %14 : vector<1xf32> to vector<1x1x1xf32>
    %16 = vector.extract %15[0, 0, 0] : f32 from vector<1x1x1xf32>
    %17 = vector.broadcast %16 : f32 to vector<1x1xf32>
    %18 = arith.addf %0, %17 : vector<1x1xf32>
    %c1_i32 = arith.constant 1 : i32
    %19 = arith.index_cast %c1_i32 : i32 to index
    %c0_7 = arith.constant 0 : index
    %c0_8 = arith.constant 0 : index
    %20 = vector.load %arg1[%19, %c0_7, %c0_8] : memref<2x128x256xf32, #tpu.memory_space<vmem>>, vector<1x128x256xf32>
    %21 = vector.shape_cast %20 : vector<1x128x256xf32> to vector<128x256xf32>
    %22 = arith.index_cast %c1_i32 : i32 to index
    %c0_9 = arith.constant 0 : index
    %c0_10 = arith.constant 0 : index
    %23 = vector.load %arg2[%22, %c0_9, %c0_10] : memref<2x256x2xf32, #tpu.memory_space<vmem>>, vector<1x256x2xf32>
    %24 = vector.shape_cast %23 : vector<1x256x2xf32> to vector<256x2xf32>
    %cst_11 = arith.constant dense<0.000000e+00> : vector<128x2xf32>
    %25 = tpu.matmul %21, %24, %cst_11 {dimension_numbers = #tpu.dot_dimension_numbers<[1], [0], [0], [1], [0, 0, 1, 1], [], []>, precision = #tpu.contract_precision<fp32>} : vector<128x256xf32>, vector<256x2xf32>, vector<128x2xf32> -> vector<128x2xf32>
    %26 = arith.index_cast %c1_i32 : i32 to index
    %c0_12 = arith.constant 0 : index
    %c0_13 = arith.constant 0 : index
    %27 = vector.load %arg3[%26, %c0_12, %c0_13] : memref<2x128x2xf32, #tpu.memory_space<vmem>>, vector<1x128x2xf32>
    %28 = vector.shape_cast %27 : vector<1x128x2xf32> to vector<128x2xf32>
    %29 = arith.subf %25, %28 : vector<128x2xf32>
    %30 = arith.mulf %29, %29 : vector<128x2xf32>
    %31 = vector.shape_cast %30 : vector<128x2xf32> to vector<1x128x2xf32>
    %cst_14 = arith.constant dense<0.000000e+00> : vector<1xf32>
    %32 = vector.multi_reduction <add>, %31, %cst_14 [1, 2] : vector<1x128x2xf32> to vector<1xf32>
    %33 = vector.shape_cast %32 : vector<1xf32> to vector<1x1x1xf32>
    %34 = vector.extract %33[0, 0, 0] : f32 from vector<1x1x1xf32>
    %35 = vector.broadcast %34 : f32 to vector<1x1xf32>
    %36 = arith.addf %18, %35 : vector<1x1xf32>
    %c2_i32 = arith.constant 2 : i32
    %37 = vector.shape_cast %36 : vector<1x1xf32> to vector<1x1x1xf32>
    %38 = vector.broadcast %37 : vector<1x1x1xf32> to vector<1x1x128xf32>
    %c0_15 = arith.constant 0 : index
    %c0_16 = arith.constant 0 : index
    %c0_17 = arith.constant 0 : index
    %39 = vector.load %arg4[%c0_15, %c0_16, %c0_17] : memref<1x1x128xf32, #tpu.memory_space<vmem>>, vector<1x1x128xf32>
    tpu.vector_store %arg4[%c0_15, %c0_16, %c0_17], %38 {strides = array<i32>} : memref<1x1x128xf32, #tpu.memory_space<vmem>>, vector<1x1x128xf32>,
    return
  }
  func.func @transform_0(%arg0: i32) -> (i32, i32, i32) {
    %c0_i32 = arith.constant 0 : i32
    %c0_i32_0 = arith.constant 0 : i32
    %c0_i32_1 = arith.constant 0 : i32
    return %arg0, %c0_i32, %c0_i32_0 : i32, i32, i32
  }
  func.func @transform_1(%arg0: i32) -> (i32, i32, i32) {
    %c0_i32 = arith.constant 0 : i32
    %c0_i32_0 = arith.constant 0 : i32
    %c0_i32_1 = arith.constant 0 : i32
    return %arg0, %c0_i32, %c0_i32_0 : i32, i32, i32
  }
  func.func @transform_2(%arg0: i32) -> (i32, i32, i32) {
    %c0_i32 = arith.constant 0 : i32
    %c0_i32_0 = arith.constant 0 : i32
    %c0_i32_1 = arith.constant 0 : i32
    return %arg0, %c0_i32, %c0_i32_0 : i32, i32, i32
  }
  func.func @transform_3(%arg0: i32) -> (i32, i32, i32) {
    %c0_i32 = arith.constant 0 : i32
    %c0_i32_0 = arith.constant 0 : i32
    %c0_i32_1 = arith.constant 0 : i32
    return %arg0, %c0_i32, %c0_i32_0 : i32, i32, i32
  }
}

</mosaic_0001>

<bundles_post_ra>
// kernel: custom-call.5
= control target key start
LH: loop header
LB: loop body
LE: loop exit
PB: predicated region body
PF: predicated region fallthrough
CT: control target
= control target key end

     0   :  { %s61_s0 = inlined_call_operand.vmem [shape: c64[2,2,8,8], index: 0, kind: input, shape index: {}]   ;;  %s62_s1 = inlined_call_operand.vmem [shape: f32[2,2,8,8], index: 1, kind: output, shape index: {}]  }
   0x1   :  { %v20_v0 = vld [vmem:[%s61_s0 + $0x20] sm:$0xff]  ;;  %v21_v1 = vld [vmem:[%s61_s0 + $0x28] sm:$0xff]  ;;  %v23_v2 = vld [vmem:[%s61_s0 + $0x30] sm:$0xff] }
   0x2   :  { %4 = vst [vmem:[%s62_s1] sm:$0xff] %v20_v0  ;;  %22 = vst [vmem:[%s62_s1 + $0x8] sm:$0xff] %v21_v1  ;;  %v25_v3 = vld [vmem:[%s61_s0 + $0x38] sm:$0xff] }
   0x3   :  { %24 = vst [vmem:[%s62_s1 + $0x10] sm:$0xff] %v23_v2  ;;  %26 = vst [vmem:[%s62_s1 + $0x18] sm:$0xff] %v25_v3 }

// kernel: custom-call.2
= control target key start
LH: loop header
LB: loop body
LE: loop exit
PB: predicated region body
PF: predicated region fallthrough
CT: control target
= control target key end

     0   :  { %2 = vsyncpa [#allocation0], 0  ;;  %s47_s0 = inlined_call_operand.hbm [shape: c64[2,128], index: 0, kind: input, shape index: {}]   ;;  %s48_s1 = inlined_call_operand.vmem [shape: f32[2,128], index: 1, kind: output, shape index: {}]  }
   0x1   :  { %s3_s8 = sshll.u32 %s48_s1, 4  ;;  %s4_s8 = int_to_ptr.vmem [resolvable:$true] %s3_s8 }
   0x2   :  { %s17_s9 = scalar_lea.vmem %s4_s8, 32  ;;  %p22_p1 = scmp.lt.s32.totalorder %s4_s8, %s4_s8 }
   0x3   :  { %p18_p0 = scmp.ne.s32.totalorder %s4_s8, %s17_s9  ;;  %p23_p2 = scmp.lt.s32.totalorder %s17_s9, %s17_s9 }
   0x5   :  { %p24_p3 = por %p23_p2, %p22_p1 }
   0x7   :  { %p25_p4 = pnand %p24_p3, %p18_p0 }
   0x9   :  { %28 = shalt.err (!%p25_p4)  }
   0xa   :  { %6 = dma.hbm_to_vmem [thread:$0]  %s47_s0, 32, %s4_s8, [#allocation0] }
   0xb   :  { %29 = dma.done.wait [#allocation0], 32  }
   0xc   :  { %30 = vsyncadd [#allocation0], 4294967264 }
   0xd   :  { %8 = vsyncpa [#allocation0], 1 }

// kernel: custom-call.3
= control target key start
LH: loop header
LB: loop body
LE: loop exit
PB: predicated region body
PF: predicated region fallthrough
CT: control target
= control target key end

     0   :  { %s51_s0 = inlined_call_operand.hbm [shape: c64[2,128], index: 0, kind: input, shape index: {}]   ;;  %s52_s1 = inlined_call_operand.vmem [shape: f32[2,128], index: 1, kind: output, shape index: {}]  }
   0x1   :  { %s2_s8 = scalar_lea.hbm %s51_s0, 32 }
   0x2   :  { %3 = vsyncpa [#allocation0], 0  ;;  %s4_s11 = sshll.u32 %s52_s1, 4  ;;  %s5_s11 = int_to_ptr.vmem [resolvable:$true] %s4_s11 }
   0x3   :  { %s20_s12 = scalar_lea.vmem %s5_s11, 32  ;;  %p25_p1 = scmp.lt.s32.totalorder %s5_s11, %s5_s11 }
   0x4   :  { %p21_p0 = scmp.ne.s32.totalorder %s5_s11, %s20_s12  ;;  %p26_p2 = scmp.lt.s32.totalorder %s20_s12, %s20_s12 }
   0x6   :  { %p27_p3 = por %p26_p2, %p25_p1 }
   0x8   :  { %p28_p4 = pnand %p27_p3, %p21_p0 }
   0xa   :  { %31 = shalt.err (!%p28_p4)  }
   0xb   :  { %7 = dma.hbm_to_vmem [thread:$0]  %s2_s8, 32, %s5_s11, [#allocation0] }
   0xc   :  { %33 = dma.done.wait [#allocation0], 32  }
   0xd   :  { %34 = vsyncadd [#allocation0], 4294967264 }
   0xe   :  { %9 = vsyncpa [#allocation0], 1 }

// kernel: custom-call.4
= control target key start
LH: loop header
LB: loop body
LE: loop exit
PB: predicated region body
PF: predicated region fallthrough
CT: control target
= control target key end

     0   :  { %s56_s0 = inlined_call_operand.vmem [shape: c64[2,2,8,8], index: 0, kind: input, shape index: {}]   ;;  %s57_s1 = inlined_call_operand.vmem [shape: f32[2,2,8,8], index: 1, kind: output, shape index: {}]  }
   0x1   :  { %v2_v0 = vld [vmem:[%s56_s0] sm:$0xff]  ;;  %v16_v1 = vld [vmem:[%s56_s0 + $0x8] sm:$0xff]  ;;  %v18_v2 = vld [vmem:[%s56_s0 + $0x10] sm:$0xff] }
   0x2   :  { %3 = vst [vmem:[%s57_s1] sm:$0xff] %v2_v0  ;;  %17 = vst [vmem:[%s57_s1 + $0x8] sm:$0xff] %v16_v1  ;;  %v20_v3 = vld [vmem:[%s56_s0 + $0x18] sm:$0xff] }
   0x3   :  { %19 = vst [vmem:[%s57_s1 + $0x10] sm:$0xff] %v18_v2  ;;  %21 = vst [vmem:[%s57_s1 + $0x18] sm:$0xff] %v20_v3 }

// kernel: neg.9
= control target key start
LH: loop header
LB: loop body
LE: loop exit
PB: predicated region body
PF: predicated region fallthrough
CT: control target
= control target key end

     0   :  { %s24_s0 = inlined_call_operand.vmem [shape: f32[2,128,1], index: 0, kind: input, shape index: {}]   ;;  %s25_s1 = inlined_call_operand.vmem [shape: f32[2,128,1], index: 1, kind: output, shape index: {}]  }
   0x1   :  { %v2_v0 = vld [vmem:[%s24_s0] sm:$0x3] }
   0x2   :  { %v5_v1 = vxor.u32 2147483648, %v2_v0 }
   0x4   :  { %7 = vst [vmem:[%s25_s1] sm:$0x3] %v5_v1 }

// kernel: custom-call.1
= control target key start
LH: loop header
LB: loop body
LE: loop exit
PB: predicated region body
PF: predicated region fallthrough
CT: control target
= control target key end

     0   :  { %s51_s0 = inlined_call_operand.hbm [shape: c64[2,128,128], index: 0, kind: input, shape index: {}]   ;;  %s52_s1 = inlined_call_operand.vmem [shape: f32[2,128,128], index: 1, kind: output, shape index: {}]  }
   0x1   :  { %s2_s8 = scalar_lea.hbm %s51_s0, 4096 }
   0x2   :  { %3 = vsyncpa [#allocation0], 0  ;;  %s4_s11 = sshll.u32 %s52_s1, 4  ;;  %s5_s11 = int_to_ptr.vmem [resolvable:$true] %s4_s11 }
   0x3   :  { %s20_s12 = scalar_lea.vmem %s5_s11, 4096  ;;  %p25_p1 = scmp.lt.s32.totalorder %s5_s11, %s5_s11 }
   0x4   :  { %p21_p0 = scmp.ne.s32.totalorder %s5_s11, %s20_s12  ;;  %p26_p2 = scmp.lt.s32.totalorder %s20_s12, %s20_s12 }
   0x6   :  { %p27_p3 = por %p26_p2, %p25_p1 }
   0x8   :  { %p28_p4 = pnand %p27_p3, %p21_p0 }
   0xa   :  { %31 = shalt.err (!%p28_p4)  }
   0xb   :  { %7 = dma.hbm_to_vmem [thread:$0]  %s2_s8, 4096, %s5_s11, [#allocation0] }
   0xc   :  { %33 = dma.done.wait [#allocation0], 4096  }
   0xd   :  { %34 = vsyncadd [#allocation0], 4294963200 }
   0xe   :  { %9 = vsyncpa [#allocation0], 1 }

// kernel: custom-call
= control target key start
LH: loop header
LB: loop body
LE: loop exit
PB: predicated region body
PF: predicated region fallthrough
CT: control target
= control target key end

     0   :  { %2 = vsyncpa [#allocation0], 0  ;;  %s47_s0 = inlined_call_operand.hbm [shape: c64[2,128,128], index: 0, kind: input, shape index: {}]   ;;  %s48_s1 = inlined_call_operand.vmem [shape: f32[2,128,128], index: 1, kind: output, shape index: {}]  }
   0x1   :  { %s3_s8 = sshll.u32 %s48_s1, 4  ;;  %s4_s8 = int_to_ptr.vmem [resolvable:$true] %s3_s8 }
   0x2   :  { %s17_s9 = scalar_lea.vmem %s4_s8, 4096  ;;  %p22_p1 = scmp.lt.s32.totalorder %s4_s8, %s4_s8 }
   0x3   :  { %p18_p0 = scmp.ne.s32.totalorder %s4_s8, %s17_s9  ;;  %p23_p2 = scmp.lt.s32.totalorder %s17_s9, %s17_s9 }
   0x5   :  { %p24_p3 = por %p23_p2, %p22_p1 }
   0x7   :  { %p25_p4 = pnand %p24_p3, %p18_p0 }
   0x9   :  { %28 = shalt.err (!%p25_p4)  }
   0xa   :  { %6 = dma.hbm_to_vmem [thread:$0]  %s47_s0, 4096, %s4_s8, [#allocation0] }
   0xb   :  { %29 = dma.done.wait [#allocation0], 4096  }
   0xc   :  { %30 = vsyncadd [#allocation0], 4294963200 }
   0xd   :  { %8 = vsyncpa [#allocation0], 1 }

// kernel: maxloss_pallas.1
= control target key start
LH: loop header
LB: loop body
LE: loop exit
PB: predicated region body
PF: predicated region fallthrough
CT: control target
= control target key end

     0   :  { %vm1828_vm0 = vcmask 15360   ;;  %s7539_s1 = inlined_call_operand.vmem [shape: f32[2,256,2], index: 1, kind: input, shape index: {}]   ;;  %s7540_s0 = inlined_call_operand.vmem [shape: f32[2,128,256], index: 0, kind: input, shape index: {}]   ;;  %s7541_s2 = inlined_call_operand.vmem [shape: f32[2,128,2], index: 2, kind: input, shape index: {}]   ;;  %s7542_s3 = inlined_call_operand.vmem [shape: f32[1,1,128], index: 3, kind: output, shape index: {}]  }
   0x1   :  { %v77_v0 = vld [vmem:[%s7539_s1 + $0xf8] sm:$0xff]  ;;  %v76_v2 = vld [vmem:[%s7539_s1 + $0xf0] sm:$0xff]  ;;  %v75_v7 = vld [vmem:[%s7539_s1 + $0xe8] sm:$0xff] }
   0x2   :  { %v61_v1 = vld [vmem:[%s7539_s1 + $0x78] sm:$0xff]  ;;  %v4808_v3 = vand.u32 4294901760, %v77_v0  ;;  %v4812_v5 = vand.u32 4294901760, %v76_v2  ;;  %v60_v6 = vld [vmem:[%s7539_s1 + $0x70] sm:$0xff]  ;;  %v59_v8 = vld [vmem:[%s7539_s1 + $0x68] sm:$0xff]  ;;  %v4825_v10 = vand.u32 4294901760, %v75_v7 }
   0x3   :  { %v4810_v4 = vand.u32 4294901760, %v61_v1  ;;  %v4823_v9 = vand.u32 4294901760, %v60_v6  ;;  %v4827_v11 = vand.u32 4294901760, %v59_v8  ;;  %v74_v12 = vld [vmem:[%s7539_s1 + $0xe0] sm:$0xff]  ;;  %v73_v14 = vld [vmem:[%s7539_s1 + $0xd8] sm:$0xff]  ;;  %v4856_v20 = vld [vmem:[%s7539_s1 + $0xd0] sm:$0xff] }
   0x4   :  { %7977 = vst [vmem:[#allocation2_spill] sm:$0xff] %v4825_v10  ;;  %v58_v13 = vld [vmem:[%s7539_s1 + $0x60] sm:$0xff]  ;;  %3815 = vmatprep.subr.mxu0 %v4808_v3  ;;  %v4839_v15 = vand.u32 4294901760, %v74_v12  ;;  %v4843_v17 = vand.u32 4294901760, %v73_v14  ;;  %v4846_v18 = vsub.f32 %v77_v0, %v4808_v3  ;;  %v4851_v19 = vld [vmem:[%s7539_s1 + $0x58] sm:$0xff]  ;;  %v4861_v21 = vld [vmem:[%s7539_s1 + $0x50] sm:$0xff]  ;;  %v4874_v25 = vsub.f32 %v76_v2, %v4812_v5 }
   0x5   :  { %v4841_v16 = vand.u32 4294901760, %v58_v13  ;;  %3816 = vmatpush3.msra.mxu0 %v4810_v4  ;;  %v4865_v22 = vand.u32 4294901760, %v4851_v19  ;;  %v4868_v23 = vsub.f32 %v61_v1, %v4810_v4  ;;  %v4871_v24 = vand.u32 4294901760, %v4856_v20  ;;  %v4879_v26 = vld [vmem:[%s7539_s1 + $0xc8] sm:$0xff]  ;;  %v4889_v28 = vld [vmem:[%s7539_s1 + $0xc0] sm:$0xff]  ;;  %v4941_v46 = vld [vmem:[%s7539_s1 + $0xb8] sm:$0xff] }
   0x6   :  { %7978 = vst [vmem:[#allocation3_spill] sm:$0xff] %v4846_v18  ;;  %7982 = vst [vmem:[#allocation7_spill] sm:$0xff] %v4874_v25  ;;  %v4884_v27 = vld [vmem:[%s7539_s1 + $0x48] sm:$0xff]  ;;  %3817 = vmatprep.subr.mxu0 %v4812_v5  ;;  %v7556_v29 = vand.u32 4294901760, %v4846_v18  ;;  %v4894_v30 = vand.u32 4294901760, %v4861_v21  ;;  %v4897_v31 = vsub.f32 %v60_v6, %v4823_v9  ;;  %v4900_v32 = vand.u32 4294901760, %v4879_v26 }
   0x7   :  { %7979 = vst [vmem:[#allocation4_spill] sm:$0xff] %v4865_v22  ;;  %7980 = vst [vmem:[#allocation5_spill] sm:$0xff] %v4868_v23  ;;  %3818 = vmatpush3.msra.mxu0 %v4823_v9  ;;  %v7555_v33 = vand.u32 4294901760, %v4868_v23  ;;  %v7553_v34 = vand.u32 4294901760, %v4874_v25  ;;  %v4906_v35 = vsub.f32 %v75_v7, %v4825_v10  ;;  %v4909_v36 = vand.u32 4294901760, %v4884_v27  ;;  %v4914_v37 = vld [vmem:[%s7539_s1 + $0x40] sm:$0xff] }
   0x8   :  { %7981 = vst [vmem:[#allocation6_spill] sm:$0xff] %v4871_v24  ;;  %7983 = vst [vmem:[#allocation8_spill] sm:$0xff] %v4897_v31  ;;  %3819 = vmatprep.subr.mxu0 %v4825_v10  ;;  %v531_v38 = vsub.f32 %v4846_v18, %v7556_v29  ;;  %v7552_v39 = vand.u32 4294901760, %v4897_v31  ;;  %v4922_v40 = vsub.f32 %v59_v8, %v4827_v11  ;;  %v4925_v41 = vand.u32 4294901760, %v4889_v28  ;;  %v4954_v51 = vld [vmem:[%s7539_s1 + $0x38] sm:$0xff]  ;;  %v4964_v56 = vld [vmem:[%s7539_s1 + $0xb0] sm:$0xff] }
   0x9   :  { %7984 = vst [vmem:[#allocation9_spill] sm:$0xff] %v4906_v35  ;;  %3820 = vmatpush3.msra.mxu0 %v4827_v11  ;;  %v419_v42 = vsub.f32 %v4868_v23, %v7555_v33  ;;  %v538_v43 = vsub.f32 %v4874_v25, %v7553_v34  ;;  %v7550_v44 = vand.u32 4294901760, %v4906_v35  ;;  %v4936_v45 = vsub.f32 %v74_v12, %v4839_v15  ;;  %v4979_v61 = vld [vmem:[%s7539_s1 + $0x30] sm:$0xff]  ;;  %v4994_v2 = vld [vmem:[%s7539_s1 + $0xa8] sm:$0xff] }
   0xa   :  { %7985 = vst [vmem:[#allocation10_spill] sm:$0xff] %v4922_v40  ;;  %7986 = vst [vmem:[#allocation11_spill] sm:$0xff] %v4925_v41  ;;  %3821 = vmatprep.subr.mxu0 %v4839_v15  ;;  %v532_v47 = vand.u32 4294901760, %v531_v38  ;;  %v426_v48 = vsub.f32 %v4897_v31, %v7552_v39  ;;  %v7548_v49 = vand.u32 4294901760, %v4922_v40  ;;  %v4949_v50 = vand.u32 4294901760, %v4914_v37  ;;  %v5130_v33 = vld [vmem:[%s7539_s1 + $0x88] sm:$0xff] }
   0xb   :  { %7987 = vst [vmem:[#allocation12_spill] sm:$0xff] %v4936_v45  ;;  %3822 = vmatpush3.msra.mxu0 %v4841_v16  ;;  %v420_v52 = vand.u32 4294901760, %v419_v42  ;;  %v539_v53 = vand.u32 4294901760, %v538_v43  ;;  %v545_v54 = vsub.f32 %v4906_v35, %v7550_v44  ;;  %v7547_v55 = vand.u32 4294901760, %v4936_v45  ;;  %v5103_v44 = vld [vmem:[%s7539_s1 + $0x90] sm:$0xff] }
   0xc   :  { %7988 = vst [vmem:[#allocation13_spill] sm:$0xff] %v4949_v50  ;;  %3823 = vmatprep.subr.mxu0 %v4843_v17  ;;  %3895 = vmatprep.subr.mxu1 %v532_v47  ;;  %v427_v57 = vand.u32 4294901760, %v426_v48  ;;  %v433_v58 = vsub.f32 %v4922_v40, %v7548_v49  ;;  %v4971_v59 = vsub.f32 %v58_v13, %v4841_v16  ;;  %v4974_v60 = vand.u32 4294901760, %v4941_v46  ;;  %v5008_v13 = vld [vmem:[%s7539_s1 + $0x28] sm:$0xff]  ;;  %v5087_v49 = vld [vmem:[%s7539_s1 + $0x18] sm:$0xff] }
   0xd   :  { %3824 = vmatpush3.msra.mxu0 %v4865_v22  ;;  %3896 = vmatpush3.msra.mxu1 %v420_v52  ;;  %v546_v62 = vand.u32 4294901760, %v545_v54  ;;  %v552_v63 = vsub.f32 %v4936_v45, %v7547_v55  ;;  %v4986_v0 = vsub.f32 %v73_v14, %v4843_v17  ;;  %v4989_v1 = vand.u32 4294901760, %v4954_v51 }
   0xe   :  { %7989 = vst [vmem:[#allocation14_spill] sm:$0xff] %v4971_v59  ;;  %7990 = vst [vmem:[#allocation15_spill] sm:$0xff] %v4974_v60  ;;  %3825 = vmatprep.subr.mxu0 %v4871_v24  ;;  %3897 = vmatprep.subr.mxu1 %v539_v53  ;;  %v434_v6 = vand.u32 4294901760, %v433_v58  ;;  %v7545_v7 = vand.u32 4294901760, %v4971_v59  ;;  %v5000_v8 = vsub.f32 %v4851_v19, %v4865_v22  ;;  %v5003_v12 = vand.u32 4294901760, %v4964_v56 }
   0xf   :  { %7991 = vst [vmem:[#allocation16_spill] sm:$0xff] %v4989_v1  ;;  %3826 = vmatpush3.msra.mxu0 %v4894_v30  ;;  %3898 = vmatpush3.msra.mxu1 %v427_v57  ;;  %v553_v14 = vand.u32 4294901760, %v552_v63  ;;  %v7543_v38 = vand.u32 4294901760, %v4986_v0  ;;  %v5014_v42 = vsub.f32 %v4856_v20, %v4871_v24  ;;  %v5017_v19 = vand.u32 4294901760, %v4979_v61  ;;  %v5034_v20 = vld [vmem:[%s7539_s1 + $0xa0] sm:$0xff] }
  0x10   :  { %7992 = vst [vmem:[#allocation17_spill] sm:$0xff] %v5003_v12  ;;  %3827 = vmatprep.subr.mxu0 %v4900_v32  ;;  %3899 = vmatprep.subr.mxu1 %v546_v62  ;;  %v440_v43 = vsub.f32 %v4971_v59, %v7545_v7  ;;  %v7544_v47 = vand.u32 4294901760, %v5000_v8  ;;  %v5026_v48 = vsub.f32 %v4861_v21, %v4894_v30  ;;  %v5029_v52 = vand.u32 4294901760, %v4994_v2 }
  0x11   :  { %7993 = vst [vmem:[#allocation18_spill] sm:$0xff] %v5017_v19  ;;  %3828 = vmatpush3.msra.mxu0 %v4909_v36  ;;  %3900 = vmatpush3.msra.mxu1 %v434_v6  ;;  %v559_v53 = vsub.f32 %v4986_v0, %v7543_v38  ;;  %v7546_v54 = vand.u32 4294901760, %v5014_v42  ;;  %v5043_v21 = vsub.f32 %v4879_v26, %v4900_v32  ;;  %v5046_v57 = vand.u32 4294901760, %v5008_v13  ;;  %v5060_v26 = vld [vmem:[%s7539_s1 + $0x20] sm:$0xff] }
  0x12   :  { %7994 = vst [vmem:[#allocation19_spill] sm:$0xff] %v5029_v52  ;;  %3829 = vmatprep.subr.mxu0 %v4925_v41  ;;  %3901 = vmatprep.subr.mxu1 %v553_v14  ;;  %v441_v58 = vand.u32 4294901760, %v440_v43  ;;  %v447_v62 = vsub.f32 %v5000_v8, %v7544_v47  ;;  %v7549_v63 = vand.u32 4294901760, %v5026_v48  ;;  %v5055_v6 = vsub.f32 %v4884_v27, %v4909_v36  ;;  %v5073_v27 = vld [vmem:[%s7539_s1 + $0x98] sm:$0xff] }
  0x13   :  { %7995 = vst [vmem:[#allocation20_spill] sm:$0xff] %v5046_v57  ;;  %3830 = vmatpush3.msra.mxu0 %v4949_v50  ;;  %v560_v38 = vand.u32 4294901760, %v559_v53  ;;  %v566_v14 = vsub.f32 %v5014_v42, %v7546_v54  ;;  %v7551_v43 = vand.u32 4294901760, %v5043_v21  ;;  %v5068_v47 = vand.u32 4294901760, %v5034_v20 }
  0x14   :  { %3902 = vmatpush3.msra.mxu1 %v441_v58  ;;  %3831 = vmatprep.subr.mxu0 %v4974_v60  ;;  %v448_v7 = vand.u32 4294901760, %v447_v62  ;;  %v454_v53 = vsub.f32 %v5026_v48, %v7549_v63  ;;  %v7554_v54 = vand.u32 4294901760, %v5055_v6  ;;  %v5082_v55 = vsub.f32 %v4889_v28, %v4925_v41 }
  0x15   :  { %7996 = vst [vmem:[#allocation21_spill] sm:$0xff] %v5068_v47  ;;  %3903 = vmatprep.subr.mxu1 %v560_v38  ;;  %3832 = vmatpush3.msra.mxu0 %v4989_v1  ;;  %v567_v58 = vand.u32 4294901760, %v566_v14  ;;  %v573_v62 = vsub.f32 %v5043_v21, %v7551_v43  ;;  %v5094_v63 = vand.u32 4294901760, %v5060_v26  ;;  %v5098_v28 = vsub.f32 %v4914_v37, %v4949_v50  ;;  %v5116_v37 = vld [vmem:[%s7539_s1 + $0x10] sm:$0xff] }
  0x16   :  { %3904 = vmatpush3.msra.mxu1 %v448_v7  ;;  %3833 = vmatprep.subr.mxu0 %v5003_v12  ;;  %v455_v38 = vand.u32 4294901760, %v454_v53  ;;  %v461_v14 = vsub.f32 %v5055_v6, %v7554_v54  ;;  %v7559_v43 = vand.u32 4294901760, %v5082_v55  ;;  %v5111_v39 = vand.u32 4294901760, %v5073_v27 }
  0x17   :  { %7997 = vst [vmem:[#allocation22_spill] sm:$0xff] %v5098_v28  ;;  %3905 = vmatprep.subr.mxu1 %v567_v58  ;;  %3834 = vmatpush3.msra.mxu0 %v5017_v19  ;;  %v574_v7 = vand.u32 4294901760, %v573_v62  ;;  %v7560_v53 = vand.u32 4294901760, %v5098_v28  ;;  %v5122_v34 = vsub.f32 %v4941_v46, %v4974_v60  ;;  %v5125_v54 = vand.u32 4294901760, %v5087_v49 }
  0x18   :  { %7998 = vst [vmem:[#allocation23_spill] sm:$0xff] %v5111_v39  ;;  %3906 = vmatpush3.msra.mxu1 %v455_v38  ;;  %3835 = vmatprep.subr.mxu0 %v5029_v52  ;;  %v462_v58 = vand.u32 4294901760, %v461_v14  ;;  %v580_v62 = vsub.f32 %v5082_v55, %v7559_v43  ;;  %v5138_v46 = vsub.f32 %v4954_v51, %v4989_v1  ;;  %v5141_v29 = vand.u32 4294901760, %v5103_v44  ;;  %v5158_v51 = vld [vmem:[%s7539_s1 + $0x8] sm:$0xff] }
  0x19   :  { %7999 = vst [vmem:[#allocation24_spill] sm:$0xff] %v5122_v34  ;;  %8000 = vst [vmem:[#allocation25_spill] sm:$0xff] %v5125_v54  ;;  %3907 = vmatprep.subr.mxu1 %v574_v7  ;;  %3836 = vmatpush3.msra.mxu0 %v5046_v57  ;;  %v468_v38 = vsub.f32 %v5098_v28, %v7560_v53  ;;  %v5150_v60 = vsub.f32 %v4964_v56, %v5003_v12  ;;  %v5153_v43 = vand.u32 4294901760, %v5116_v37  ;;  %v5172_v12 = vld [vmem:[%s7539_s1 + $0x80] sm:$0xff] }
  0x1a   :  { %8001 = vst [vmem:[#allocation26_spill] sm:$0xff] %v5138_v46  ;;  %8002 = vst [vmem:[#allocation27_spill] sm:$0xff] %v5141_v29  ;;  %3908 = vmatpush3.msra.mxu1 %v462_v58  ;;  %3837 = vmatprep.subr.mxu0 %v5068_v47  ;;  %v581_v7 = vand.u32 4294901760, %v580_v62  ;;  %v5164_v14 = vsub.f32 %v4979_v61, %v5017_v19  ;;  %v5167_v56 = vand.u32 4294901760, %v5130_v33  ;;  %v8005_v1 = vand.u32 4294901760, %v5122_v34 }
  0x1b   :  { %8003 = vst [vmem:[#allocation28_spill] sm:$0xff] %v5150_v60  ;;  %3838 = vmatpush3.msra.mxu0 %v5094_v63  ;;  %v469_v58 = vand.u32 4294901760, %v468_v38  ;;  %v7579_v53 = vand.u32 4294901760, %v5150_v60  ;;  %v5181_v61 = vsub.f32 %v4994_v2, %v5029_v52  ;;  %v8007_v19 = vand.u32 4294901760, %v5138_v46  ;;  %v5198_v2 = vld [vmem:[%s7539_s1] sm:$0xff] }
  0x1c   :  { %8004 = vst [vmem:[#allocation29_spill] sm:$0xff] %v5164_v14  ;;  %v587_v62 = vsub.f32 %v5122_v34, %v8005_v1  ;;  %3909 = vmatprep.subr.mxu1 %v581_v7  ;;  %3839 = vmatprep.subr.mxu0 %v5111_v39  ;;  %v5189_v38 = vand.u32 4294901760, %v5158_v51  ;;  %v5193_v1 = vsub.f32 %v5008_v13, %v5046_v57  ;;  %v15_v7 = vld [vmem:[%s7540_s0 + $0x8] sm:$0xff]  ;;  %v5209_v57 = vand.u32 4294901760, %v5172_v12 }
  0x1d   :  { %8006 = vst [vmem:[#allocation30_spill] sm:$0xff] %v5181_v61  ;;  %v475_v28 = vsub.f32 %v5138_v46, %v8007_v19  ;;  %3910 = vmatpush3.msra.mxu1 %v469_v58  ;;  %3840 = vmatpush3.msra.mxu0 %v5125_v54  ;;  %v594_v50 = vsub.f32 %v5150_v60, %v7579_v53  ;;  %v8009_v46 = vand.u32 4294901760, %v5164_v14  ;;  %v14_v53 = vld [vmem:[%s7540_s0] sm:$0xff]  ;;  %v5230_v58 = vand.u32 4294901760, %v15_v7 }
  0x1e   :  { %v588_v19 = vand.u32 4294901760, %v587_v62  ;;  %8008 = vst [vmem:[#allocation31_spill] sm:$0xff] %v5209_v57  ;;  %3841 = vmatprep.subr.mxu0 %v5141_v29  ;;  %v5218_v62 = vsub.f32 %v5034_v20, %v5068_v47  ;;  %v8013_v47 = vand.u32 4294901760, %v5193_v1 }
  0x1f   :  { %v476_v52 = vand.u32 4294901760, %v475_v28  ;;  %v482_v34 = vsub.f32 %v5164_v14, %v8009_v46  ;;  %v595_v13 = vand.u32 4294901760, %v594_v50  ;;  %3842 = vmatpush3.msra.mxu0 %v5153_v43  ;;  %v8010_v28 = vand.u32 4294901760, %v5181_v61  ;;  %8012 = vst [vmem:[#allocation33_spill] sm:$0xff] %v5230_v58  ;;  %640 = vmatprep.mubr.f32.mxu1 %v5230_v58 }
  0x20   :  { %3911 = vmatprep.subr.mxu1 %v588_v19  ;;  %v5228_v46 = vand.u32 4294901760, %v5198_v2  ;;  %3843 = vmatprep.subr.mxu0 %v5167_v56  ;;  %v489_v19 = vsub.f32 %v5193_v1, %v8013_v47  ;;  %v7590_v50 = vand.u32 4294901760, %v5218_v62  ;;  %v5239_v14 = vsub.f32 %v5060_v26, %v5094_v63  ;;  %v17_v47 = vld [vmem:[%s7540_s0 + $0x18] sm:$0xff] }
  0x21   :  { %v601_v60 = vsub.f32 %v5181_v61, %v8010_v28  ;;  %3912 = vmatpush3.msra.mxu1 %v476_v52  ;;  %v483_v20 = vand.u32 4294901760, %v482_v34  ;;  %3844 = vmatpush3.msra.mxu0 %v5189_v38  ;;  %v5243_v61 = vsub.f32 %v15_v7, %v5230_v58  ;;  %v5245_v34 = vand.u32 4294901760, %v14_v53 }
  0x22   :  { %8011 = vst [vmem:[#allocation32_spill] sm:$0xff] %v5228_v46  ;;  %3913 = vmatprep.subr.mxu1 %v595_v13  ;;  %v5249_v52 = vsub.f32 %v5073_v27, %v5111_v39  ;;  %v490_v26 = vand.u32 4294901760, %v489_v19  ;;  %3845 = vmatprep.subr.mxu0 %v5209_v57  ;;  %v7593_v7 = vand.u32 4294901760, %v5239_v14  ;;  %v5261_v13 = vsub.f32 %v5087_v49, %v5125_v54 }
  0x23   :  { %v602_v28 = vand.u32 4294901760, %v601_v60  ;;  %8014 = vst [vmem:[#allocation34_spill] sm:$0xff] %v5243_v61  ;;  %8015 = vst [vmem:[#allocation35_spill] sm:$0xff] %v5245_v34  ;;  %3914 = vmatpush3.msra.mxu1 %v483_v20  ;;  %v608_v60 = vsub.f32 %v5218_v62, %v7590_v50  ;;  %3846 = vmatpush3.msra.mxu0 %v5228_v46  ;;  %v7595_v27 = vand.u32 4294901760, %v5243_v61  ;;  %v5277_v54 = vand.u32 4294901760, %v17_v47 }
  0x24   :  { %8016 = vst [vmem:[#allocation36_spill] sm:$0xff] %v5249_v52  ;;  %8017 = vst [vmem:[#allocation37_spill] sm:$0xff] %v5261_v13  ;;  %v5266_v20 = vsub.f32 %v14_v53, %v5245_v34  ;;  %v5271_v39 = vsub.f32 %v5103_v44, %v5141_v29  ;;  %v496_v49 = vsub.f32 %v5239_v14, %v7593_v7  ;;  %3975 = vmatprep.subr.mxu0 %v4846_v18  ;;  %v16_v7 = vld [vmem:[%s7540_s0 + $0x10] sm:$0xff] }
  0x25   :  { %3915 = vmatprep.subr.mxu1 %v602_v28  ;;  %v609_v50 = vand.u32 4294901760, %v608_v60  ;;  %8019 = vst [vmem:[#allocation39_spill] sm:$0xff] %v5277_v54  ;;  %v177_v53 = vsub.f32 %v5243_v61, %v7595_v27  ;;  %v8020_v44 = vand.u32 4294901760, %v5249_v52  ;;  %v8021_v18 = vand.u32 4294901760, %v5261_v13 }
  0x26   :  { %8018 = vst [vmem:[#allocation38_spill] sm:$0xff] %v5266_v20  ;;  %3916 = vmatpush3.msra.mxu1 %v490_v26  ;;  %v497_v28 = vand.u32 4294901760, %v496_v49  ;;  %v5296_v19 = vsub.f32 %v17_v47, %v5277_v54  ;;  %v8023_v61 = vand.u32 4294901760, %v5266_v20 }
  0x27   :  { %v615_v26 = vsub.f32 %v5249_v52, %v8020_v44  ;;  %3917 = vmatprep.subr.mxu1 %v609_v50  ;;  %v503_v27 = vsub.f32 %v5261_v13, %v8021_v18  ;;  %v5300_v44 = vsub.f32 %v5116_v37, %v5153_v43  ;;  %v178_v60 = vand.u32 4294901760, %v177_v53  ;;  %v19_v37 = vld [vmem:[%s7540_s0 + $0x28] sm:$0xff] }
  0x28   :  { %8022 = vst [vmem:[#allocation40_spill] sm:$0xff] %v5296_v19  ;;  %v183_v29 = vsub.f32 %v5266_v20, %v8023_v61  ;;  %v8024_v50 = vand.u32 4294901760, %v5271_v39  ;;  %3918 = vmatpush3.msra.mxu1 %v497_v28  ;;  %v7607_v18 = vand.u32 4294901760, %v5296_v19  ;;  %v5310_v13 = vand.u32 4294901760, %v16_v7  ;;  %v25_v20 = vld [vmem:[%s7540_s0 + $0x58] sm:$0xff] }
  0x29   :  { %v616_v52 = vand.u32 4294901760, %v615_v26  ;;  %v504_v58 = vand.u32 4294901760, %v503_v27  ;;  %v7606_v47 = vand.u32 4294901760, %v5300_v44  ;;  %179 = vmatprep.mubr.f32.mxu0 %v178_v60  ;;  %v5317_v26 = vsub.f32 %v5130_v33, %v5167_v56 }
  0x2a   :  { %v622_v49 = vsub.f32 %v5271_v39, %v8024_v50  ;;  %8025 = vst [vmem:[#allocation41_spill] sm:$0xff] %v5310_v13  ;;  %v184_v53 = vand.u32 4294901760, %v183_v29  ;;  %v5321_v27 = vsub.f32 %v5158_v51, %v5189_v38  ;;  %v192_v28 = vsub.f32 %v5296_v19, %v7607_v18 }
  0x2b   :  { %3919 = vmatprep.subr.mxu1 %v616_v52  ;;  %v510_v60 = vsub.f32 %v5300_v44, %v7606_v47  ;;  %v5330_v29 = vsub.f32 %v16_v7, %v5310_v13  ;;  %v5334_v33 = vsub.f32 %v5172_v12, %v5209_v57  ;;  %v7610_v51 = vand.u32 4294901760, %v5317_v26  ;;  %v18_v7 = vld [vmem:[%s7540_s0 + $0x20] sm:$0xff]  ;;  %v21_v12 = vld [vmem:[%s7540_s0 + $0x38] sm:$0xff] }
  0x2c   :  { %v623_v61 = vand.u32 4294901760, %v622_v49  ;;  %3920 = vmatpush3.msra.mxu1 %v504_v58  ;;  %185 = vmatmul.mubr.f32.vlgmr.msra.gmra.mxu0 %v184_v53  ;;  %v7612_v58 = vand.u32 4294901760, %v5321_v27  ;;  %v5338_v52 = vand.u32 4294901760, %v19_v37  ;;  %v5342_v50 = vsub.f32 %v5198_v2, %v5228_v46 }
  0x2d   :  { %8026 = vst [vmem:[#allocation42_spill] sm:$0xff] %v5330_v29  ;;  %v193_v49 = vand.u32 4294901760, %v192_v28  ;;  %v511_v53 = vand.u32 4294901760, %v510_v60  ;;  %v7616_v47 = vand.u32 4294901760, %v5334_v33  ;;  %3976 = vmatpush3.msra.mxu0 %v4868_v23  ;;  %v629_v2 = vsub.f32 %v5317_v26, %v7610_v51 }
  0x2e   :  { %3921 = vmatprep.subr.mxu1 %v623_v61  ;;  %8027 = vst [vmem:[#allocation43_spill] sm:$0xff] %v5338_v52  ;;  %8028 = vst [vmem:[#allocation44_spill] sm:$0xff] %v5342_v50  ;;  %v7613_v61 = vand.u32 4294901760, %v5330_v29  ;;  %v517_v18 = vsub.f32 %v5321_v27, %v7612_v58  ;;  %v5360_v19 = vsub.f32 %v19_v37, %v5338_v52  ;;  %3977 = vmatprep.subr.mxu0 %v4874_v25  ;;  %v20_v37 = vld [vmem:[%s7540_s0 + $0x30] sm:$0xff]  ;;  %v22_v25 = vld [vmem:[%s7540_s0 + $0x40] sm:$0xff] }
  0x2f   :  { %194 = vmatprep.mubr.f32.mxu0 %v193_v49  ;;  %3922 = vmatpush3.msra.mxu1 %v511_v53  ;;  %v636_v51 = vsub.f32 %v5334_v33, %v7616_v47  ;;  %v5370_v23 = vand.u32 4294901760, %v18_v7  ;;  %v5372_v58 = vand.u32 4294901760, %v21_v12  ;;  %v23_v49 = vld [vmem:[%s7540_s0 + $0x48] sm:$0xff]  ;;  %v630_v53 = vand.u32 4294901760, %v629_v2 }
  0x30   :  { %8029 = vst [vmem:[#allocation45_spill] sm:$0xff] %v5360_v19  ;;  %v198_v60 = vsub.f32 %v5330_v29, %v7613_v61  ;;  %v518_v28 = vand.u32 4294901760, %v517_v18  ;;  %v7628_v61 = vand.u32 4294901760, %v5360_v19  ;;  %v8032_v29 = vand.u32 4294901760, %v5342_v50  ;;  %3978 = vmatpush3.msra.mxu0 %v4897_v31 }
  0x31   :  { %8030 = vst [vmem:[#allocation46_spill] sm:$0xff] %v5370_v23  ;;  %8031 = vst [vmem:[#allocation47_spill] sm:$0xff] %v5372_v58  ;;  %v637_v57 = vand.u32 4294901760, %v636_v51  ;;  %v5392_v18 = vsub.f32 %v18_v7, %v5370_v23  ;;  %v5395_v2 = vsub.f32 %v21_v12, %v5372_v58  ;;  %3979 = vmatprep.subr.mxu0 %v4906_v35  ;;  %3923 = vmatprep.subr.mxu1 %v630_v53 }
  0x32   :  { %v524_v47 = vsub.f32 %v5342_v50, %v8032_v29  ;;  %v199_v46 = vand.u32 4294901760, %v198_v60  ;;  %v24_v29 = vld [vmem:[%s7540_s0 + $0x50] sm:$0xff]  ;;  %v207_v31 = vsub.f32 %v5360_v19, %v7628_v61  ;;  %v5404_v60 = vand.u32 4294901760, %v20_v37  ;;  %3980 = vmatpush3.msra.mxu0 %v4922_v40  ;;  %3924 = vmatpush3.msra.mxu1 %v518_v28 }
  0x33   :  { %8033 = vst [vmem:[#allocation48_spill] sm:$0xff] %v5392_v18  ;;  %8034 = vst [vmem:[#allocation49_spill] sm:$0xff] %v5395_v2  ;;  %v5406_v51 = vand.u32 4294901760, %v23_v49  ;;  %v7633_v7 = vand.u32 4294901760, %v5392_v18  ;;  %v5411_v35 = vand.u32 4294901760, %v22_v25  ;;  %v5413_v53 = vand.u32 4294901760, %v25_v20  ;;  %3925 = vmatprep.subr.mxu1 %v637_v57  ;;  %3981 = vmatprep.subr.mxu0 %v4936_v45 }
  0x34   :  { %v525_v50 = vand.u32 4294901760, %v524_v47  ;;  %8035 = vst [vmem:[#allocation50_spill] sm:$0xff] %v5404_v60  ;;  %200 = vmatmul.mubr.f32.gmra.mxu0 %v199_v46  ;;  %v27_v47 = vld [vmem:[%s7540_s0 + $0x68] sm:$0xff]  ;;  %v208_v61 = vand.u32 4294901760, %v207_v31  ;;  %v5419_v19 = vsub.f32 %v20_v37, %v5404_v60  ;;  %v5425_v28 = vand.u32 4294901760, %v24_v29 }
  0x35   :  { %8036 = vst [vmem:[#allocation51_spill] sm:$0xff] %v5406_v51  ;;  %8037 = vst [vmem:[#allocation52_spill] sm:$0xff] %v5411_v35  ;;  %v5422_v46 = vsub.f32 %v23_v49, %v5406_v51  ;;  %v213_v12 = vsub.f32 %v5392_v18, %v7633_v7  ;;  %v8042_v40 = vand.u32 4294901760, %v5395_v2  ;;  %v5434_v31 = vsub.f32 %v22_v25, %v5411_v35  ;;  %v26_v25 = vld [vmem:[%s7540_s0 + $0x60] sm:$0xff] }
  0x36   :  { %8038 = vst [vmem:[#allocation53_spill] sm:$0xff] %v5413_v53  ;;  %8039 = vst [vmem:[#allocation54_spill] sm:$0xff] %v5419_v19  ;;  %3926 = vmatpush3.msra.mxu1 %v525_v50  ;;  %v5437_v37 = vsub.f32 %v25_v20, %v5413_v53  ;;  %209 = vmatprep.mubr.f32.mxu0 %v208_v61  ;;  %v7640_v49 = vand.u32 4294901760, %v5419_v19  ;;  %v5443_v45 = vsub.f32 %v24_v29, %v5425_v28 }
  0x37   :  { %8040 = vst [vmem:[#allocation55_spill] sm:$0xff] %v5422_v46  ;;  %8041 = vst [vmem:[#allocation56_spill] sm:$0xff] %v5425_v28  ;;  %v222_v57 = vsub.f32 %v5395_v2, %v8042_v40  ;;  %642 = vmatmul.mubr.f32.vlgmr.msra.gmra.mxu1 %v5245_v34  ;;  %v5445_v7 = vand.u32 4294901760, %v27_v47  ;;  %v29_v40 = vld [vmem:[%s7540_s0 + $0x78] sm:$0xff]  ;;  %v214_v20 = vand.u32 4294901760, %v213_v12  ;;  %4055 = vmatprep.subr.mxu1 %v4808_v3  ;;  %v7645_v50 = vand.u32 4294901760, %v5434_v31 }
  0x38   :  { %8043 = vst [vmem:[#allocation57_spill] sm:$0xff] %v5434_v31  ;;  %8044 = vst [vmem:[#allocation58_spill] sm:$0xff] %v5437_v37  ;;  %647 = vmatprep.mubr.f32.mxu1 %v5277_v54  ;;  %4056 = vmatpush3.msra.mxu1 %v4810_v4  ;;  %v228_v34 = vsub.f32 %v5419_v19, %v7640_v49  ;;  %v8047_v2 = vand.u32 4294901760, %v5422_v46  ;;  %v8049_v49 = vand.u32 4294901760, %v5437_v37  ;;  %v5476_v19 = vand.u32 4294901760, %v26_v25 }
  0x39   :  { %8045 = vst [vmem:[#allocation59_spill] sm:$0xff] %v5443_v45  ;;  %8046 = vst [vmem:[#allocation60_spill] sm:$0xff] %v5445_v7  ;;  %v223_v61 = vand.u32 4294901760, %v222_v57  ;;  %3982 = vmatpush3.msra.mxu0 %v4971_v59  ;;  %v5467_v57 = vsub.f32 %v27_v47, %v5445_v7  ;;  %4057 = vmatprep.subr.mxu1 %v4812_v5  ;;  %v243_v29 = vsub.f32 %v5434_v31, %v7645_v50  ;;  %v28_v47 = vld [vmem:[%s7540_s0 + $0x70] sm:$0xff] }
  0x3a   :  { %v237_v18 = vsub.f32 %v5422_v46, %v8047_v2  ;;  %215 = vmatmul.mubr.f32.gmra.mxu0 %v214_v20  ;;  %v252_v54 = vsub.f32 %v5437_v37, %v8049_v49  ;;  %8050 = vst [vmem:[#allocation62_spill] sm:$0xff] %v5476_v19  ;;  %v5478_v2 = vand.u32 4294901760, %v29_v40  ;;  %v31_v20 = vld [vmem:[%s7540_s0 + $0x88] sm:$0xff]  ;;  %v229_v12 = vand.u32 4294901760, %v228_v34  ;;  %v30_v49 = vld [vmem:[%s7540_s0 + $0x80] sm:$0xff]  ;;  %4058 = vmatpush3.msra.mxu1 %v4823_v9  ;;  %v33_v34 = vld [vmem:[%s7540_s0 + $0x98] sm:$0xff] }
  0x3b   :  { %8048 = vst [vmem:[#allocation61_spill] sm:$0xff] %v5467_v57  ;;  %224 = vmatprep.mubr.f32.mxu0 %v223_v61  ;;  %649 = vmatmul.mubr.f32.gmra.mxu1 %v5310_v13  ;;  %v5494_v37 = vsub.f32 %v26_v25, %v5476_v19  ;;  %v8054_v61 = vand.u32 4294901760, %v5443_v45  ;;  %v5509_v25 = vand.u32 4294901760, %v31_v20  ;;  %v8057_v13 = vand.u32 4294901760, %v5467_v57 }
  0x3c   :  { %8051 = vst [vmem:[#allocation63_spill] sm:$0xff] %v5478_v2  ;;  %v238_v50 = vand.u32 4294901760, %v237_v18  ;;  %654 = vmatprep.mubr.f32.mxu1 %v5338_v52  ;;  %v5497_v59 = vsub.f32 %v29_v40, %v5478_v2  ;;  %v244_v18 = vand.u32 4294901760, %v243_v29  ;;  %4059 = vmatprep.subr.mxu1 %v4825_v10  ;;  %v5507_v52 = vand.u32 4294901760, %v28_v47 }
  0x3d   :  { %8052 = vst [vmem:[#allocation64_spill] sm:$0xff] %v5494_v37  ;;  %v258_v31 = vsub.f32 %v5443_v45, %v8054_v61  ;;  %3983 = vmatprep.subr.mxu0 %v4986_v0  ;;  %8056 = vst [vmem:[#allocation67_spill] sm:$0xff] %v5509_v25  ;;  %4060 = vmatpush3.msra.mxu1 %v4827_v11  ;;  %v253_v40 = vand.u32 4294901760, %v252_v54  ;;  %v267_v29 = vsub.f32 %v5467_v57, %v8057_v13  ;;  %v32_v61 = vld [vmem:[%s7540_s0 + $0x90] sm:$0xff] }
  0x3e   :  { %8053 = vst [vmem:[#allocation65_spill] sm:$0xff] %v5497_v59  ;;  %8055 = vst [vmem:[#allocation66_spill] sm:$0xff] %v5507_v52  ;;  %230 = vmatmul.mubr.f32.gmra.mxu0 %v229_v12  ;;  %v5516_v10 = vand.u32 4294901760, %v30_v49  ;;  %v5524_v45 = vsub.f32 %v28_v47, %v5507_v52  ;;  %v5527_v54 = vsub.f32 %v31_v20, %v5509_v25  ;;  %v5529_v13 = vand.u32 4294901760, %v33_v34 }
  0x3f   :  { %239 = vmatprep.mubr.f32.mxu0 %v238_v50  ;;  %656 = vmatmul.mubr.f32.gmra.mxu1 %v5370_v23  ;;  %v35_v50 = vld [vmem:[%s7540_s0 + $0xa8] sm:$0xff]  ;;  %v259_v46 = vand.u32 4294901760, %v258_v31  ;;  %v5538_v47 = vand.u32 4294901760, %v32_v61  ;;  %v268_v20 = vand.u32 4294901760, %v267_v29  ;;  %v8063_v12 = vand.u32 4294901760, %v5494_v37  ;;  %v34_v31 = vld [vmem:[%s7540_s0 + $0xa0] sm:$0xff] }
  0x40   :  { %8058 = vst [vmem:[#allocation68_spill] sm:$0xff] %v5516_v10  ;;  %8059 = vst [vmem:[#allocation69_spill] sm:$0xff] %v5524_v45  ;;  %661 = vmatprep.mubr.f32.mxu1 %v5372_v58  ;;  %4061 = vmatprep.subr.mxu1 %v4839_v15  ;;  %v5546_v57 = vsub.f32 %v30_v49, %v5516_v10  ;;  %v5559_v58 = vand.u32 4294901760, %v35_v50  ;;  %v37_v49 = vld [vmem:[%s7540_s0 + $0xb8] sm:$0xff] }
  0x41   :  { %8060 = vst [vmem:[#allocation70_spill] sm:$0xff] %v5527_v54  ;;  %8061 = vst [vmem:[#allocation71_spill] sm:$0xff] %v5529_v13  ;;  %4062 = vmatpush3.msra.mxu1 %v4841_v16  ;;  %3984 = vmatpush3.msra.mxu0 %v5000_v8  ;;  %v273_v23 = vsub.f32 %v5494_v37, %v8063_v12  ;;  %v5557_v37 = vsub.f32 %v33_v34, %v5529_v13  ;;  %v8070_v12 = vand.u32 4294901760, %v5524_v45 }
  0x42   :  { %8062 = vst [vmem:[#allocation72_spill] sm:$0xff] %v5538_v47  ;;  %245 = vmatmul.mubr.f32.gmra.mxu0 %v244_v18  ;;  %4063 = vmatprep.subr.mxu1 %v4843_v17  ;;  %8064 = vst [vmem:[#allocation73_spill] sm:$0xff] %v5546_v57  ;;  %v8065_v18 = vand.u32 4294901760, %v5497_v59 }
  0x43   :  { %254 = vmatprep.mubr.f32.mxu0 %v253_v40  ;;  %663 = vmatmul.mubr.f32.gmra.mxu1 %v5404_v60  ;;  %8066 = vst [vmem:[#allocation74_spill] sm:$0xff] %v5557_v37  ;;  %8067 = vst [vmem:[#allocation75_spill] sm:$0xff] %v5559_v58  ;;  %v5569_v40 = vsub.f32 %v32_v61, %v5538_v47  ;;  %v274_v34 = vand.u32 4294901760, %v273_v23  ;;  %v288_v60 = vsub.f32 %v5524_v45, %v8070_v12  ;;  %v36_v12 = vld [vmem:[%s7540_s0 + $0xb0] sm:$0xff] }
  0x44   :  { %v282_v29 = vsub.f32 %v5497_v59, %v8065_v18  ;;  %668 = vmatprep.mubr.f32.mxu1 %v5406_v51  ;;  %4064 = vmatpush3.msra.mxu1 %v4865_v22  ;;  %v5571_v18 = vand.u32 4294901760, %v34_v31  ;;  %v7682_v51 = vand.u32 4294901760, %v5546_v57  ;;  %v5578_v59 = vand.u32 4294901760, %v37_v49  ;;  %v40_v45 = vld [vmem:[%s7540_s0 + $0xd0] sm:$0xff] }
  0x45   :  { %3985 = vmatprep.subr.mxu0 %v5014_v42  ;;  %4065 = vmatprep.subr.mxu1 %v4871_v24  ;;  %8068 = vst [vmem:[#allocation76_spill] sm:$0xff] %v5569_v40  ;;  %v8072_v61 = vand.u32 4294901760, %v5527_v54 }
  0x46   :  { %8069 = vst [vmem:[#allocation77_spill] sm:$0xff] %v5571_v18  ;;  %260 = vmatmul.mubr.f32.gmra.mxu0 %v259_v46  ;;  %4066 = vmatpush3.msra.mxu1 %v4894_v30  ;;  %8071 = vst [vmem:[#allocation78_spill] sm:$0xff] %v5578_v59  ;;  %v283_v24 = vand.u32 4294901760, %v282_v29  ;;  %v5586_v46 = vsub.f32 %v35_v50, %v5559_v58  ;;  %v5600_v50 = vsub.f32 %v34_v31, %v5571_v18 }
  0x47   :  { %269 = vmatprep.mubr.f32.mxu0 %v268_v20  ;;  %670 = vmatmul.mubr.f32.gmra.mxu1 %v5411_v35  ;;  %v297_v22 = vsub.f32 %v5527_v54, %v8072_v61  ;;  %v39_v20 = vld [vmem:[%s7540_s0 + $0xc8] sm:$0xff]  ;;  %v289_v61 = vand.u32 4294901760, %v288_v60  ;;  %v303_v23 = vsub.f32 %v5546_v57, %v7682_v51  ;;  %v5609_v35 = vand.u32 4294901760, %v36_v12  ;;  %v38_v51 = vld [vmem:[%s7540_s0 + $0xc0] sm:$0xff] }
  0x48   :  { %8073 = vst [vmem:[#allocation79_spill] sm:$0xff] %v5586_v46  ;;  %675 = vmatprep.mubr.f32.mxu1 %v5413_v53  ;;  %3986 = vmatpush3.msra.mxu0 %v5026_v48  ;;  %8074 = vst [vmem:[#allocation80_spill] sm:$0xff] %v5600_v50  ;;  %v5607_v53 = vsub.f32 %v37_v49, %v5578_v59  ;;  %v8076_v31 = vand.u32 4294901760, %v5557_v37  ;;  %v5616_v54 = vand.u32 4294901760, %v39_v20  ;;  %v5637_v57 = vand.u32 4294901760, %v38_v51 }
  0x49   :  { %3987 = vmatprep.subr.mxu0 %v5043_v21  ;;  %4067 = vmatprep.subr.mxu1 %v4900_v32  ;;  %v298_v29 = vand.u32 4294901760, %v297_v22  ;;  %v41_v22 = vld [vmem:[%s7540_s0 + $0xd8] sm:$0xff]  ;;  %v304_v60 = vand.u32 4294901760, %v303_v23 }
  0x4a   :  { %275 = vmatmul.mubr.f32.gmra.mxu0 %v274_v34  ;;  %4068 = vmatpush3.msra.mxu1 %v4909_v36  ;;  %8075 = vst [vmem:[#allocation81_spill] sm:$0xff] %v5607_v53  ;;  %v312_v34 = vsub.f32 %v5557_v37, %v8076_v31  ;;  %8077 = vst [vmem:[#allocation82_spill] sm:$0xff] %v5616_v54  ;;  %v5635_v37 = vsub.f32 %v36_v12, %v5609_v35  ;;  %v8085_v12 = vld [vmem:[#allocation22_spill] sm:$0xff] }
  0x4b   :  { %284 = vmatprep.mubr.f32.mxu0 %v283_v24  ;;  %677 = vmatmul.mubr.f32.gmra.mxu1 %v5425_v28  ;;  %v8078_v24 = vand.u32 4294901760, %v5569_v40  ;;  %v8079_v28 = vld [vmem:[#allocation13_spill] sm:$0xff]  ;;  %8081 = vst [vmem:[#allocation84_spill] sm:$0xff] %v5637_v57  ;;  %v5647_v31 = vsub.f32 %v39_v20, %v5616_v54  ;;  %v5661_v20 = vand.u32 4294901760, %v40_v45 }
  0x4c   :  { %682 = vmatprep.mubr.f32.mxu1 %v5445_v7  ;;  %3988 = vmatpush3.msra.mxu0 %v5055_v6  ;;  %8080 = vst [vmem:[#allocation83_spill] sm:$0xff] %v5635_v37  ;;  %v5649_v7 = vand.u32 4294901760, %v41_v22 }
  0x4d   :  { %3989 = vmatprep.subr.mxu0 %v5082_v55  ;;  %v318_v49 = vsub.f32 %v5569_v40, %v8078_v24  ;;  %4069 = vmatprep.subr.mxu1 %v4925_v41  ;;  %v313_v24 = vand.u32 4294901760, %v312_v34  ;;  %8083 = vst [vmem:[#allocation85_spill] sm:$0xff] %v5647_v31  ;;  %v8086_v40 = vld [vmem:[#allocation24_spill] sm:$0xff]  ;;  %v8087_v34 = vand.u32 4294901760, %v5600_v50  ;;  %8089 = vst [vmem:[#allocation87_spill] sm:$0xff] %v5661_v20  ;;  %v8093_v41 = vld [vmem:[#allocation26_spill] sm:$0xff] }
  0x4e   :  { %290 = vmatmul.mubr.f32.gmra.mxu0 %v289_v61  ;;  %4070 = vmatpush3.msra.mxu1 %v8079_v28  ;;  %v8082_v61 = vand.u32 4294901760, %v5586_v46  ;;  %8084 = vst [vmem:[#allocation86_spill] sm:$0xff] %v5649_v7  ;;  %v8090_v28 = vld [vmem:[#allocation16_spill] sm:$0xff] }
  0x4f   :  { %299 = vmatprep.mubr.f32.mxu0 %v298_v29  ;;  %684 = vmatmul.mubr.f32.gmra.mxu1 %v5476_v19  ;;  %v43_v29 = vld [vmem:[%s7540_s0 + $0xe8] sm:$0xff]  ;;  %v333_v19 = vsub.f32 %v5600_v50, %v8087_v34  ;;  %v8095_v50 = vld [vmem:[#allocation17_spill] sm:$0xff] }
  0x50   :  { %v327_v23 = vsub.f32 %v5586_v46, %v8082_v61  ;;  %689 = vmatprep.mubr.f32.mxu1 %v5478_v2  ;;  %3990 = vmatpush3.msra.mxu0 %v8085_v12  ;;  %v8088_v61 = vld [vmem:[#allocation15_spill] sm:$0xff]  ;;  %v319_v46 = vand.u32 4294901760, %v318_v49  ;;  %v8091_v2 = vand.u32 4294901760, %v5607_v53  ;;  %v5676_v49 = vand.u32 4294901760, %v43_v29 }
  0x51   :  { %3991 = vmatprep.subr.mxu0 %v8086_v40  ;;  %4071 = vmatprep.subr.mxu1 %v8088_v61  ;;  %v5669_v40 = vsub.f32 %v38_v51, %v5637_v57  ;;  %v45_v51 = vld [vmem:[%s7540_s0 + $0xf8] sm:$0xff] }
  0x52   :  { %305 = vmatmul.mubr.f32.gmra.mxu0 %v304_v60  ;;  %4072 = vmatpush3.msra.mxu1 %v8090_v28  ;;  %v342_v12 = vsub.f32 %v5607_v53, %v8091_v2  ;;  %v328_v34 = vand.u32 4294901760, %v327_v23  ;;  %v5674_v60 = vsub.f32 %v41_v22, %v5649_v7  ;;  %8092 = vst [vmem:[#allocation88_spill] sm:$0xff] %v5676_v49  ;;  %v42_v2 = vld [vmem:[%s7540_s0 + $0xe0] sm:$0xff]  ;;  %v8094_v23 = vld [vmem:[#allocation28_spill] sm:$0xff]  ;;  %v8096_v53 = vand.u32 4294901760, %v5635_v37 }
  0x53   :  { %314 = vmatprep.mubr.f32.mxu0 %v313_v24  ;;  %691 = vmatmul.mubr.f32.gmra.mxu1 %v5507_v52  ;;  %v334_v24 = vand.u32 4294901760, %v333_v19  ;;  %v5689_v22 = vsub.f32 %v40_v45, %v5661_v20  ;;  %v8097_v28 = vld [vmem:[#allocation18_spill] sm:$0xff]  ;;  %v5696_v61 = vand.u32 4294901760, %v42_v2  ;;  %v8099_v19 = vand.u32 4294901760, %v5647_v31 }
  0x54   :  { %696 = vmatprep.mubr.f32.mxu1 %v5509_v25  ;;  %3992 = vmatpush3.msra.mxu0 %v8093_v41  ;;  %v343_v52 = vand.u32 4294901760, %v342_v12  ;;  %v348_v25 = vsub.f32 %v5635_v37, %v8096_v53  ;;  %v5704_v12 = vsub.f32 %v43_v29, %v5676_v49  ;;  %v44_v53 = vld [vmem:[%s7540_s0 + $0xf0] sm:$0xff]  ;;  %v8102_v41 = vld [vmem:[#allocation30_spill] sm:$0xff]  ;;  %v8104_v29 = vand.u32 4294901760, %v5669_v40 }
  0x55   :  { %3993 = vmatprep.subr.mxu0 %v8094_v23  ;;  %4073 = vmatprep.subr.mxu1 %v8095_v50  ;;  %8098 = vst [vmem:[#allocation28_spill] sm:$0xff] %v5696_v61  ;;  %v357_v45 = vsub.f32 %v5647_v31, %v8099_v19  ;;  %v5706_v50 = vand.u32 4294901760, %v45_v51  ;;  %v8105_v37 = vld [vmem:[#allocation20_spill] sm:$0xff] }
  0x56   :  { %320 = vmatmul.mubr.f32.gmra.mxu0 %v319_v46  ;;  %4074 = vmatpush3.msra.mxu1 %v8097_v28  ;;  %v349_v46 = vand.u32 4294901760, %v348_v25  ;;  %v363_v31 = vsub.f32 %v5669_v40, %v8104_v29  ;;  %v5721_v28 = vsub.f32 %v42_v2, %v5696_v61  ;;  %v8108_v2 = vld [vmem:[#allocation21_spill] sm:$0xff] }
  0x57   :  { %329 = vmatprep.mubr.f32.mxu0 %v328_v34  ;;  %698 = vmatmul.mubr.f32.gmra.mxu1 %v5516_v10  ;;  %8100 = vst [vmem:[#allocation89_spill] sm:$0xff] %v5706_v50  ;;  %v8101_v34 = vld [vmem:[#allocation29_spill] sm:$0xff]  ;;  %v8103_v10 = vld [vmem:[#allocation19_spill] sm:$0xff]  ;;  %v5731_v19 = vsub.f32 %v45_v51, %v5706_v50 }
  0x58   :  { %703 = vmatprep.mubr.f32.mxu1 %v5529_v13  ;;  %3994 = vmatpush3.msra.mxu0 %v8101_v34  ;;  %v5723_v13 = vand.u32 4294901760, %v44_v53 }
  0x59   :  { %3995 = vmatprep.subr.mxu0 %v8102_v41  ;;  %4075 = vmatprep.subr.mxu1 %v8103_v10  ;;  %v358_v41 = vand.u32 4294901760, %v357_v45  ;;  %v8107_v10 = vand.u32 4294901760, %v5674_v60  ;;  %v8109_v45 = vand.u32 4294901760, %v5689_v22 }
  0x5a   :  { %335 = vmatmul.mubr.f32.gmra.mxu0 %v334_v24  ;;  %4076 = vmatpush3.msra.mxu1 %v8105_v37  ;;  %8106 = vst [vmem:[#allocation29_spill] sm:$0xff] %v5723_v13  ;;  %v5743_v51 = vsub.f32 %v44_v53, %v5723_v13 }
  0x5b   :  { %344 = vmatprep.mubr.f32.mxu0 %v343_v52  ;;  %705 = vmatmul.mubr.f32.gmra.mxu1 %v5538_v47  ;;  %v372_v24 = vsub.f32 %v5674_v60, %v8107_v10  ;;  %v364_v52 = vand.u32 4294901760, %v363_v31  ;;  %v378_v29 = vsub.f32 %v5689_v22, %v8109_v45  ;;  %v8111_v45 = vld [vmem:[#allocation36_spill] sm:$0xff]  ;;  %v8112_v10 = vld [vmem:[#allocation23_spill] sm:$0xff] }
  0x5c   :  { %710 = vmatprep.mubr.f32.mxu1 %v5559_v58  ;;  %3996 = vmatpush3.msra.mxu0 %v5193_v1  ;;  %v8110_v58 = vand.u32 4294901760, %v5704_v12 }
  0x5d   :  { %3997 = vmatprep.subr.mxu0 %v5218_v62  ;;  %4077 = vmatprep.subr.mxu1 %v8108_v2  ;;  %v373_v25 = vand.u32 4294901760, %v372_v24  ;;  %v379_v53 = vand.u32 4294901760, %v378_v29  ;;  %v8117_v29 = vld [vmem:[#allocation27_spill] sm:$0xff] }
  0x5e   :  { %350 = vmatmul.mubr.f32.gmra.mxu0 %v349_v46  ;;  %4078 = vmatpush3.msra.mxu1 %v5094_v63  ;;  %v387_v46 = vsub.f32 %v5704_v12, %v8110_v58  ;;  %v7726_v58 = vand.u32 4294901760, %v5743_v51 }
  0x5f   :  { %359 = vmatprep.mubr.f32.mxu0 %v358_v41  ;;  %712 = vmatmul.mubr.f32.gmra.mxu1 %v5571_v18  ;;  %v8113_v41 = vand.u32 4294901760, %v5721_v28  ;;  %v8114_v18 = vld [vmem:[#allocation25_spill] sm:$0xff] }
  0x60   :  { %717 = vmatprep.mubr.f32.mxu1 %v5578_v59  ;;  %3998 = vmatpush3.msra.mxu0 %v5239_v14  ;;  %v388_v31 = vand.u32 4294901760, %v387_v46  ;;  %v8115_v59 = vand.u32 4294901760, %v5731_v19 }
  0x61   :  { %3999 = vmatprep.subr.mxu0 %v8111_v45  ;;  %4079 = vmatprep.subr.mxu1 %v8112_v10  ;;  %v393_v24 = vsub.f32 %v5721_v28, %v8113_v41 }
  0x62   :  { %365 = vmatmul.mubr.f32.gmra.mxu0 %v364_v52  ;;  %4080 = vmatpush3.msra.mxu1 %v8114_v18  ;;  %v402_v47 = vsub.f32 %v5731_v19, %v8115_v59  ;;  %v8116_v52 = vld [vmem:[#allocation37_spill] sm:$0xff] }
  0x63   :  { %374 = vmatprep.mubr.f32.mxu0 %v373_v25  ;;  %719 = vmatmul.mubr.f32.gmra.mxu1 %v5609_v35  ;;  %v394_v41 = vand.u32 4294901760, %v393_v24  ;;  %v408_v25 = vsub.f32 %v5743_v51, %v7726_v58  ;;  %v8121_v24 = vld [vmem:[#allocation34_spill] sm:$0xff]  ;;  %v8125_v58 = vld [vmem:[#allocation40_spill] sm:$0xff] }
  0x64   :  { %724 = vmatprep.mubr.f32.mxu1 %v5616_v54  ;;  %4000 = vmatpush3.msra.mxu0 %v8116_v52  ;;  %v403_v59 = vand.u32 4294901760, %v402_v47  ;;  %v8118_v47 = vld [vmem:[#allocation31_spill] sm:$0xff]  ;;  %v8136_v54 = vld [vmem:[#allocation45_spill] sm:$0xff] }
  0x65   :  { %4001 = vmatprep.subr.mxu0 %v5271_v39  ;;  %4081 = vmatprep.subr.mxu1 %v8117_v29  ;;  %v409_v46 = vand.u32 4294901760, %v408_v25 }
  0x66   :  { %380 = vmatmul.mubr.f32.gmra.mxu0 %v379_v53  ;;  %4082 = vmatpush3.msra.mxu1 %v5153_v43  ;;  %v8120_v53 = vld [vmem:[#allocation44_spill] sm:$0xff] }
  0x67   :  { %389 = vmatprep.mubr.f32.mxu0 %v388_v31  ;;  %726 = vmatmul.mubr.f32.gmra.mxu1 %v5637_v57  ;;  %v8119_v31 = vld [vmem:[#allocation32_spill] sm:$0xff] }
  0x68   :  { %731 = vmatprep.mubr.f32.mxu1 %v5649_v7  ;;  %4002 = vmatpush3.msra.mxu0 %v5300_v44 }
  0x69   :  { %4003 = vmatprep.subr.mxu0 %v5317_v26  ;;  %4083 = vmatprep.subr.mxu1 %v5167_v56 }
  0x6a   :  { %395 = vmatmul.mubr.f32.gmra.mxu0 %v394_v41  ;;  %4084 = vmatpush3.msra.mxu1 %v5189_v38  ;;  %v8122_v41 = vld [vmem:[#allocation3_spill] sm:$0xff] }
  0x6b   :  { %404 = vmatprep.mubr.f32.mxu0 %v403_v59  ;;  %733 = vmatmul.mubr.f32.gmra.mxu1 %v5661_v20  ;;  %v8123_v25 = vand.u32 4294901760, %v8122_v41  ;;  %v8124_v59 = vld [vmem:[#allocation38_spill] sm:$0xff]  ;;  %v8128_v20 = vld [vmem:[#allocation7_spill] sm:$0xff]  ;;  %v8131_v41 = vld [vmem:[#allocation8_spill] sm:$0xff] }
  0x6c   :  { %4004 = vmatpush3.msra.mxu0 %v5321_v27  ;;  %738 = vmatprep.mubr.f32.mxu1 %v5676_v49  ;;  %v8129_v7 = vand.u32 4294901760, %v8128_v20 }
  0x6d   :  { %4005 = vmatprep.subr.mxu0 %v5334_v33  ;;  %4085 = vmatprep.subr.mxu1 %v8118_v47 }
  0x6e   :  { %410 = vmatmul.mubr.f32.gmra.mxu0 %v409_v46  ;;  %4086 = vmatpush3.msra.mxu1 %v8119_v31  ;;  %v8126_v46 = vld [vmem:[#allocation5_spill] sm:$0xff] }
  0x6f   :  { %4006 = vmatpush3.msra.mxu0 %v8120_v53  ;;  %882 = vmatprep.mubr.f32.mxu0 %v8121_v24  ;;  %v8127_v49 = vand.u32 4294901760, %v8126_v46  ;;  %v8137_v46 = vld [vmem:[#allocation10_spill] sm:$0xff] }
  0x70   :  { %740 = vmatmul.mubr.f32.gmra.mxu1 %v5696_v61  ;;  %4135 = vmatprep.subr.mxu0 %v8123_v25  ;;  %v8130_v61 = vand.u32 4294901760, %v8121_v24  ;;  %v8132_v25 = vand.u32 4294901760, %v8131_v41  ;;  %v8143_v24 = vld [vmem:[#allocation48_spill] sm:$0xff] }
  0x71   :  { %745 = vmatprep.mubr.f32.mxu1 %v5706_v50  ;;  %4215 = vmatprep.subr.mxu1 %v4808_v3  ;;  %v8133_v50 = vld [vmem:[#allocation42_spill] sm:$0xff]  ;;  %v8134_v3 = vld [vmem:[#allocation9_spill] sm:$0xff] }
  0x72   :  { %885 = vmatmul.mubr.f32.vlgmr.msra.gmra.mxu0 %v8124_v59  ;;  %v8135_v57 = vand.u32 4294901760, %v8134_v3  ;;  %v8145_v41 = vand.u32 4294901760, %v8133_v50  ;;  %v8157_v3 = vand.u32 4294901760, %v5000_v8  ;;  %v8165_v8 = vand.u32 4294901760, %v5026_v48 }
  0x73   :  { %891 = vmatprep.mubr.f32.mxu0 %v8125_v58  ;;  %4136 = vmatpush3.msra.mxu0 %v8127_v49  ;;  %v8138_v49 = vand.u32 4294901760, %v8137_v46  ;;  %v8171_v48 = vand.u32 4294901760, %v5055_v6 }
  0x74   :  { %747 = vmatmul.mubr.f32.gmra.mxu1 %v5723_v13  ;;  %4137 = vmatprep.subr.mxu0 %v8129_v7  ;;  %v8139_v13 = vand.u32 4294901760, %v8124_v59  ;;  %v8140_v7 = vld [vmem:[#allocation12_spill] sm:$0xff]  ;;  %v8147_v59 = vand.u32 4294901760, %v8136_v54 }
  0x75   :  { %1124 = vmatprep.mubr.f32.mxu1 %v8130_v61  ;;  %4138 = vmatpush3.msra.mxu0 %v8132_v25  ;;  %v8141_v20 = vand.u32 4294901760, %v8140_v7  ;;  %v8142_v61 = vand.u32 4294901760, %v8125_v58  ;;  %v8149_v58 = vld [vmem:[#allocation55_spill] sm:$0xff]  ;;  %v8161_v7 = vld [vmem:[#allocation4_spill] sm:$0xff] }
  0x76   :  { %894 = vmatmul.mubr.f32.gmra.mxu0 %v8133_v50  ;;  %4139 = vmatprep.subr.mxu0 %v8135_v57  ;;  %v8144_v57 = vld [vmem:[#allocation49_spill] sm:$0xff]  ;;  %v8153_v50 = vand.u32 4294901760, %v4986_v0  ;;  %v8159_v0 = vand.u32 4294901760, %v5014_v42  ;;  %v8167_v42 = vand.u32 4294901760, %v5043_v21  ;;  %v8173_v21 = vand.u32 4294901760, %v5082_v55 }
  0x77   :  { %900 = vmatprep.mubr.f32.mxu0 %v8136_v54  ;;  %4140 = vmatpush3.msra.mxu0 %v8138_v49  ;;  %v8154_v54 = vand.u32 4294901760, %v8144_v57  ;;  %v8160_v49 = vand.u32 4294901760, %v8149_v58 }
  0x78   :  { %1128 = vmatmul.mubr.f32.vlgmr.msra.gmra.mxu1 %v8139_v13  ;;  %4141 = vmatprep.subr.mxu0 %v8141_v20  ;;  %v8146_v13 = vld [vmem:[#allocation2_spill] sm:$0xff] }
  0x79   :  { %4216 = vmatpush3.msra.mxu1 %v4810_v4  ;;  %1135 = vmatprep.mubr.f32.mxu1 %v8142_v61  ;;  %v8148_v4 = vld [vmem:[#allocation54_spill] sm:$0xff] }
  0x7a   :  { %903 = vmatmul.mubr.f32.gmra.mxu0 %v8143_v24  ;;  %4217 = vmatprep.subr.mxu1 %v4812_v5  ;;  %v8150_v5 = vld [vmem:[#allocation14_spill] sm:$0xff]  ;;  %v8158_v46 = vand.u32 4294901760, %v8148_v4 }
  0x7b   :  { %909 = vmatprep.mubr.f32.mxu0 %v8144_v57  ;;  %4218 = vmatpush3.msra.mxu1 %v4823_v9  ;;  %v8151_v25 = vand.u32 4294901760, %v8150_v5  ;;  %v8152_v9 = vand.u32 4294901760, %v8143_v24  ;;  %v8163_v20 = vld [vmem:[#allocation6_spill] sm:$0xff]  ;;  %v8169_v57 = vld [vmem:[#allocation64_spill] sm:$0xff] }
  0x7c   :  { %1139 = vmatmul.mubr.f32.gmra.mxu1 %v8145_v41  ;;  %4219 = vmatprep.subr.mxu1 %v8146_v13  ;;  %v8170_v41 = vld [vmem:[#allocation65_spill] sm:$0xff]  ;;  %v8180_v5 = vand.u32 4294901760, %v8169_v57 }
  0x7d   :  { %1146 = vmatprep.mubr.f32.mxu1 %v8147_v59  ;;  %4220 = vmatpush3.msra.mxu1 %v4827_v11  ;;  %v8155_v11 = vld [vmem:[#allocation57_spill] sm:$0xff] }
  0x7e   :  { %912 = vmatmul.mubr.f32.gmra.mxu0 %v8148_v4  ;;  %4221 = vmatprep.subr.mxu1 %v4839_v15  ;;  %v8156_v15 = vld [vmem:[#allocation58_spill] sm:$0xff]  ;;  %v8166_v61 = vand.u32 4294901760, %v8155_v11  ;;  %v8176_v4 = vld [vmem:[#allocation11_spill] sm:$0xff] }
  0x7f   :  { %918 = vmatprep.mubr.f32.mxu0 %v8149_v58  ;;  %4142 = vmatpush3.msra.mxu0 %v8151_v25  ;;  %v8168_v24 = vand.u32 4294901760, %v8156_v15  ;;  %v8178_v58 = vld [vmem:[#allocation22_spill] sm:$0xff]  ;;  %v8181_v25 = vld [vmem:[#allocation24_spill] sm:$0xff] }
  0x80   :  { %1150 = vmatmul.mubr.f32.gmra.mxu1 %v8152_v9  ;;  %4143 = vmatprep.subr.mxu0 %v8153_v50  ;;  %v8179_v6 = vand.u32 4294901760, %v8178_v58  ;;  %v8182_v55 = vand.u32 4294901760, %v8181_v25  ;;  %v8183_v9 = vand.u32 4294901760, %v8170_v41  ;;  %v8184_v50 = vld [vmem:[#allocation13_spill] sm:$0xff] }
  0x81   :  { %1157 = vmatprep.mubr.f32.mxu1 %v8154_v54  ;;  %4222 = vmatpush3.msra.mxu1 %v4841_v16  ;;  %v8162_v16 = vld [vmem:[#allocation59_spill] sm:$0xff]  ;;  %v8211_v58 = vld [vmem:[#allocation85_spill] sm:$0xff] }
  0x82   :  { %921 = vmatmul.mubr.f32.gmra.mxu0 %v8155_v11  ;;  %4223 = vmatprep.subr.mxu1 %v4843_v17  ;;  %v8164_v17 = vld [vmem:[#allocation61_spill] sm:$0xff]  ;;  %v8172_v13 = vand.u32 4294901760, %v8162_v16  ;;  %v8186_v54 = vld [vmem:[#allocation15_spill] sm:$0xff]  ;;  %v8187_v11 = vld [vmem:[#allocation74_spill] sm:$0xff] }
  0x83   :  { %927 = vmatprep.mubr.f32.mxu0 %v8156_v15  ;;  %4144 = vmatpush3.msra.mxu0 %v8157_v3  ;;  %v8174_v59 = vand.u32 4294901760, %v8164_v17  ;;  %v8188_v15 = vld [vmem:[#allocation26_spill] sm:$0xff] }
  0x84   :  { %1161 = vmatmul.mubr.f32.gmra.mxu1 %v8158_v46  ;;  %4145 = vmatprep.subr.mxu0 %v8159_v0  ;;  %v8189_v3 = vand.u32 4294901760, %v8188_v15  ;;  %v8191_v0 = vand.u32 4294901760, %v8094_v23  ;;  %v3795_v15 = vld [vmem:[%s7539_s1 + $0x1e0] sm:$0xff] }
  0x85   :  { %1168 = vmatprep.mubr.f32.mxu1 %v8160_v49  ;;  %4224 = vmatpush3.msra.mxu1 %v8161_v7  ;;  %v8193_v7 = vld [vmem:[#allocation16_spill] sm:$0xff] }
  0x86   :  { %930 = vmatmul.mubr.f32.gmra.mxu0 %v8162_v16  ;;  %4225 = vmatprep.subr.mxu1 %v8163_v20  ;;  %v8194_v16 = vld [vmem:[#allocation76_spill] sm:$0xff]  ;;  %v8195_v20 = vld [vmem:[#allocation17_spill] sm:$0xff] }
  0x87   :  { %936 = vmatprep.mubr.f32.mxu0 %v8164_v17  ;;  %4146 = vmatpush3.msra.mxu0 %v8165_v8  ;;  %v8196_v17 = vld [vmem:[#allocation79_spill] sm:$0xff]  ;;  %v8197_v8 = vand.u32 4294901760, %v8101_v34  ;;  %v8206_v34 = vand.u32 4294901760, %v5193_v1 }
  0x88   :  { %1172 = vmatmul.mubr.f32.gmra.mxu1 %v8166_v61  ;;  %4147 = vmatprep.subr.mxu0 %v8167_v42  ;;  %v8199_v42 = vld [vmem:[#allocation30_spill] sm:$0xff] }
  0x89   :  { %1179 = vmatprep.mubr.f32.mxu1 %v8168_v24  ;;  %4226 = vmatpush3.msra.mxu1 %v4894_v30  ;;  %v8175_v30 = vld [vmem:[#allocation69_spill] sm:$0xff]  ;;  %v8200_v23 = vand.u32 4294901760, %v8199_v42  ;;  %v8201_v24 = vand.u32 4294901760, %v8187_v11 }
  0x8a   :  { %939 = vmatmul.mubr.f32.gmra.mxu0 %v8169_v57  ;;  %4227 = vmatprep.subr.mxu1 %v4900_v32  ;;  %v8177_v32 = vld [vmem:[#allocation70_spill] sm:$0xff]  ;;  %v8190_v46 = vand.u32 4294901760, %v8175_v30 }
  0x8b   :  { %945 = vmatprep.mubr.f32.mxu0 %v8170_v41  ;;  %4148 = vmatpush3.msra.mxu0 %v8171_v48  ;;  %v8192_v49 = vand.u32 4294901760, %v8177_v32  ;;  %v8202_v57 = vld [vmem:[#allocation18_spill] sm:$0xff]  ;;  %v8203_v41 = vld [vmem:[#allocation80_spill] sm:$0xff]  ;;  %v8204_v48 = vld [vmem:[#allocation19_spill] sm:$0xff] }
  0x8c   :  { %1183 = vmatmul.mubr.f32.gmra.mxu1 %v8172_v13  ;;  %4149 = vmatprep.subr.mxu0 %v8173_v21  ;;  %v8205_v13 = vld [vmem:[#allocation81_spill] sm:$0xff] }
  0x8d   :  { %1190 = vmatprep.mubr.f32.mxu1 %v8174_v59  ;;  %4228 = vmatpush3.msra.mxu1 %v4909_v36  ;;  %v8185_v36 = vld [vmem:[#allocation73_spill] sm:$0xff]  ;;  %v8207_v59 = vand.u32 4294901760, %v8194_v16  ;;  %v8215_v25 = vand.u32 4294901760, %v8205_v13 }
  0x8e   :  { %948 = vmatmul.mubr.f32.gmra.mxu0 %v8175_v30  ;;  %4229 = vmatprep.subr.mxu1 %v8176_v4  ;;  %v8198_v61 = vand.u32 4294901760, %v8185_v36  ;;  %v3798_v21 = vld [vmem:[%s7539_s1 + $0x1f8] sm:$0xff]  ;;  %v8208_v30 = vand.u32 4294901760, %v5218_v62  ;;  %v8209_v4 = vand.u32 4294901760, %v8196_v17  ;;  %v8214_v62 = vand.u32 4294901760, %v8111_v45 }
  0x8f   :  { %954 = vmatprep.mubr.f32.mxu0 %v8177_v32  ;;  %4150 = vmatpush3.msra.mxu0 %v8179_v6  ;;  %v8210_v32 = vld [vmem:[#allocation83_spill] sm:$0xff]  ;;  %v5925_v1 = vand.u32 4294901760, %v3798_v21  ;;  %v8212_v6 = vand.u32 4294901760, %v5239_v14 }
  0x90   :  { %1194 = vmatmul.mubr.f32.gmra.mxu1 %v8180_v5  ;;  %4151 = vmatprep.subr.mxu0 %v8182_v55  ;;  %v8213_v5 = vand.u32 4294901760, %v8203_v41  ;;  %v8217_v45 = vand.u32 4294901760, %v8210_v32  ;;  %v8218_v55 = vand.u32 4294901760, %v5271_v39 }
  0x91   :  { %1201 = vmatprep.mubr.f32.mxu1 %v8183_v9  ;;  %4230 = vmatpush3.msra.mxu1 %v8184_v50  ;;  %v5943_v14 = vsub.f32 %v3798_v21, %v5925_v1  ;;  %v8220_v50 = vand.u32 4294901760, %v8211_v58 }
  0x92   :  { %957 = vmatmul.mubr.f32.gmra.mxu0 %v8185_v36  ;;  %4231 = vmatprep.subr.mxu1 %v8186_v54  ;;  %v3780_v54 = vld [vmem:[%s7539_s1 + $0x168] sm:$0xff] }
  0x93   :  { %963 = vmatprep.mubr.f32.mxu0 %v8187_v11  ;;  %4152 = vmatpush3.msra.mxu0 %v8189_v3  ;;  %v7759_v39 = vand.u32 4294901760, %v5943_v14  ;;  %v8224_v3 = vand.u32 4294901760, %v5317_v26 }
  0x94   :  { %1205 = vmatmul.mubr.f32.gmra.mxu1 %v8190_v46  ;;  %4153 = vmatprep.subr.mxu0 %v8191_v0 }
  0x95   :  { %1212 = vmatprep.mubr.f32.mxu1 %v8192_v49  ;;  %4232 = vmatpush3.msra.mxu1 %v8193_v7  ;;  %v8226_v49 = vand.u32 4294901760, %v5321_v27  ;;  %v5995_v7 = vand.u32 4294901760, %v3780_v54  ;;  %v2390_v26 = vsub.f32 %v5943_v14, %v7759_v39  ;;  %v3779_v27 = vld [vmem:[%s7539_s1 + $0x160] sm:$0xff] }
  0x96   :  { %966 = vmatmul.mubr.f32.gmra.mxu0 %v8194_v16  ;;  %4233 = vmatprep.subr.mxu1 %v8195_v20  ;;  %v6005_v16 = vand.u32 4294901760, %v3795_v15 }
  0x97   :  { %972 = vmatprep.mubr.f32.mxu0 %v8196_v17  ;;  %4154 = vmatpush3.msra.mxu0 %v8197_v8  ;;  %v8228_v17 = vand.u32 4294901760, %v5689_v22  ;;  %v8229_v8 = vand.u32 4294901760, %v8120_v53  ;;  %v2391_v53 = vand.u32 4294901760, %v2390_v26  ;;  %v3791_v26 = vld [vmem:[%s7539_s1 + $0x1c0] sm:$0xff] }
  0x98   :  { %1216 = vmatmul.mubr.f32.gmra.mxu1 %v8198_v61  ;;  %4155 = vmatprep.subr.mxu0 %v8200_v23  ;;  %v8230_v23 = vand.u32 4294901760, %v5704_v12 }
  0x99   :  { %1223 = vmatprep.mubr.f32.mxu1 %v8201_v24  ;;  %4234 = vmatpush3.msra.mxu1 %v8202_v57  ;;  %v6033_v24 = vand.u32 4294901760, %v3779_v27 }
  0x9a   :  { %975 = vmatmul.mubr.f32.gmra.mxu0 %v8203_v41  ;;  %4235 = vmatprep.subr.mxu1 %v8204_v48  ;;  %v6041_v41 = vsub.f32 %v3795_v15, %v6005_v16 }
  0x9b   :  { %981 = vmatprep.mubr.f32.mxu0 %v8205_v13  ;;  %4156 = vmatpush3.msra.mxu0 %v8206_v34  ;;  %v8232_v13 = vand.u32 4294901760, %v5721_v28 }
  0x9c   :  { %1227 = vmatmul.mubr.f32.gmra.mxu1 %v8207_v59  ;;  %4157 = vmatprep.subr.mxu0 %v8208_v30  ;;  %v8233_v59 = vand.u32 4294901760, %v5731_v19  ;;  %v6064_v30 = vsub.f32 %v3779_v27, %v6033_v24 }
  0x9d   :  { %1234 = vmatprep.mubr.f32.mxu1 %v8209_v4  ;;  %4236 = vmatpush3.msra.mxu1 %v8105_v37  ;;  %v3782_v37 = vld [vmem:[%s7539_s1 + $0x178] sm:$0xff] }
  0x9e   :  { %984 = vmatmul.mubr.f32.gmra.mxu0 %v8210_v32  ;;  %4237 = vmatprep.subr.mxu1 %v8108_v2  ;;  %v8216_v2 = vand.u32 4294901760, %v8116_v52  ;;  %v5955_v9 = vand.u32 4294901760, %v3782_v37  ;;  %v3796_v52 = vld [vmem:[%s7539_s1 + $0x1e8] sm:$0xff]  ;;  %v3777_v32 = vld [vmem:[%s7539_s1 + $0x150] sm:$0xff] }
  0x9f   :  { %990 = vmatprep.mubr.f32.mxu0 %v8211_v58  ;;  %4158 = vmatpush3.msra.mxu0 %v8212_v6  ;;  %v5989_v0 = vand.u32 4294901760, %v3796_v52  ;;  %v8235_v58 = vld [vmem:[#allocation35_spill] sm:$0xff] }
  0xa0   :  { %1238 = vmatmul.mubr.f32.gmra.mxu1 %v8213_v5  ;;  %4159 = vmatprep.subr.mxu0 %v8214_v62  ;;  %8219 = vst [vmem:[#allocation20_spill] sm:$0xff] %v5955_v9  ;;  %v5987_v46 = vsub.f32 %v3782_v37, %v5955_v9  ;;  %v8236_v5 = vld [vmem:[#allocation39_spill] sm:$0xff]  ;;  %v8237_v37 = vand.u32 4294901760, %v5743_v51 }
  0xa1   :  { %1245 = vmatprep.mubr.f32.mxu1 %v8215_v25  ;;  %4238 = vmatpush3.msra.mxu1 %v5094_v63  ;;  %v3797_v63 = vld [vmem:[%s7539_s1 + $0x1f0] sm:$0xff]  ;;  %v6025_v42 = vsub.f32 %v3796_v52, %v5989_v0  ;;  %v3792_v25 = vld [vmem:[%s7539_s1 + $0x1c8] sm:$0xff] }
  0xa2   :  { %993 = vmatmul.mubr.f32.gmra.mxu0 %v5669_v40  ;;  %4239 = vmatprep.subr.mxu1 %v8112_v10  ;;  %v3781_v10 = vld [vmem:[%s7539_s1 + $0x170] sm:$0xff]  ;;  %v5969_v36 = vand.u32 4294901760, %v3797_v63  ;;  %v7757_v61 = vand.u32 4294901760, %v5987_v46  ;;  %v3776_v52 = vld [vmem:[%s7539_s1 + $0x148] sm:$0xff] }
  0xa3   :  { %999 = vmatprep.mubr.f32.mxu0 %v5674_v60  ;;  %4160 = vmatpush3.msra.mxu0 %v8216_v2  ;;  %v5977_v11 = vand.u32 4294901760, %v3781_v10  ;;  %v7753_v21 = vand.u32 4294901760, %v6025_v42 }
  0xa4   :  { %1249 = vmatmul.mubr.f32.gmra.mxu1 %v8217_v45  ;;  %4161 = vmatprep.subr.mxu0 %v8218_v55  ;;  %v2278_v34 = vsub.f32 %v5987_v46, %v7757_v61  ;;  %v6095_v45 = vand.u32 4294901760, %v3777_v32  ;;  %v3786_v61 = vld [vmem:[%s7539_s1 + $0x198] sm:$0xff] }
  0xa5   :  { %1256 = vmatprep.mubr.f32.mxu1 %v8220_v50  ;;  %4240 = vmatpush3.msra.mxu1 %v8114_v18  ;;  %v8221_v18 = vand.u32 4294901760, %v5300_v44  ;;  %8222 = vst [vmem:[#allocation21_spill] sm:$0xff] %v5977_v11  ;;  %v8225_v44 = vand.u32 4294901760, %v5674_v60  ;;  %v3794_v60 = vld [vmem:[%s7539_s1 + $0x1d8] sm:$0xff]  ;;  %v6017_v20 = vsub.f32 %v3781_v10, %v5977_v11 }
  0xa6   :  { %1002 = vmatmul.mubr.f32.gmra.mxu0 %v5689_v22  ;;  %4241 = vmatprep.subr.mxu1 %v8117_v29  ;;  %v8223_v29 = vand.u32 4294901760, %v5669_v40  ;;  %v6003_v40 = vsub.f32 %v3797_v63, %v5969_v36  ;;  %v6035_v22 = vand.u32 4294901760, %v3794_v60  ;;  %v2279_v2 = vand.u32 4294901760, %v2278_v34  ;;  %8238 = vst [vmem:[#allocation23_spill] sm:$0xff] %v6095_v45 }
  0xa7   :  { %1008 = vmatprep.mubr.f32.mxu0 %v5704_v12  ;;  %4162 = vmatpush3.msra.mxu0 %v8221_v18  ;;  %v8231_v12 = vld [vmem:[#allocation33_spill] sm:$0xff]  ;;  %v7754_v48 = vand.u32 4294901760, %v6017_v20  ;;  %v2404_v63 = vsub.f32 %v6025_v42, %v7753_v21  ;;  %v6145_v34 = vand.u32 4294901760, %v3791_v26 }
  0xa8   :  { %1260 = vmatmul.mubr.f32.gmra.mxu1 %v8223_v29  ;;  %4163 = vmatprep.subr.mxu0 %v8224_v3  ;;  %v7756_v57 = vand.u32 4294901760, %v6003_v40  ;;  %v6069_v4 = vsub.f32 %v3794_v60, %v6035_v22  ;;  %v6118_v3 = vand.u32 4294901760, %v3792_v25  ;;  %v6128_v60 = vsub.f32 %v3777_v32, %v6095_v45  ;;  %v8248_v32 = vld [vmem:[#allocation47_spill] sm:$0xff] }
  0xa9   :  { %1267 = vmatprep.mubr.f32.mxu1 %v8225_v44  ;;  %4164 = vmatpush3.msra.mxu0 %v8226_v49  ;;  %v2285_v62 = vsub.f32 %v6017_v20, %v7754_v48  ;;  %v8242_v44 = vld [vmem:[#allocation43_spill] sm:$0xff]  ;;  %v2405_v27 = vand.u32 4294901760, %v2404_v63  ;;  %8247 = vst [vmem:[#allocation44_spill] sm:$0xff] %v6145_v34  ;;  %v8251_v63 = vld [vmem:[#allocation50_spill] sm:$0xff] }
  0xaa   :  { %1011 = vmatmul.mubr.f32.gmra.mxu0 %v5721_v28  ;;  %4242 = vmatpush3.msra.mxu1 %v5153_v43  ;;  %v8227_v43 = vand.u32 4294901760, %v5334_v33  ;;  %v6031_v33 = vsub.f32 %v3780_v54, %v5995_v7  ;;  %8234 = vst [vmem:[#allocation36_spill] sm:$0xff] %v6069_v4  ;;  %v7747_v50 = vand.u32 4294901760, %v6069_v4  ;;  %v8240_v54 = vld [vmem:[#allocation41_spill] sm:$0xff]  ;;  %8241 = vst [vmem:[#allocation37_spill] sm:$0xff] %v6118_v3 }
  0xab   :  { %1017 = vmatprep.mubr.f32.mxu0 %v5731_v19  ;;  %4243 = vmatprep.subr.mxu1 %v5167_v56  ;;  %v3778_v56 = vld [vmem:[%s7539_s1 + $0x158] sm:$0xff]  ;;  %v2397_v19 = vsub.f32 %v6003_v40, %v7756_v57  ;;  %v2286_v49 = vand.u32 4294901760, %v2285_v62  ;;  %8243 = vst [vmem:[#allocation27_spill] sm:$0xff] %v6128_v60  ;;  %v8272_v57 = vld [vmem:[#allocation63_spill] sm:$0xff] }
  0xac   :  { %4165 = vmatprep.subr.mxu0 %v8227_v43  ;;  %1271 = vmatmul.mubr.f32.gmra.mxu1 %v8228_v17  ;;  %v6066_v28 = vand.u32 4294901760, %v3778_v56  ;;  %v6130_v43 = vand.u32 4294901760, %v3776_v52 }
  0xad   :  { %4166 = vmatpush3.msra.mxu0 %v8229_v8  ;;  %1278 = vmatprep.mubr.f32.mxu1 %v8230_v23  ;;  %v2398_v18 = vand.u32 4294901760, %v2397_v19  ;;  %v2418_v23 = vsub.f32 %v6069_v4, %v7747_v50  ;;  %v7744_v19 = vand.u32 4294901760, %v6128_v60 }
  0xae   :  { %1020 = vmatmul.mubr.f32.gmra.mxu0 %v5743_v51  ;;  %4244 = vmatpush3.msra.mxu1 %v5189_v38  ;;  %v3793_v38 = vld [vmem:[%s7539_s1 + $0x1d0] sm:$0xff]  ;;  %v7748_v51 = vand.u32 4294901760, %v6064_v30  ;;  %v6104_v10 = vsub.f32 %v3778_v56, %v6066_v28  ;;  %8244 = vst [vmem:[#allocation31_spill] sm:$0xff] %v6130_v43  ;;  %v8245_v56 = vld [vmem:[#allocation46_spill] sm:$0xff] }
  0xaf   :  { %1459 = vmatprep.mubr.f32.mxu0 %v8231_v12  ;;  %4245 = vmatprep.subr.mxu1 %v8118_v47  ;;  %v7752_v47 = vand.u32 4294901760, %v6031_v33  ;;  %v6079_v6 = vand.u32 4294901760, %v3793_v38 }
  0xb0   :  { %1282 = vmatmul.mubr.f32.gmra.mxu1 %v8232_v13  ;;  %4295 = vmatprep.subr.mxu0 %v5925_v1  ;;  %8239 = vst [vmem:[#allocation25_spill] sm:$0xff] %v6104_v10  ;;  %v2299_v8 = vsub.f32 %v6064_v30, %v7748_v51  ;;  %v6143_v13 = vsub.f32 %v3792_v25, %v6118_v3  ;;  %v2419_v25 = vand.u32 4294901760, %v2418_v23 }
  0xb1   :  { %1289 = vmatprep.mubr.f32.mxu1 %v8233_v59  ;;  %4246 = vmatpush3.msra.mxu1 %v8119_v31  ;;  %v7749_v31 = vand.u32 4294901760, %v6041_v41  ;;  %v2292_v55 = vsub.f32 %v6031_v33, %v7752_v47  ;;  %v6116_v29 = vsub.f32 %v3793_v38, %v6079_v6  ;;  %v3775_v59 = vld [vmem:[%s7539_s1 + $0x140] sm:$0xff] }
  0xb2   :  { %1461 = vmatmul.mubr.f32.vlgmr.msra.gmra.mxu0 %v8235_v58  ;;  %4375 = vmatprep.subr.mxu1 %v2391_v53  ;;  %v7745_v53 = vand.u32 4294901760, %v6104_v10  ;;  %8246 = vst [vmem:[#allocation32_spill] sm:$0xff] %v6143_v13  ;;  %v2300_v62 = vand.u32 4294901760, %v2299_v8 }
  0xb3   :  { %1466 = vmatprep.mubr.f32.mxu0 %v8236_v5  ;;  %4296 = vmatpush3.msra.mxu0 %v5955_v9  ;;  %v2411_v15 = vsub.f32 %v6041_v41, %v7749_v31  ;;  %v2293_v17 = vand.u32 4294901760, %v2292_v55  ;;  %v7743_v38 = vand.u32 4294901760, %v6116_v29 }
  0xb4   :  { %1293 = vmatmul.mubr.f32.gmra.mxu1 %v8237_v37  ;;  %4297 = vmatprep.subr.mxu0 %v5969_v36  ;;  %v2306_v37 = vsub.f32 %v6104_v10, %v7745_v53  ;;  %v3788_v53 = vld [vmem:[%s7539_s1 + $0x1a8] sm:$0xff] }
  0xb5   :  { %1668 = vmatprep.mubr.f32.mxu1 %v8231_v12  ;;  %4298 = vmatpush3.msra.mxu0 %v5977_v11  ;;  %v2412_v12 = vand.u32 4294901760, %v2411_v15  ;;  %v2425_v55 = vsub.f32 %v6116_v29, %v7743_v38  ;;  %v3774_v15 = vld [vmem:[%s7539_s1 + $0x138] sm:$0xff]  ;;  %v8258_v38 = vld [vmem:[#allocation52_spill] sm:$0xff] }
  0xb6   :  { %1468 = vmatmul.mubr.f32.gmra.mxu0 %v8240_v54  ;;  %4299 = vmatprep.subr.mxu0 %v5989_v0  ;;  %v6193_v23 = vand.u32 4294901760, %v3774_v15 }
  0xb7   :  { %1473 = vmatprep.mubr.f32.mxu0 %v8242_v44  ;;  %4300 = vmatpush3.msra.mxu0 %v5995_v7 }
  0xb8   :  { %1670 = vmatmul.mubr.f32.vlgmr.msra.gmra.mxu1 %v8235_v58  ;;  %4301 = vmatprep.subr.mxu0 %v6005_v16  ;;  %v3790_v58 = vld [vmem:[%s7539_s1 + $0x1b8] sm:$0xff]  ;;  %8256 = vst [vmem:[#allocation7_spill] sm:$0xff] %v6193_v23  ;;  %v6223_v50 = vsub.f32 %v3774_v15, %v6193_v23  ;;  %v3772_v15 = vld [vmem:[%s7539_s1 + $0x128] sm:$0xff] }
  0xb9   :  { %4376 = vmatpush3.msra.mxu1 %v2279_v2  ;;  %1675 = vmatprep.mubr.f32.mxu1 %v8236_v5  ;;  %v6157_v5 = vsub.f32 %v3776_v52, %v6130_v43  ;;  %v6163_v2 = vand.u32 4294901760, %v3775_v59  ;;  %v7746_v52 = vand.u32 4294901760, %v6143_v13  ;;  %v6254_v48 = vand.u32 4294901760, %v3772_v15 }
  0xba   :  { %1475 = vmatmul.mubr.f32.gmra.mxu0 %v8245_v56  ;;  %4377 = vmatprep.subr.mxu1 %v2398_v18  ;;  %v6173_v18 = vand.u32 4294901760, %v3790_v58  ;;  %8262 = vst [vmem:[#allocation45_spill] sm:$0xff] %v6223_v50  ;;  %v7764_v47 = vand.u32 4294901760, %v6223_v50 }
  0xbb   :  { %1480 = vmatprep.mubr.f32.mxu0 %v8248_v32  ;;  %4378 = vmatpush3.msra.mxu1 %v2286_v49  ;;  %8249 = vst [vmem:[#allocation34_spill] sm:$0xff] %v6157_v5  ;;  %8250 = vst [vmem:[#allocation3_spill] sm:$0xff] %v6163_v2  ;;  %v8254_v49 = vld [vmem:[#allocation51_spill] sm:$0xff]  ;;  %v6191_v8 = vsub.f32 %v3775_v59, %v6163_v2 }
  0xbc   :  { %1677 = vmatmul.mubr.f32.gmra.mxu1 %v8240_v54  ;;  %4379 = vmatprep.subr.mxu1 %v2405_v27  ;;  %v6171_v54 = vsub.f32 %v3791_v26, %v6145_v34  ;;  %8253 = vst [vmem:[#allocation40_spill] sm:$0xff] %v6173_v18  ;;  %v2313_v26 = vsub.f32 %v6128_v60, %v7744_v19  ;;  %v7750_v27 = vand.u32 4294901760, %v6157_v5  ;;  %v2426_v19 = vand.u32 4294901760, %v2425_v55 }
  0xbd   :  { %1682 = vmatprep.mubr.f32.mxu1 %v8242_v44  ;;  %4380 = vmatpush3.msra.mxu1 %v2293_v17  ;;  %v3789_v44 = vld [vmem:[%s7539_s1 + $0x1b0] sm:$0xff]  ;;  %v2307_v17 = vand.u32 4294901760, %v2306_v37  ;;  %8255 = vst [vmem:[#allocation5_spill] sm:$0xff] %v6191_v8  ;;  %v6206_v59 = vsub.f32 %v3790_v58, %v6173_v18  ;;  %v8260_v37 = vld [vmem:[#allocation53_spill] sm:$0xff]  ;;  %8268 = vst [vmem:[#allocation49_spill] sm:$0xff] %v6254_v48 }
  0xbe   :  { %1482 = vmatmul.mubr.f32.gmra.mxu0 %v8251_v63  ;;  %4381 = vmatprep.subr.mxu1 %v2412_v12  ;;  %8252 = vst [vmem:[#allocation38_spill] sm:$0xff] %v6171_v54  ;;  %v6195_v12 = vand.u32 4294901760, %v3789_v44  ;;  %v2314_v58 = vand.u32 4294901760, %v2313_v26  ;;  %v8266_v26 = vld [vmem:[#allocation60_spill] sm:$0xff] }
  0xbf   :  { %1487 = vmatprep.mubr.f32.mxu0 %v8254_v49  ;;  %4302 = vmatpush3.msra.mxu0 %v6033_v24  ;;  %8259 = vst [vmem:[#allocation42_spill] sm:$0xff] %v6206_v59 }
  0xc0   :  { %1684 = vmatmul.mubr.f32.gmra.mxu1 %v8245_v56  ;;  %4303 = vmatprep.subr.mxu0 %v6035_v22  ;;  %8257 = vst [vmem:[#allocation8_spill] sm:$0xff] %v6195_v12  ;;  %v3773_v56 = vld [vmem:[%s7539_s1 + $0x130] sm:$0xff]  ;;  %v6226_v51 = vsub.f32 %v3789_v44, %v6195_v12 }
  0xc1   :  { %1689 = vmatprep.mubr.f32.mxu1 %v8248_v32  ;;  %4382 = vmatpush3.msra.mxu1 %v2300_v62  ;;  %v2432_v32 = vsub.f32 %v6143_v13, %v7746_v52  ;;  %v7751_v62 = vand.u32 4294901760, %v6171_v54  ;;  %v6218_v55 = vand.u32 4294901760, %v3773_v56  ;;  %v7755_v52 = vand.u32 4294901760, %v6191_v8 }
  0xc2   :  { %1489 = vmatmul.mubr.f32.gmra.mxu0 %v8258_v38  ;;  %4383 = vmatprep.subr.mxu1 %v2419_v25  ;;  %v2320_v25 = vsub.f32 %v6157_v5, %v7750_v27  ;;  %8263 = vst [vmem:[#allocation10_spill] sm:$0xff] %v6226_v51  ;;  %v7765_v21 = vand.u32 4294901760, %v6226_v51 }
  0xc3   :  { %1494 = vmatprep.mubr.f32.mxu0 %v8260_v37  ;;  %4304 = vmatpush3.msra.mxu0 %v6066_v28  ;;  %8261 = vst [vmem:[#allocation9_spill] sm:$0xff] %v6218_v55  ;;  %v2433_v31 = vand.u32 4294901760, %v2432_v32  ;;  %v2439_v27 = vsub.f32 %v6171_v54, %v7751_v62  ;;  %v6246_v32 = vsub.f32 %v3773_v56, %v6218_v55  ;;  %v8332_v54 = vld [vmem:[#allocation28_spill] sm:$0xff] }
  0xc4   :  { %1691 = vmatmul.mubr.f32.gmra.mxu1 %v8251_v63  ;;  %4305 = vmatprep.subr.mxu0 %v6079_v6  ;;  %v8264_v63 = vld [vmem:[#allocation56_spill] sm:$0xff]  ;;  %v2321_v44 = vand.u32 4294901760, %v2320_v25  ;;  %v2327_v62 = vsub.f32 %v6191_v8, %v7755_v52  ;;  %v8269_v25 = vld [vmem:[#allocation62_spill] sm:$0xff]  ;;  %v2453_v39 = vsub.f32 %v6226_v51, %v7765_v21 }
  0xc5   :  { %1696 = vmatprep.mubr.f32.mxu1 %v8254_v49  ;;  %4384 = vmatpush3.msra.mxu1 %v2307_v17  ;;  %v7758_v49 = vand.u32 4294901760, %v6206_v59  ;;  %v6233_v17 = vand.u32 4294901760, %v3788_v53  ;;  %8267 = vst [vmem:[#allocation48_spill] sm:$0xff] %v6246_v32  ;;  %v2440_v56 = vand.u32 4294901760, %v2439_v27 }
  0xc6   :  { %1496 = vmatmul.mubr.f32.gmra.mxu0 %v8264_v63  ;;  %4385 = vmatprep.subr.mxu1 %v2426_v19  ;;  %v3787_v19 = vld [vmem:[%s7539_s1 + $0x1a0] sm:$0xff]  ;;  %v2454_v8 = vand.u32 4294901760, %v2453_v39  ;;  %v3769_v39 = vld [vmem:[%s7539_s1 + $0x110] sm:$0xff] }
  0xc7   :  { %8265 = vst [vmem:[#allocation12_spill] sm:$0xff] %v6233_v17  ;;  %1501 = vmatprep.mubr.f32.mxu0 %v8266_v26  ;;  %4306 = vmatpush3.msra.mxu0 %v6095_v45  ;;  %v6266_v52 = vand.u32 4294901760, %v3787_v19 }
  0xc8   :  { %1698 = vmatmul.mubr.f32.gmra.mxu1 %v8258_v38  ;;  %4307 = vmatprep.subr.mxu0 %v6118_v3  ;;  %v3771_v38 = vld [vmem:[%s7539_s1 + $0x120] sm:$0xff] }
  0xc9   :  { %1703 = vmatprep.mubr.f32.mxu1 %v8260_v37  ;;  %4386 = vmatpush3.msra.mxu1 %v2314_v58  ;;  %v2446_v37 = vsub.f32 %v6206_v59, %v7758_v49  ;;  %v6264_v58 = vsub.f32 %v3788_v53, %v6233_v17  ;;  %8271 = vst [vmem:[#allocation54_spill] sm:$0xff] %v6266_v52  ;;  %v6276_v27 = vand.u32 4294901760, %v3771_v38  ;;  %v2328_v53 = vand.u32 4294901760, %v2327_v62  ;;  %v8275_v59 = vld [vmem:[#allocation66_spill] sm:$0xff] }
  0xca   :  { %1503 = vmatmul.mubr.f32.gmra.mxu0 %v8269_v25  ;;  %4387 = vmatprep.subr.mxu1 %v2433_v31  ;;  %v2334_v49 = vsub.f32 %v6223_v50, %v7764_v47  ;;  %v6293_v62 = vand.u32 4294901760, %v3786_v61  ;;  %v8278_v47 = vld [vmem:[#allocation67_spill] sm:$0xff] }
  0xcb   :  { %8270 = vst [vmem:[#allocation2_spill] sm:$0xff] %v6264_v58  ;;  %1508 = vmatprep.mubr.f32.mxu0 %v8272_v57  ;;  %4308 = vmatpush3.msra.mxu0 %v6130_v43  ;;  %8273 = vst [vmem:[#allocation55_spill] sm:$0xff] %v6276_v27  ;;  %v2447_v31 = vand.u32 4294901760, %v2446_v37  ;;  %v6309_v37 = vsub.f32 %v3771_v38, %v6276_v27 }
  0xcc   :  { %1705 = vmatmul.mubr.f32.gmra.mxu1 %v8264_v63  ;;  %4309 = vmatprep.subr.mxu0 %v6145_v34  ;;  %v6286_v63 = vsub.f32 %v3772_v15, %v6254_v48  ;;  %8277 = vst [vmem:[#allocation58_spill] sm:$0xff] %v6293_v62  ;;  %v3785_v15 = vld [vmem:[%s7539_s1 + $0x190] sm:$0xff]  ;;  %v2335_v21 = vand.u32 4294901760, %v2334_v49  ;;  %v6321_v38 = vsub.f32 %v3786_v61, %v6293_v62  ;;  %v8286_v49 = vld [vmem:[#allocation71_spill] sm:$0xff] }
  0xcd   :  { %1710 = vmatprep.mubr.f32.mxu1 %v8266_v26  ;;  %4388 = vmatpush3.msra.mxu1 %v2321_v44  ;;  %v6291_v26 = vsub.f32 %v3787_v19, %v6266_v52  ;;  %v3770_v44 = vld [vmem:[%s7539_s1 + $0x118] sm:$0xff]  ;;  %v8279_v19 = vand.u32 4294901760, %v6246_v32  ;;  %8280 = vst [vmem:[#allocation4_spill] sm:$0xff] %v6309_v37 }
  0xce   :  { %8274 = vst [vmem:[#allocation14_spill] sm:$0xff] %v6286_v63  ;;  %1510 = vmatmul.mubr.f32.gmra.mxu0 %v8275_v59  ;;  %4389 = vmatprep.subr.mxu1 %v2440_v56  ;;  %v7776_v51 = vand.u32 4294901760, %v6286_v63  ;;  %v6313_v50 = vand.u32 4294901760, %v3770_v44  ;;  %8284 = vst [vmem:[#allocation6_spill] sm:$0xff] %v6321_v38 }
  0xcf   :  { %8276 = vst [vmem:[#allocation57_spill] sm:$0xff] %v6291_v26  ;;  %1515 = vmatprep.mubr.f32.mxu0 %v8278_v47  ;;  %4310 = vmatpush3.msra.mxu0 %v6163_v2  ;;  %v2341_v56 = vsub.f32 %v6246_v32, %v8279_v19  ;;  %v8282_v2 = vld [vmem:[#allocation68_spill] sm:$0xff]  ;;  %v6340_v19 = vand.u32 4294901760, %v3769_v39  ;;  %v8297_v32 = vld [vmem:[#allocation77_spill] sm:$0xff] }
  0xd0   :  { %1712 = vmatmul.mubr.f32.gmra.mxu1 %v8269_v25  ;;  %4311 = vmatprep.subr.mxu0 %v6173_v18  ;;  %8281 = vst [vmem:[#allocation59_spill] sm:$0xff] %v6313_v50  ;;  %v8283_v25 = vand.u32 4294901760, %v6264_v58 }
  0xd1   :  { %1717 = vmatprep.mubr.f32.mxu1 %v8272_v57  ;;  %4390 = vmatpush3.msra.mxu1 %v2328_v53  ;;  %v6323_v57 = vand.u32 4294901760, %v3785_v15  ;;  %v2342_v61 = vand.u32 4294901760, %v2341_v56  ;;  %v2348_v53 = vsub.f32 %v6286_v63, %v7776_v51  ;;  %8288 = vst [vmem:[#allocation65_spill] sm:$0xff] %v6340_v19  ;;  %v8292_v63 = vld [vmem:[#allocation75_spill] sm:$0xff] }
  0xd2   :  { %1517 = vmatmul.mubr.f32.gmra.mxu0 %v8282_v2  ;;  %4391 = vmatprep.subr.mxu1 %v2447_v31  ;;  %v2460_v18 = vsub.f32 %v6264_v58, %v8283_v25  ;;  %v6338_v25 = vsub.f32 %v3770_v44, %v6313_v50  ;;  %v8289_v58 = vld [vmem:[#allocation72_spill] sm:$0xff]  ;;  %v3784_v44 = vld [vmem:[%s7539_s1 + $0x188] sm:$0xff] }
  0xd3   :  { %8285 = vst [vmem:[#allocation61_spill] sm:$0xff] %v6323_v57  ;;  %1522 = vmatprep.mubr.f32.mxu0 %v8286_v49  ;;  %4312 = vmatpush3.msra.mxu0 %v6193_v23  ;;  %v6354_v51 = vsub.f32 %v3785_v15, %v6323_v57  ;;  %v3783_v15 = vld [vmem:[%s7539_s1 + $0x180] sm:$0xff]  ;;  %v3738_v23 = vld [vmem:[%s7540_s0 + $0x118] sm:$0xff] }
  0xd4   :  { %1719 = vmatmul.mubr.f32.gmra.mxu1 %v8275_v59  ;;  %4313 = vmatprep.subr.mxu0 %v6195_v12  ;;  %8287 = vst [vmem:[#allocation64_spill] sm:$0xff] %v6338_v25  ;;  %v3768_v59 = vld [vmem:[%s7539_s1 + $0x108] sm:$0xff]  ;;  %v2461_v31 = vand.u32 4294901760, %v2460_v18 }
  0xd5   :  { %1724 = vmatprep.mubr.f32.mxu1 %v8278_v47  ;;  %4392 = vmatpush3.msra.mxu1 %v2335_v21  ;;  %v8290_v21 = vand.u32 4294901760, %v6291_v26  ;;  %8291 = vst [vmem:[#allocation69_spill] sm:$0xff] %v6354_v51  ;;  %v3736_v18 = vld [vmem:[%s7540_s0 + $0x108] sm:$0xff]  ;;  %v6366_v56 = vand.u32 4294901760, %v3768_v59 }
  0xd6   :  { %1524 = vmatmul.mubr.f32.gmra.mxu0 %v8289_v58  ;;  %4393 = vmatprep.subr.mxu1 %v2454_v8  ;;  %v8293_v8 = vand.u32 4294901760, %v6309_v37 }
  0xd7   :  { %v2467_v47 = vsub.f32 %v6291_v26, %v8290_v21  ;;  %1529 = vmatprep.mubr.f32.mxu0 %v8292_v63  ;;  %4314 = vmatpush3.msra.mxu0 %v6218_v55  ;;  %8294 = vst [vmem:[#allocation11_spill] sm:$0xff] %v6366_v56  ;;  %v2349_v26 = vand.u32 4294901760, %v2348_v53  ;;  %v7801_v55 = vand.u32 4294901760, %v6338_v25  ;;  %v8300_v53 = vld [vmem:[#allocation78_spill] sm:$0xff] }
  0xd8   :  { %1726 = vmatmul.mubr.f32.gmra.mxu1 %v8282_v2  ;;  %4315 = vmatprep.subr.mxu0 %v6233_v17  ;;  %v2355_v21 = vsub.f32 %v6309_v37, %v8293_v8  ;;  %v6374_v2 = vsub.f32 %v3769_v39, %v6340_v19  ;;  %v6376_v17 = vand.u32 4294901760, %v3784_v44  ;;  %v8298_v37 = vand.u32 4294901760, %v6321_v38  ;;  %v3735_v39 = vld [vmem:[%s7540_s0 + $0x100] sm:$0xff] }
  0xd9   :  { %1731 = vmatprep.mubr.f32.mxu1 %v8286_v49  ;;  %4394 = vmatpush3.msra.mxu1 %v2342_v61  ;;  %v2468_v8 = vand.u32 4294901760, %v2467_v47  ;;  %v3767_v49 = vld [vmem:[%s7539_s1 + $0x100] sm:$0xff]  ;;  %v6386_v61 = vand.u32 4294901760, %v3736_v18  ;;  %v6398_v47 = vsub.f32 %v3768_v59, %v6366_v56 }
  0xda   :  { %8295 = vst [vmem:[#allocation70_spill] sm:$0xff] %v6374_v2  ;;  %8296 = vst [vmem:[#allocation22_spill] sm:$0xff] %v6376_v17  ;;  %1531 = vmatmul.mubr.f32.gmra.mxu0 %v8297_v32  ;;  %4395 = vmatprep.subr.mxu1 %v2461_v31  ;;  %v2474_v12 = vsub.f32 %v6321_v38, %v8298_v37  ;;  %v6393_v31 = vand.u32 4294901760, %v3783_v15  ;;  %v2356_v37 = vand.u32 4294901760, %v2355_v21 }
  0xdb   :  { %8299 = vst [vmem:[#allocation24_spill] sm:$0xff] %v6386_v61  ;;  %1536 = vmatprep.mubr.f32.mxu0 %v8300_v53  ;;  %4316 = vmatpush3.msra.mxu0 %v6254_v48  ;;  %8302 = vst [vmem:[#allocation73_spill] sm:$0xff] %v6398_v47  ;;  %v2362_v38 = vsub.f32 %v6338_v25, %v7801_v55  ;;  %v6407_v48 = vand.u32 4294901760, %v3767_v49  ;;  %v6412_v21 = vsub.f32 %v3784_v44, %v6376_v17  ;;  %v8308_v55 = vld [vmem:[#allocation82_spill] sm:$0xff]  ;;  %v3737_v44 = vld [vmem:[%s7540_s0 + $0x110] sm:$0xff] }
  0xdc   :  { %8301 = vst [vmem:[#allocation13_spill] sm:$0xff] %v6393_v31  ;;  %1733 = vmatmul.mubr.f32.gmra.mxu1 %v8289_v58  ;;  %4317 = vmatprep.subr.mxu0 %v6266_v52  ;;  %v6409_v58 = vand.u32 4294901760, %v3735_v39  ;;  %v2475_v59 = vand.u32 4294901760, %v2474_v12  ;;  %v8306_v52 = vand.u32 4294901760, %v6354_v51  ;;  %v6420_v34 = vsub.f32 %v3736_v18, %v6386_v61  ;;  %v3740_v18 = vld [vmem:[%s7540_s0 + $0x128] sm:$0xff] }
  0xdd   :  { %1738 = vmatprep.mubr.f32.mxu1 %v8292_v63  ;;  %4396 = vmatpush3.msra.mxu1 %v2349_v26  ;;  %8303 = vst [vmem:[#allocation15_spill] sm:$0xff] %v6407_v48  ;;  %8305 = vst [vmem:[#allocation26_spill] sm:$0xff] %v6412_v21  ;;  %v6424_v25 = vand.u32 4294901760, %v3738_v23  ;;  %v6430_v12 = vsub.f32 %v3783_v15, %v6393_v31  ;;  %v6440_v26 = vsub.f32 %v3767_v49, %v6407_v48 }
  0xde   :  { %8304 = vst [vmem:[#allocation74_spill] sm:$0xff] %v6409_v58  ;;  %1538 = vmatmul.mubr.f32.gmra.mxu0 %v5609_v35  ;;  %4397 = vmatprep.subr.mxu1 %v2468_v8  ;;  %v2481_v63 = vsub.f32 %v6354_v51, %v8306_v52  ;;  %8307 = vst [vmem:[#allocation16_spill] sm:$0xff] %v6420_v34  ;;  %v2363_v8 = vand.u32 4294901760, %v2362_v38  ;;  %v6443_v15 = vsub.f32 %v3735_v39, %v6409_v58  ;;  %v8313_v51 = vld [vmem:[#allocation84_spill] sm:$0xff]  ;;  %v8316_v38 = vld [vmem:[#allocation86_spill] sm:$0xff] }
  0xdf   :  { %1543 = vmatprep.mubr.f32.mxu0 %v8308_v55  ;;  %4318 = vmatpush3.msra.mxu0 %v6276_v27  ;;  %8309 = vst [vmem:[#allocation76_spill] sm:$0xff] %v6424_v25  ;;  %8310 = vst [vmem:[#allocation17_spill] sm:$0xff] %v6430_v12  ;;  %v6456_v49 = vsub.f32 %v3738_v23, %v6424_v25  ;;  %v3742_v23 = vld [vmem:[%s7540_s0 + $0x138] sm:$0xff]  ;;  %v3744_v39 = vld [vmem:[%s7540_s0 + $0x148] sm:$0xff] }
  0xe0   :  { %1740 = vmatmul.mubr.f32.gmra.mxu1 %v8297_v32  ;;  %4319 = vmatprep.subr.mxu0 %v6293_v62  ;;  %8311 = vst [vmem:[#allocation79_spill] sm:$0xff] %v6440_v26  ;;  %8312 = vst [vmem:[#allocation30_spill] sm:$0xff] %v6443_v15  ;;  %v2482_v52 = vand.u32 4294901760, %v2481_v63  ;;  %v8314_v62 = vand.u32 4294901760, %v6374_v2  ;;  %v6459_v32 = vand.u32 4294901760, %v3740_v18 }
  0xe1   :  { %1745 = vmatprep.mubr.f32.mxu1 %v8300_v53  ;;  %4398 = vmatpush3.msra.mxu1 %v2356_v37  ;;  %v6451_v37 = vand.u32 4294901760, %v3737_v44  ;;  %8317 = vst [vmem:[#allocation80_spill] sm:$0xff] %v6456_v49  ;;  %v8320_v53 = vand.u32 4294901760, %v6412_v21 }
  0xe2   :  { %1545 = vmatmul.mubr.f32.gmra.mxu0 %v8313_v51  ;;  %4399 = vmatprep.subr.mxu1 %v2475_v59  ;;  %v2369_v27 = vsub.f32 %v6374_v2, %v8314_v62  ;;  %8318 = vst [vmem:[#allocation19_spill] sm:$0xff] %v6459_v32  ;;  %v3739_v59 = vld [vmem:[%s7540_s0 + $0x120] sm:$0xff]  ;;  %v8319_v62 = vand.u32 4294901760, %v6398_v47 }
  0xe3   :  { %8315 = vst [vmem:[#allocation18_spill] sm:$0xff] %v6451_v37  ;;  %1550 = vmatprep.mubr.f32.mxu0 %v8316_v38  ;;  %4320 = vmatpush3.msra.mxu0 %v6313_v50  ;;  %v2488_v2 = vsub.f32 %v6412_v21, %v8320_v53  ;;  %v6483_v43 = vsub.f32 %v3737_v44, %v6451_v37  ;;  %v8325_v53 = vld [vmem:[#allocation88_spill] sm:$0xff]  ;;  %v6499_v44 = vand.u32 4294901760, %v3742_v23 }
  0xe4   :  { %1747 = vmatmul.mubr.f32.gmra.mxu1 %v5609_v35  ;;  %4321 = vmatprep.subr.mxu0 %v6323_v57  ;;  %v2376_v63 = vsub.f32 %v6398_v47, %v8319_v62  ;;  %v8321_v57 = vld [vmem:[#allocation87_spill] sm:$0xff]  ;;  %v2370_v50 = vand.u32 4294901760, %v2369_v27  ;;  %v8322_v62 = vand.u32 4294901760, %v6420_v34  ;;  %v8326_v27 = vand.u32 4294901760, %v6430_v12 }
  0xe5   :  { %1752 = vmatprep.mubr.f32.mxu1 %v8308_v55  ;;  %4400 = vmatpush3.msra.mxu1 %v2363_v8  ;;  %8323 = vst [vmem:[#allocation81_spill] sm:$0xff] %v6483_v43  ;;  %v6485_v55 = vand.u32 4294901760, %v3739_v59  ;;  %v3741_v8 = vld [vmem:[%s7540_s0 + $0x130] sm:$0xff]  ;;  %8328 = vst [vmem:[#allocation33_spill] sm:$0xff] %v6499_v44 }
  0xe6   :  { %1552 = vmatmul.mubr.f32.gmra.mxu0 %v8321_v57  ;;  %4401 = vmatprep.subr.mxu1 %v2482_v52  ;;  %v2036_v47 = vsub.f32 %v6420_v34, %v8322_v62  ;;  %v2495_v35 = vsub.f32 %v6430_v12, %v8326_v27  ;;  %v6497_v62 = vsub.f32 %v3740_v18, %v6459_v32  ;;  %v2377_v34 = vand.u32 4294901760, %v2376_v63 }
  0xe7   :  { %8324 = vst [vmem:[#allocation83_spill] sm:$0xff] %v6485_v55  ;;  %1557 = vmatprep.mubr.f32.mxu0 %v8325_v53  ;;  %4322 = vmatpush3.msra.mxu0 %v6340_v19  ;;  %v8329_v27 = vand.u32 4294901760, %v6443_v15  ;;  %v2489_v52 = vand.u32 4294901760, %v2488_v2  ;;  %v8330_v12 = vand.u32 4294901760, %v6440_v26  ;;  %v6514_v21 = vand.u32 4294901760, %v3741_v8  ;;  %v3743_v2 = vld [vmem:[%s7540_s0 + $0x140] sm:$0xff] }
  0xe8   :  { %8327 = vst [vmem:[#allocation85_spill] sm:$0xff] %v6497_v62  ;;  %1754 = vmatmul.mubr.f32.gmra.mxu1 %v8313_v51  ;;  %4323 = vmatprep.subr.mxu0 %v6376_v17  ;;  %v2037_v51 = vand.u32 4294901760, %v2036_v47  ;;  %v2496_v47 = vand.u32 4294901760, %v2495_v35  ;;  %v6544_v63 = vand.u32 4294901760, %v3743_v2 }
  0xe9   :  { %1759 = vmatprep.mubr.f32.mxu1 %v8316_v38  ;;  %4324 = vmatpush3.msra.mxu0 %v6366_v56  ;;  %v2042_v18 = vsub.f32 %v6443_v15, %v8329_v27  ;;  %v2383_v19 = vsub.f32 %v6440_v26, %v8330_v12  ;;  %8331 = vst [vmem:[#allocation35_spill] sm:$0xff] %v6514_v21  ;;  %v6521_v56 = vand.u32 4294901760, %v3744_v39  ;;  %v8335_v27 = vld [vmem:[#allocation89_spill] sm:$0xff]  ;;  %v8336_v12 = vand.u32 4294901760, %v6456_v49 }
  0xea   :  { %1559 = vmatmul.mubr.f32.gmra.mxu0 %v8332_v54  ;;  %4402 = vmatpush3.msra.mxu1 %v2370_v50  ;;  %v6519_v38 = vsub.f32 %v3739_v59, %v6485_v55  ;;  %v6533_v59 = vsub.f32 %v3742_v23, %v6499_v44  ;;  %v3746_v15 = vld [vmem:[%s7540_s0 + $0x158] sm:$0xff]  ;;  %v6542_v35 = vsub.f32 %v3741_v8, %v6514_v21 }
  0xeb   :  { %8334 = vst [vmem:[#allocation41_spill] sm:$0xff] %v6521_v56  ;;  %1564 = vmatprep.mubr.f32.mxu0 %v8335_v27  ;;  %4325 = vmatprep.subr.mxu0 %v6393_v31  ;;  %v2051_v50 = vsub.f32 %v6456_v49, %v8336_v12  ;;  %v2043_v17 = vand.u32 4294901760, %v2042_v18  ;;  %v2384_v12 = vand.u32 4294901760, %v2383_v19  ;;  %8339 = vst [vmem:[#allocation47_spill] sm:$0xff] %v6544_v63  ;;  %v8340_v23 = vld [vmem:[#allocation29_spill] sm:$0xff]  ;;  %v8341_v49 = vand.u32 4294901760, %v6483_v43 }
  0xec   :  { %8333 = vst [vmem:[#allocation39_spill] sm:$0xff] %v6519_v38  ;;  %8337 = vst [vmem:[#allocation43_spill] sm:$0xff] %v6533_v59  ;;  %1761 = vmatmul.mubr.f32.gmra.mxu1 %v8321_v57  ;;  %4326 = vmatpush3.msra.mxu0 %v6407_v48  ;;  %v3847_v31 = vpop.f32.mrf.mxu0  ;;  %v6554_v18 = vand.u32 4294901760, %v3746_v15  ;;  %v3745_v19 = vld [vmem:[%s7540_s0 + $0x150] sm:$0xff]  ;;  %v3748_v48 = vld [vmem:[%s7540_s0 + $0x168] sm:$0xff] }
  0xed   :  { %1766 = vmatprep.mubr.f32.mxu1 %v8325_v53  ;;  %4403 = vmatprep.subr.mxu1 %v2489_v52  ;;  %8338 = vst [vmem:[#allocation46_spill] sm:$0xff] %v6542_v35  ;;  %v2057_v57 = vsub.f32 %v6483_v43, %v8341_v49  ;;  %v6552_v53 = vsub.f32 %v3744_v39, %v6521_v56  ;;  %v2052_v52 = vand.u32 4294901760, %v2051_v50  ;;  %v7844_v49 = vand.u32 4294901760, %v6533_v59 }
  0xee   :  { %1566 = vmatmul.mubr.f32.gmra.mxu0 %v8340_v23  ;;  %4404 = vmatpush3.msra.mxu1 %v2377_v34  ;;  %8343 = vst [vmem:[#allocation51_spill] sm:$0xff] %v6554_v18  ;;  %v3848_v8 = vpop.f32.mrf.mxu0  ;;  %v8344_v34 = vand.u32 4294901760, %v6497_v62  ;;  %v6573_v50 = vsub.f32 %v3743_v2, %v6544_v63  ;;  %v6589_v2 = vand.u32 4294901760, %v3748_v48 }
  0xef   :  { %8342 = vst [vmem:[#allocation50_spill] sm:$0xff] %v6552_v53  ;;  %2038 = vmatprep.mubr.f32.mxu0 %v2037_v51  ;;  %4405 = vmatprep.subr.mxu1 %v2496_v47  ;;  %v6564_v39 = vadd.f32 %v3848_v8, %v3847_v31  ;;  %v7855_v51 = vand.u32 4294901760, %v6542_v35  ;;  %v6575_v47 = vand.u32 4294901760, %v3745_v19  ;;  %v8347_v31 = vand.u32 4294901760, %v6519_v38 }
  0xf0   :  { %v2066_v26 = vsub.f32 %v6497_v62, %v8344_v34  ;;  %1768 = vmatmul.mubr.f32.gmra.mxu1 %v8332_v54  ;;  %4455 = vmatprep.subr.mxu0 %v5943_v14  ;;  %8345 = vst [vmem:[#allocation52_spill] sm:$0xff] %v6573_v50  ;;  %v2058_v54 = vand.u32 4294901760, %v2057_v57  ;;  %8349 = vst [vmem:[#allocation60_spill] sm:$0xff] %v6589_v2  ;;  %v3747_v57 = vld [vmem:[%s7540_s0 + $0x160] sm:$0xff] }
  0xf1   :  { %1773 = vmatprep.mubr.f32.mxu1 %v8335_v27  ;;  %4406 = vmatpush3.msra.mxu1 %v2384_v12  ;;  %8346 = vst [vmem:[#allocation53_spill] sm:$0xff] %v6575_v47  ;;  %v2072_v8 = vsub.f32 %v6519_v38, %v8347_v31  ;;  %v6583_v27 = vsub.f32 %v3746_v15, %v6554_v18  ;;  %v6613_v62 = vand.u32 4294901760, %v3747_v57 }
  0xf2   :  { %2044 = vmatmul.mubr.f32.vlgmr.msra.gmra.mxu0 %v2043_v17  ;;  %4535 = vmatprep.subr.mxu1 %v5925_v1  ;;  %v2067_v12 = vand.u32 4294901760, %v2066_v26  ;;  %v2081_v17 = vsub.f32 %v6533_v59, %v7844_v49  ;;  %v3750_v26 = vld [vmem:[%s7540_s0 + $0x178] sm:$0xff]  ;;  %v2087_v15 = vsub.f32 %v6542_v35, %v7855_v51  ;;  %v6606_v49 = vsub.f32 %v3745_v19, %v6575_v47 }
  0xf3   :  { %8348 = vst [vmem:[#allocation56_spill] sm:$0xff] %v6583_v27  ;;  %2053 = vmatprep.mubr.f32.mxu0 %v2052_v52  ;;  %4456 = vmatpush3.msra.mxu0 %v5987_v46  ;;  %v2073_v34 = vand.u32 4294901760, %v2072_v8  ;;  %v8351_v59 = vand.u32 4294901760, %v6552_v53  ;;  %8352 = vst [vmem:[#allocation63_spill] sm:$0xff] %v6613_v62  ;;  %v6617_v19 = vsub.f32 %v3748_v48, %v6589_v2  ;;  %v3749_v8 = vld [vmem:[%s7540_s0 + $0x170] sm:$0xff] }
  0xf4   :  { %v3850_v31 = vpop.f32.mrf.mxu0  ;;  %1775 = vmatmul.mubr.f32.gmra.mxu1 %v8340_v23  ;;  %4457 = vmatprep.subr.mxu0 %v6003_v40  ;;  %8350 = vst [vmem:[#allocation62_spill] sm:$0xff] %v6606_v49  ;;  %v2082_v52 = vand.u32 4294901760, %v2081_v17  ;;  %v2088_v48 = vand.u32 4294901760, %v2087_v15  ;;  %v8355_v17 = vand.u32 4294901760, %v6573_v50  ;;  %v6639_v35 = vand.u32 4294901760, %v3749_v8  ;;  %v3751_v15 = vld [vmem:[%s7540_s0 + $0x180] sm:$0xff] }
  0xf5   :  { %2499 = vmatprep.mubr.f32.mxu1 %v6386_v61  ;;  %4458 = vmatpush3.msra.mxu0 %v6017_v20  ;;  %v2096_v61 = vsub.f32 %v6552_v53, %v8351_v59  ;;  %8353 = vst [vmem:[#allocation66_spill] sm:$0xff] %v6617_v19  ;;  %v3752_v59 = vld [vmem:[%s7540_s0 + $0x188] sm:$0xff] }
  0xf6   :  { %2059 = vmatmul.mubr.f32.gmra.mxu0 %v2058_v54  ;;  %v3851_v23 = vpop.f32.mrf.mxu0  ;;  %4459 = vmatprep.subr.mxu0 %v6025_v42  ;;  %v6619_v54 = vand.u32 4294901760, %v3750_v26  ;;  %8357 = vst [vmem:[#allocation71_spill] sm:$0xff] %v6639_v35 }
  0xf7   :  { %v3852_v43 = vadd.f32 %v3851_v23, %v3850_v31  ;;  %2068 = vmatprep.mubr.f32.mxu0 %v2067_v12  ;;  %v3927_v51 = vpop.f32.mrf.mxu1  ;;  %4460 = vmatpush3.msra.mxu0 %v6031_v33  ;;  %v2102_v31 = vsub.f32 %v6573_v50, %v8355_v17  ;;  %v2097_v23 = vand.u32 4294901760, %v2096_v61  ;;  %v3754_v61 = vld [vmem:[%s7540_s0 + $0x198] sm:$0xff] }
  0xf8   :  { %8354 = vst [vmem:[#allocation67_spill] sm:$0xff] %v6619_v54  ;;  %2501 = vmatmul.mubr.f32.vlgmr.msra.gmra.mxu1 %v6409_v58  ;;  %4461 = vmatprep.subr.mxu0 %v6041_v41  ;;  %v6637_v58 = vsub.f32 %v3747_v57, %v6613_v62 }
  0xf9   :  { %4536 = vmatpush3.msra.mxu1 %v5955_v9  ;;  %v3928_v12 = vpop.f32.mrf.mxu1  ;;  %2506 = vmatprep.mubr.f32.mxu1 %v6424_v25  ;;  %v6641_v9 = vand.u32 4294901760, %v3752_v59 }
  0xfa   :  { %v3853_v38 = vpop.f32.mrf.mxu0  ;;  %2074 = vmatmul.mubr.f32.gmra.mxu0 %v2073_v34  ;;  %v3929_v53 = vadd.f32 %v3928_v12, %v3927_v51  ;;  %4537 = vmatprep.subr.mxu1 %v5969_v36  ;;  %8356 = vst [vmem:[#allocation68_spill] sm:$0xff] %v6637_v58  ;;  %v8359_v51 = vand.u32 4294901760, %v6583_v27  ;;  %v6652_v12 = vsub.f32 %v3750_v26, %v6619_v54  ;;  %v8361_v26 = vand.u32 4294901760, %v6606_v49 }
  0xfb   :  { %8358 = vst [vmem:[#allocation72_spill] sm:$0xff] %v6641_v9  ;;  %2083 = vmatprep.mubr.f32.mxu0 %v2082_v52  ;;  %v3930_v17 = vpop.f32.mrf.mxu1  ;;  %4538 = vmatpush3.msra.mxu1 %v5977_v11 }
  0xfc   :  { %v2111_v34 = vsub.f32 %v6583_v27, %v8359_v51  ;;  %8360 = vst [vmem:[#allocation75_spill] sm:$0xff] %v6652_v12  ;;  %v3854_v25 = vpop.f32.mrf.mxu0  ;;  %v6655_v50 = vadd.f32 %v3929_v53, %v6564_v39  ;;  %2508 = vmatmul.mubr.f32.gmra.mxu1 %v6451_v37  ;;  %4539 = vmatprep.subr.mxu1 %v5989_v0  ;;  %v2103_v51 = vand.u32 4294901760, %v2102_v31  ;;  %v6667_v39 = vand.u32 4294901760, %v3751_v15  ;;  %v3753_v31 = vld [vmem:[%s7540_s0 + $0x190] sm:$0xff] }
  0xfd   :  { %v3855_v52 = vadd.f32 %v3854_v25, %v3853_v38  ;;  %v3931_v11 = vpop.f32.mrf.mxu1  ;;  %2513 = vmatprep.mubr.f32.mxu1 %v6459_v32  ;;  %4540 = vmatpush3.msra.mxu1 %v5995_v7  ;;  %v2117_v53 = vsub.f32 %v6606_v49, %v8361_v26  ;;  %v6672_v25 = vsub.f32 %v3749_v8, %v6639_v35  ;;  %v6685_v8 = vand.u32 4294901760, %v3754_v61 }
  0xfe   :  { %8362 = vst [vmem:[#allocation77_spill] sm:$0xff] %v6667_v39  ;;  %v3856_v57 = vpop.f32.mrf.mxu0  ;;  %2089 = vmatmul.mubr.f32.gmra.mxu0 %v2088_v48  ;;  %v3932_v37 = vadd.f32 %v3931_v11, %v3930_v17  ;;  %4541 = vmatprep.subr.mxu1 %v6005_v16  ;;  %v6675_v38 = vsub.f32 %v3752_v59, %v6641_v9  ;;  %v2112_v32 = vand.u32 4294901760, %v2111_v34  ;;  %v8365_v11 = vand.u32 4294901760, %v6617_v19 }
  0xff   :  { %8363 = vst [vmem:[#allocation78_spill] sm:$0xff] %v6672_v25  ;;  %2098 = vmatprep.mubr.f32.mxu0 %v2097_v23  ;;  %v3933_v26 = vpop.f32.mrf.mxu1  ;;  %4462 = vmatpush3.msra.mxu0 %v6064_v30  ;;  %8366 = vst [vmem:[#allocation84_spill] sm:$0xff] %v6685_v8  ;;  %v3756_v23 = vld [vmem:[%s7540_s0 + $0x1a8] sm:$0xff]  ;;  %v6697_v17 = vsub.f32 %v3751_v15, %v6667_v39  ;;  %v3755_v15 = vld [vmem:[%s7540_s0 + $0x1a0] sm:$0xff] }
 0x100   :  { %8364 = vst [vmem:[#allocation82_spill] sm:$0xff] %v6675_v38  ;;  %v2126_v48 = vsub.f32 %v6617_v19, %v8365_v11  ;;  %v3857_v27 = vpop.f32.mrf.mxu0  ;;  %v6687_v59 = vadd.f32 %v3932_v37, %v3852_v43  ;;  %2515 = vmatmul.mubr.f32.gmra.mxu1 %v6485_v55  ;;  %4463 = vmatprep.subr.mxu0 %v6069_v4  ;;  %v2118_v11 = vand.u32 4294901760, %v2117_v53  ;;  %v6699_v43 = vand.u32 4294901760, %v3753_v31 }
 0x101   :  { %v3858_v34 = vadd.f32 %v3857_v27, %v3856_v57  ;;  %v3934_v49 = vpop.f32.mrf.mxu1  ;;  %2520 = vmatprep.mubr.f32.mxu1 %v6499_v44  ;;  %4542 = vmatpush3.msra.mxu1 %v6033_v24  ;;  %8367 = vst [vmem:[#allocation86_spill] sm:$0xff] %v6697_v17  ;;  %v8369_v19 = vand.u32 4294901760, %v6637_v58  ;;  %v3758_v57 = vld [vmem:[%s7540_s0 + $0x1b8] sm:$0xff] }
 0x102   :  { %8368 = vst [vmem:[#allocation87_spill] sm:$0xff] %v6699_v43  ;;  %v3859_v37 = vpop.f32.mrf.mxu0  ;;  %2104 = vmatmul.mubr.f32.gmra.mxu0 %v2103_v51  ;;  %v3935_v55 = vadd.f32 %v3934_v49, %v3933_v26  ;;  %4543 = vmatprep.subr.mxu1 %v6035_v22  ;;  %v2127_v44 = vand.u32 4294901760, %v2126_v48  ;;  %v8370_v49 = vand.u32 4294901760, %v6652_v12  ;;  %v6717_v26 = vand.u32 4294901760, %v3756_v23 }
 0x103   :  { %v2132_v4 = vsub.f32 %v6637_v58, %v8369_v19  ;;  %2113 = vmatprep.mubr.f32.mxu0 %v2112_v32  ;;  %v3936_v53 = vpop.f32.mrf.mxu1  ;;  %4464 = vmatpush3.msra.mxu0 %v6104_v10  ;;  %v6715_v19 = vsub.f32 %v3754_v61, %v6685_v8  ;;  %v3757_v61 = vld [vmem:[%s7540_s0 + $0x1b0] sm:$0xff] }
 0x104   :  { %v2141_v51 = vsub.f32 %v6652_v12, %v8370_v49  ;;  %8372 = vst [vmem:[#allocation28_spill] sm:$0xff] %v6717_v26  ;;  %v3860_v27 = vpop.f32.mrf.mxu0  ;;  %v6722_v58 = vadd.f32 %v3935_v55, %v3855_v52  ;;  %2522 = vmatmul.mubr.f32.gmra.mxu1 %v6514_v21  ;;  %4465 = vmatprep.subr.mxu0 %v6116_v29  ;;  %v6732_v12 = vand.u32 4294901760, %v3755_v15  ;;  %v8375_v21 = vand.u32 4294901760, %v6672_v25 }
 0x105   :  { %8371 = vst [vmem:[#allocation88_spill] sm:$0xff] %v6715_v19  ;;  %v3861_v32 = vadd.f32 %v3860_v27, %v3859_v37  ;;  %v3937_v48 = vpop.f32.mrf.mxu1  ;;  %2527 = vmatprep.mubr.f32.mxu1 %v6521_v56  ;;  %4544 = vmatpush3.msra.mxu1 %v6066_v28  ;;  %v6730_v49 = vsub.f32 %v3753_v31, %v6699_v43  ;;  %v2133_v52 = vand.u32 4294901760, %v2132_v4  ;;  %v6738_v27 = vand.u32 4294901760, %v3758_v57 }
 0x106   :  { %8374 = vst [vmem:[#allocation29_spill] sm:$0xff] %v6732_v12  ;;  %v3862_v10 = vpop.f32.mrf.mxu0  ;;  %2119 = vmatmul.mubr.f32.gmra.mxu0 %v2118_v11  ;;  %v3938_v55 = vadd.f32 %v3937_v48, %v3936_v53  ;;  %v2147_v37 = vsub.f32 %v6672_v25, %v8375_v21  ;;  %4545 = vmatprep.subr.mxu1 %v6079_v6  ;;  %v2142_v56 = vand.u32 4294901760, %v2141_v51  ;;  %v8377_v11 = vand.u32 4294901760, %v6675_v38 }
 0x107   :  { %8373 = vst [vmem:[#allocation89_spill] sm:$0xff] %v6730_v49  ;;  %8376 = vst [vmem:[#allocation90_spill] sm:$0xff] %v6738_v27  ;;  %2128 = vmatprep.mubr.f32.mxu0 %v2127_v44  ;;  %v3939_v31 = vpop.f32.mrf.mxu1  ;;  %4466 = vmatpush3.msra.mxu0 %v6128_v60  ;;  %v6749_v21 = vsub.f32 %v3756_v23, %v6717_v26  ;;  %v3760_v44 = vld [vmem:[%s7540_s0 + $0x1c8] sm:$0xff]  ;;  %v8379_v23 = vand.u32 4294901760, %v6697_v17 }
 0x108   :  { %v2156_v4 = vsub.f32 %v6675_v38, %v8377_v11  ;;  %v3863_v48 = vpop.f32.mrf.mxu0  ;;  %v6751_v25 = vadd.f32 %v3938_v55, %v3858_v34  ;;  %2529 = vmatmul.mubr.f32.gmra.mxu1 %v6544_v63  ;;  %4467 = vmatprep.subr.mxu0 %v6143_v13  ;;  %v6764_v34 = vsub.f32 %v3755_v15, %v6732_v12  ;;  %v6766_v55 = vand.u32 4294901760, %v3757_v61 }
 0x109   :  { %8378 = vst [vmem:[#allocation91_spill] sm:$0xff] %v6749_v21  ;;  %v3864_v51 = vadd.f32 %v3863_v48, %v3862_v10  ;;  %v3940_v60 = vpop.f32.mrf.mxu1  ;;  %2534 = vmatprep.mubr.f32.mxu1 %v6554_v18  ;;  %4546 = vmatpush3.msra.mxu1 %v6095_v45  ;;  %v2162_v11 = vsub.f32 %v6697_v17, %v8379_v23  ;;  %v2148_v38 = vand.u32 4294901760, %v2147_v37  ;;  %v3759_v23 = vld [vmem:[%s7540_s0 + $0x1c0] sm:$0xff]  ;;  %v8391_v45 = vld [vmem:[#allocation5_spill] sm:$0xff] }
 0x10a   :  { %8380 = vst [vmem:[#allocation92_spill] sm:$0xff] %v6764_v34  ;;  %8381 = vst [vmem:[#allocation93_spill] sm:$0xff] %v6766_v55  ;;  %v3865_v53 = vpop.f32.mrf.mxu0  ;;  %2134 = vmatmul.mubr.f32.gmra.mxu0 %v2133_v52  ;;  %v3941_v63 = vadd.f32 %v3940_v60, %v3939_v31  ;;  %4547 = vmatprep.subr.mxu1 %v6118_v3  ;;  %v6771_v48 = vsub.f32 %v3758_v57, %v6738_v27  ;;  %v2157_v18 = vand.u32 4294901760, %v2156_v4  ;;  %v8385_v17 = vld [vmem:[#allocation38_spill] sm:$0xff] }
 0x10b   :  { %2143 = vmatprep.mubr.f32.mxu0 %v2142_v56  ;;  %v3942_v15 = vpop.f32.mrf.mxu1  ;;  %4468 = vmatpush3.msra.mxu0 %v6157_v5  ;;  %v8383_v52 = vand.u32 4294901760, %v6715_v19  ;;  %v6781_v31 = vand.u32 4294901760, %v3760_v44  ;;  %v3762_v56 = vld [vmem:[%s7540_s0 + $0x1d8] sm:$0xff]  ;;  %v8389_v3 = vand.u32 4294901760, %v6730_v49 }
 0x10c   :  { %8382 = vst [vmem:[#allocation94_spill] sm:$0xff] %v6771_v48  ;;  %v3866_v10 = vpop.f32.mrf.mxu0  ;;  %v6783_v57 = vadd.f32 %v3941_v63, %v3861_v32  ;;  %2536 = vmatmul.mubr.f32.gmra.mxu1 %v6575_v47  ;;  %4469 = vmatprep.subr.mxu0 %v8385_v17  ;;  %v6796_v63 = vand.u32 4294901760, %v3759_v23  ;;  %v2163_v17 = vand.u32 4294901760, %v2162_v11 }
 0x10d   :  { %v2171_v60 = vsub.f32 %v6715_v19, %v8383_v52  ;;  %8384 = vst [vmem:[#allocation95_spill] sm:$0xff] %v6781_v31  ;;  %v3867_v4 = vadd.f32 %v3866_v10, %v3865_v53  ;;  %v3943_v5 = vpop.f32.mrf.mxu1  ;;  %2541 = vmatprep.mubr.f32.mxu1 %v6589_v2  ;;  %v8386_v52 = vld [vmem:[#allocation31_spill] sm:$0xff]  ;;  %v6794_v19 = vsub.f32 %v3757_v61, %v6766_v55  ;;  %v8390_v10 = vld [vmem:[#allocation44_spill] sm:$0xff]  ;;  %v8392_v61 = vand.u32 4294901760, %v6749_v21 }
 0x10e   :  { %4548 = vmatpush3.msra.mxu1 %v8386_v52  ;;  %8388 = vst [vmem:[#allocation97_spill] sm:$0xff] %v6796_v63  ;;  %v3868_v32 = vpop.f32.mrf.mxu0  ;;  %2149 = vmatmul.mubr.f32.gmra.mxu0 %v2148_v38  ;;  %v3944_v47 = vadd.f32 %v3943_v5, %v3942_v15  ;;  %v2177_v53 = vsub.f32 %v6730_v49, %v8389_v3  ;;  %v6810_v38 = vand.u32 4294901760, %v3762_v56  ;;  %v3761_v3 = vld [vmem:[%s7540_s0 + $0x1d0] sm:$0xff]  ;;  %v8397_v2 = vld [vmem:[#allocation3_spill] sm:$0xff] }
 0x10f   :  { %8387 = vst [vmem:[#allocation96_spill] sm:$0xff] %v6794_v19  ;;  %4549 = vmatprep.subr.mxu1 %v8390_v10  ;;  %2158 = vmatprep.mubr.f32.mxu0 %v2157_v18  ;;  %v3945_v52 = vpop.f32.mrf.mxu1  ;;  %v2172_v37 = vand.u32 4294901760, %v2171_v60  ;;  %v2186_v13 = vsub.f32 %v6749_v21, %v8392_v61  ;;  %v6808_v5 = vsub.f32 %v3760_v44, %v6781_v31  ;;  %v8396_v18 = vld [vmem:[#allocation42_spill] sm:$0xff]  ;;  %v3764_v60 = vld [vmem:[%s7540_s0 + $0x1e8] sm:$0xff]  ;;  %v8398_v21 = vand.u32 4294901760, %v6764_v34  ;;  %v8400_v10 = vld [vmem:[#allocation40_spill] sm:$0xff] }
 0x110   :  { %4470 = vmatpush3.msra.mxu0 %v8391_v45  ;;  %8394 = vst [vmem:[#allocation99_spill] sm:$0xff] %v6810_v38  ;;  %v3869_v11 = vpop.f32.mrf.mxu0  ;;  %v6815_v15 = vadd.f32 %v3944_v47, %v3864_v51  ;;  %2543 = vmatmul.mubr.f32.gmra.mxu1 %v6613_v62  ;;  %v6829_v51 = vsub.f32 %v3759_v23, %v6796_v63  ;;  %v2178_v45 = vand.u32 4294901760, %v2177_v53 }
 0x111   :  { %8393 = vst [vmem:[#allocation98_spill] sm:$0xff] %v6808_v5  ;;  %4471 = vmatprep.subr.mxu0 %v8396_v18  ;;  %v3870_v61 = vadd.f32 %v3869_v11, %v3868_v32  ;;  %v3946_v44 = vpop.f32.mrf.mxu1  ;;  %2548 = vmatprep.mubr.f32.mxu1 %v6619_v54  ;;  %v2192_v49 = vsub.f32 %v6764_v34, %v8398_v21  ;;  %v8401_v32 = vand.u32 4294901760, %v6771_v48  ;;  %v6835_v54 = vand.u32 4294901760, %v3761_v3  ;;  %v8403_v34 = vld [vmem:[#allocation45_spill] sm:$0xff] }
 0x112   :  { %8395 = vst [vmem:[#allocation100_spill] sm:$0xff] %v6815_v15  ;;  %4550 = vmatpush3.msra.mxu1 %v8397_v2  ;;  %8399 = vst [vmem:[#allocation101_spill] sm:$0xff] %v6829_v51  ;;  %v3871_v62 = vpop.f32.mrf.mxu0  ;;  %2164 = vmatmul.mubr.f32.gmra.mxu0 %v2163_v17  ;;  %v3947_v18 = vadd.f32 %v3946_v44, %v3945_v52  ;;  %v2187_v21 = vand.u32 4294901760, %v2186_v13  ;;  %v6840_v47 = vsub.f32 %v3762_v56, %v6810_v38  ;;  %v3763_v52 = vld [vmem:[%s7540_s0 + $0x1e0] sm:$0xff]  ;;  %v3766_v13 = vld [vmem:[%s7540_s0 + $0x1f8] sm:$0xff] }
 0x113   :  { %4551 = vmatprep.subr.mxu1 %v8400_v10  ;;  %v2201_v11 = vsub.f32 %v6771_v48, %v8401_v32  ;;  %8402 = vst [vmem:[#allocation102_spill] sm:$0xff] %v6835_v54  ;;  %2173 = vmatprep.mubr.f32.mxu0 %v2172_v37  ;;  %v3948_v2 = vpop.f32.mrf.mxu1  ;;  %v6842_v17 = vand.u32 4294901760, %v3764_v60  ;;  %v8407_v37 = vld [vmem:[#allocation10_spill] sm:$0xff]  ;;  %v2193_v23 = vand.u32 4294901760, %v2192_v49  ;;  %v8408_v48 = vld [vmem:[#allocation7_spill] sm:$0xff] }
 0x114   :  { %4472 = vmatpush3.msra.mxu0 %v8403_v34  ;;  %8404 = vst [vmem:[#allocation103_spill] sm:$0xff] %v6840_v47  ;;  %v3872_v53 = vpop.f32.mrf.mxu0  ;;  %v6847_v44 = vadd.f32 %v3947_v18, %v3867_v4  ;;  %2550 = vmatmul.mubr.f32.gmra.mxu1 %v6639_v35  ;;  %v8409_v34 = vand.u32 4294901760, %v6794_v19 }
 0x115   :  { %8405 = vst [vmem:[#allocation104_spill] sm:$0xff] %v6842_v17  ;;  %4473 = vmatprep.subr.mxu0 %v8407_v37  ;;  %v3873_v32 = vadd.f32 %v3872_v53, %v3871_v62  ;;  %v3949_v56 = vpop.f32.mrf.mxu1  ;;  %2555 = vmatprep.mubr.f32.mxu1 %v6641_v9  ;;  %v2202_v10 = vand.u32 4294901760, %v2201_v11  ;;  %v6862_v62 = vsub.f32 %v3761_v3, %v6835_v54  ;;  %v6864_v53 = vand.u32 4294901760, %v3763_v52  ;;  %v8413_v9 = vld [vmem:[#allocation48_spill] sm:$0xff] }
 0x116   :  { %8406 = vst [vmem:[#allocation105_spill] sm:$0xff] %v6847_v44  ;;  %4552 = vmatpush3.msra.mxu1 %v8408_v48  ;;  %v2207_v4 = vsub.f32 %v6794_v19, %v8409_v34  ;;  %v3874_v35 = vpop.f32.mrf.mxu0  ;;  %2179 = vmatmul.mubr.f32.gmra.mxu0 %v2178_v45  ;;  %v3950_v37 = vadd.f32 %v3949_v56, %v3948_v2  ;;  %v8410_v44 = vld [vmem:[#allocation8_spill] sm:$0xff]  ;;  %v8414_v48 = vand.u32 4294901760, %v6808_v5  ;;  %v6874_v2 = vand.u32 4294901760, %v3766_v13  ;;  %v8417_v56 = vld [vmem:[#allocation2_spill] sm:$0xff] }
 0x117   :  { %4553 = vmatprep.subr.mxu1 %v8410_v44  ;;  %8411 = vst [vmem:[#allocation106_spill] sm:$0xff] %v6862_v62  ;;  %8412 = vst [vmem:[#allocation107_spill] sm:$0xff] %v6864_v53  ;;  %2188 = vmatprep.mubr.f32.mxu0 %v2187_v21  ;;  %v3951_v49 = vpop.f32.mrf.mxu1  ;;  %v6872_v45 = vsub.f32 %v3764_v60, %v6842_v17  ;;  %v3765_v3 = vld [vmem:[%s7540_s0 + $0x1f0] sm:$0xff]  ;;  %v8418_v60 = vld [vmem:[#allocation9_spill] sm:$0xff] }
 0x118   :  { %4474 = vmatpush3.msra.mxu0 %v8413_v9  ;;  %v2216_v34 = vsub.f32 %v6808_v5, %v8414_v48  ;;  %8416 = vst [vmem:[#allocation109_spill] sm:$0xff] %v6874_v2  ;;  %v3875_v11 = vpop.f32.mrf.mxu0  ;;  %v6879_v21 = vadd.f32 %v3950_v37, %v3870_v61  ;;  %2557 = vmatmul.mubr.f32.gmra.mxu1 %v6667_v39  ;;  %v2208_v18 = vand.u32 4294901760, %v2207_v4  ;;  %v8419_v5 = vand.u32 4294901760, %v6829_v51  ;;  %v8420_v61 = vld [vmem:[#allocation12_spill] sm:$0xff] }
 0x119   :  { %8415 = vst [vmem:[#allocation108_spill] sm:$0xff] %v6872_v45  ;;  %4475 = vmatprep.subr.mxu0 %v8417_v56  ;;  %v3876_v19 = vadd.f32 %v3875_v11, %v3874_v35  ;;  %v3952_v48 = vpop.f32.mrf.mxu1  ;;  %2562 = vmatprep.mubr.f32.mxu1 %v6685_v8  ;;  %v6891_v39 = vsub.f32 %v3763_v52, %v6864_v53  ;;  %v6893_v35 = vand.u32 4294901760, %v3765_v3  ;;  %v8423_v8 = vld [vmem:[#allocation14_spill] sm:$0xff]  ;;  %v8426_v52 = vld [vmem:[#allocation57_spill] sm:$0xff] }
 0x11a   :  { %4554 = vmatpush3.msra.mxu1 %v8418_v60  ;;  %v2222_v9 = vsub.f32 %v6829_v51, %v8419_v5  ;;  %v3877_v44 = vpop.f32.mrf.mxu0  ;;  %2194 = vmatmul.mubr.f32.gmra.mxu0 %v2193_v23  ;;  %v3953_v15 = vadd.f32 %v3952_v48, %v3951_v49  ;;  %v2217_v11 = vand.u32 4294901760, %v2216_v34  ;;  %v8424_v60 = vand.u32 4294901760, %v6840_v47 }
 0x11b   :  { %4555 = vmatprep.subr.mxu1 %v8420_v61  ;;  %8421 = vst [vmem:[#allocation2_spill] sm:$0xff] %v6891_v39  ;;  %8422 = vst [vmem:[#allocation12_spill] sm:$0xff] %v6893_v35  ;;  %2203 = vmatprep.mubr.f32.mxu0 %v2202_v10  ;;  %v3954_v4 = vpop.f32.mrf.mxu1  ;;  %v6901_v49 = vsub.f32 %v3766_v13, %v6874_v2  ;;  %v8428_v13 = vand.u32 4294901760, %v6862_v62 }
 0x11c   :  { %4476 = vmatpush3.msra.mxu0 %v8423_v8  ;;  %v2231_v5 = vsub.f32 %v6840_v47, %v8424_v60  ;;  %v3878_v48 = vpop.f32.mrf.mxu0  ;;  %v6903_v37 = vadd.f32 %v3953_v15, %v3873_v32  ;;  %2564 = vmatmul.mubr.f32.gmra.mxu1 %v6699_v43  ;;  %v2223_v51 = vand.u32 4294901760, %v2222_v9  ;;  %v8427_v8 = vld [vmem:[#allocation49_spill] sm:$0xff]  ;;  %v8429_v15 = vld [vmem:[#allocation54_spill] sm:$0xff]  ;;  %v6915_v43 = vsub.f32 %v3765_v3, %v6893_v35  ;;  %v8431_v9 = vld [vmem:[#allocation4_spill] sm:$0xff] }
 0x11d   :  { %8425 = vst [vmem:[#allocation110_spill] sm:$0xff] %v6901_v49  ;;  %4477 = vmatprep.subr.mxu0 %v8426_v52  ;;  %v3879_v10 = vadd.f32 %v3878_v48, %v3877_v44  ;;  %v3955_v34 = vpop.f32.mrf.mxu1  ;;  %2569 = vmatprep.mubr.f32.mxu1 %v6717_v26  ;;  %v2237_v47 = vsub.f32 %v6862_v62, %v8428_v13  ;;  %v8432_v26 = vand.u32 4294901760, %v6872_v45  ;;  %v8433_v32 = vld [vmem:[#allocation6_spill] sm:$0xff] }
 0x11e   :  { %4556 = vmatpush3.msra.mxu1 %v8427_v8  ;;  %v3880_v60 = vpop.f32.mrf.mxu0  ;;  %2209 = vmatmul.mubr.f32.gmra.mxu0 %v2208_v18  ;;  %v3956_v23 = vadd.f32 %v3955_v34, %v3954_v4  ;;  %8430 = vst [vmem:[#allocation57_spill] sm:$0xff] %v6915_v43  ;;  %v2232_v48 = vand.u32 4294901760, %v2231_v5 }
 0x11f   :  { %4557 = vmatprep.subr.mxu1 %v8429_v15  ;;  %2218 = vmatprep.mubr.f32.mxu0 %v2217_v11  ;;  %v3957_v44 = vpop.f32.mrf.mxu1  ;;  %v2246_v18 = vsub.f32 %v6872_v45, %v8432_v26  ;;  %v8434_v11 = vld [vmem:[#allocation55_spill] sm:$0xff]  ;;  %v2238_v15 = vand.u32 4294901760, %v2237_v47  ;;  %v8435_v26 = vand.u32 4294901760, %v6891_v39  ;;  %v8439_v47 = vld [vmem:[#allocation69_spill] sm:$0xff] }
 0x120   :  { %4478 = vmatpush3.msra.mxu0 %v8431_v9  ;;  %v3881_v34 = vpop.f32.mrf.mxu0  ;;  %v6922_v13 = vadd.f32 %v3956_v23, %v3876_v19  ;;  %2571 = vmatmul.mubr.f32.gmra.mxu1 %v6732_v12  ;;  %v8436_v19 = vld [vmem:[#allocation58_spill] sm:$0xff] }
 0x121   :  { %4479 = vmatprep.subr.mxu0 %v8433_v32  ;;  %v3882_v3 = vadd.f32 %v3881_v34, %v3880_v60  ;;  %v3958_v62 = vpop.f32.mrf.mxu1  ;;  %2576 = vmatprep.mubr.f32.mxu1 %v6738_v27  ;;  %v2252_v4 = vsub.f32 %v6891_v39, %v8435_v26  ;;  %v2247_v60 = vand.u32 4294901760, %v2246_v18  ;;  %v8437_v34 = vld [vmem:[#allocation64_spill] sm:$0xff]  ;;  %v8438_v27 = vand.u32 4294901760, %v6901_v49 }
 0x122   :  { %4558 = vmatpush3.msra.mxu1 %v8434_v11  ;;  %v3883_v5 = vpop.f32.mrf.mxu0  ;;  %2224 = vmatmul.mubr.f32.gmra.mxu0 %v2223_v51  ;;  %v3959_v9 = vadd.f32 %v3958_v62, %v3957_v44 }
 0x123   :  { %4559 = vmatprep.subr.mxu1 %v8436_v19  ;;  %2233 = vmatprep.mubr.f32.mxu0 %v2232_v48  ;;  %v3960_v12 = vpop.f32.mrf.mxu1  ;;  %v2261_v45 = vsub.f32 %v6901_v49, %v8438_v27  ;;  %v8440_v48 = vld [vmem:[#allocation59_spill] sm:$0xff]  ;;  %v2253_v39 = vand.u32 4294901760, %v2252_v4  ;;  %v8443_v49 = vld [vmem:[#allocation70_spill] sm:$0xff]  ;;  %v8445_v4 = vld [vmem:[#allocation73_spill] sm:$0xff] }
 0x124   :  { %4480 = vmatpush3.msra.mxu0 %v8437_v34  ;;  %v3884_v51 = vpop.f32.mrf.mxu0  ;;  %v6937_v62 = vadd.f32 %v3959_v9, %v3879_v10  ;;  %2578 = vmatmul.mubr.f32.gmra.mxu1 %v6766_v55  ;;  %v8441_v34 = vand.u32 4294901760, %v6915_v43  ;;  %v8442_v10 = vld [vmem:[#allocation61_spill] sm:$0xff] }
 0x125   :  { %4481 = vmatprep.subr.mxu0 %v8439_v47  ;;  %v3885_v44 = vadd.f32 %v3884_v51, %v3883_v5  ;;  %v3961_v26 = vpop.f32.mrf.mxu1  ;;  %2583 = vmatprep.mubr.f32.mxu1 %v6781_v31  ;;  %v2262_v55 = vand.u32 4294901760, %v2261_v45  ;;  %v8444_v31 = vld [vmem:[#allocation26_spill] sm:$0xff]  ;;  %v8446_v45 = vld [vmem:[#allocation65_spill] sm:$0xff] }
 0x126   :  { %4560 = vmatpush3.msra.mxu1 %v8440_v48  ;;  %v3886_v18 = vpop.f32.mrf.mxu0  ;;  %2239 = vmatmul.mubr.f32.gmra.mxu0 %v2238_v15  ;;  %v3962_v23 = vadd.f32 %v3961_v26, %v3960_v12  ;;  %v2267_v27 = vsub.f32 %v6915_v43, %v8441_v34 }
 0x127   :  { %4561 = vmatprep.subr.mxu1 %v8442_v10  ;;  %2248 = vmatprep.mubr.f32.mxu0 %v2247_v60  ;;  %v3963_v9 = vpop.f32.mrf.mxu1 }
 0x128   :  { %4482 = vmatpush3.msra.mxu0 %v8443_v49  ;;  %v3887_v5 = vpop.f32.mrf.mxu0  ;;  %v6948_v51 = vadd.f32 %v3962_v23, %v3882_v3  ;;  %2585 = vmatmul.mubr.f32.gmra.mxu1 %v6796_v63  ;;  %v2268_v26 = vand.u32 4294901760, %v2267_v27  ;;  %v8447_v3 = vld [vmem:[#allocation17_spill] sm:$0xff] }
 0x129   :  { %4483 = vmatprep.subr.mxu0 %v8444_v31  ;;  %v3888_v12 = vadd.f32 %v3887_v5, %v3886_v18  ;;  %v3964_v15 = vpop.f32.mrf.mxu1  ;;  %2590 = vmatprep.mubr.f32.mxu1 %v6810_v38  ;;  %v8448_v18 = vld [vmem:[#allocation79_spill] sm:$0xff] }
 0x12a   :  { %4484 = vmatpush3.msra.mxu0 %v8445_v4  ;;  %v3889_v34 = vpop.f32.mrf.mxu0  ;;  %v3965_v60 = vadd.f32 %v3964_v15, %v3963_v9  ;;  %4562 = vmatpush3.msra.mxu1 %v8446_v45  ;;  %v8451_v15 = vld [vmem:[#allocation16_spill] sm:$0xff] }
 0x12b   :  { %2254 = vmatmul.mubr.f32.gmra.mxu0 %v2253_v39  ;;  %v3966_v43 = vpop.f32.mrf.mxu1  ;;  %4485 = vmatprep.subr.mxu0 %v8447_v3  ;;  %v8449_v39 = vld [vmem:[#allocation22_spill] sm:$0xff]  ;;  %v8452_v3 = vld [vmem:[#allocation13_spill] sm:$0xff] }
 0x12c   :  { %2263 = vmatprep.mubr.f32.mxu0 %v2262_v55  ;;  %v3890_v23 = vpop.f32.mrf.mxu0  ;;  %v6956_v63 = vadd.f32 %v3965_v60, %v3885_v44  ;;  %2592 = vmatmul.mubr.f32.gmra.mxu1 %v6835_v54  ;;  %v8450_v55 = vld [vmem:[#allocation11_spill] sm:$0xff] }
 0x12d   :  { %4486 = vmatpush3.msra.mxu0 %v8448_v18  ;;  %v3891_v5 = vadd.f32 %v3890_v23, %v3889_v34  ;;  %v3967_v38 = vpop.f32.mrf.mxu1  ;;  %2597 = vmatprep.mubr.f32.mxu1 %v6842_v17  ;;  %v8453_v34 = vand.u32 4294901760, %v5943_v14 }
 0x12e   :  { %4563 = vmatprep.subr.mxu1 %v8449_v39  ;;  %v3892_v27 = vpop.f32.mrf.mxu0  ;;  %v3968_v9 = vadd.f32 %v3967_v38, %v3966_v43  ;;  %v8455_v38 = vld [vmem:[#allocation30_spill] sm:$0xff] }
 0x12f   :  { %2269 = vmatmul.mubr.f32.gmra.mxu0 %v2268_v26  ;;  %4564 = vmatpush3.msra.mxu1 %v8450_v55  ;;  %v8454_v26 = vld [vmem:[#allocation15_spill] sm:$0xff] }
 0x130   :  { %2741 = vmatprep.mubr.f32.mxu0 %v8451_v15  ;;  %4565 = vmatprep.subr.mxu1 %v8452_v3  ;;  %v3893_v44 = vpop.f32.mrf.mxu0  ;;  %v6965_v60 = vadd.f32 %v3968_v9, %v3888_v12  ;;  %v3969_v54 = vpop.f32.mrf.mxu1  ;;  %v8456_v12 = vld [vmem:[#allocation80_spill] sm:$0xff]  ;;  %v8457_v9 = vand.u32 4294901760, %v5987_v46 }
 0x131   :  { %2599 = vmatmul.mubr.f32.gmra.mxu1 %v6864_v53  ;;  %4615 = vmatprep.subr.mxu0 %v8453_v34  ;;  %v3894_v23 = vadd.f32 %v3893_v44, %v3892_v27  ;;  %v8458_v27 = vand.u32 4294901760, %v6003_v40 }
 0x132   :  { %2604 = vmatprep.mubr.f32.mxu1 %v6874_v2  ;;  %4566 = vmatpush3.msra.mxu1 %v8454_v26  ;;  %v4007_v43 = vpop.f32.mrf.mxu0  ;;  %v3970_v17 = vpop.f32.mrf.mxu1  ;;  %v8459_v2 = vand.u32 4294901760, %v8451_v15 }
 0x133   :  { %2744 = vmatmul.mubr.f32.vlgmr.msra.gmra.mxu0 %v8455_v38  ;;  %4695 = vmatprep.subr.mxu1 %v5925_v1  ;;  %v3971_v3 = vadd.f32 %v3970_v17, %v3969_v54  ;;  %v8460_v1 = vand.u32 4294901760, %v6017_v20  ;;  %v8461_v17 = vld [vmem:[#allocation81_spill] sm:$0xff]  ;;  %v8465_v20 = vand.u32 4294901760, %v8455_v38 }
 0x134   :  { %2750 = vmatprep.mubr.f32.mxu0 %v8456_v12  ;;  %4616 = vmatpush3.msra.mxu0 %v8457_v9  ;;  %v4008_v53 = vpop.f32.mrf.mxu0  ;;  %v3972_v14 = vpop.f32.mrf.mxu1  ;;  %v8462_v9 = vand.u32 4294901760, %v6025_v42 }
 0x135   :  { %2606 = vmatmul.mubr.f32.gmra.mxu1 %v6893_v35  ;;  %4617 = vmatprep.subr.mxu0 %v8458_v27  ;;  %v6980_v44 = vadd.f32 %v3971_v3, %v3891_v5  ;;  %v4009_v34 = vadd.f32 %v4008_v53, %v4007_v43  ;;  %v8463_v27 = vld [vmem:[#allocation85_spill] sm:$0xff]  ;;  %v8464_v53 = vand.u32 4294901760, %v6031_v33  ;;  %v8466_v5 = vand.u32 4294901760, %v6041_v41  ;;  %v8467_v43 = vld [vmem:[#allocation20_spill] sm:$0xff] }
 0x136   :  { %2983 = vmatprep.mubr.f32.mxu1 %v8459_v2  ;;  %4618 = vmatpush3.msra.mxu0 %v8460_v1  ;;  %v4010_v54 = vpop.f32.mrf.mxu0  ;;  %v3973_v46 = vpop.f32.mrf.mxu1  ;;  %v8471_v41 = vld [vmem:[#allocation21_spill] sm:$0xff] }
 0x137   :  { %2753 = vmatmul.mubr.f32.gmra.mxu0 %v8461_v17  ;;  %4619 = vmatprep.subr.mxu0 %v8462_v9  ;;  %v887_v35 = vadd.f32 %v4009_v34, %v6655_v50  ;;  %v3974_v40 = vadd.f32 %v3973_v46, %v3972_v14  ;;  %v8468_v50 = vand.u32 4294901760, %v8456_v12  ;;  %v8469_v34 = vld [vmem:[#allocation39_spill] sm:$0xff]  ;;  %v8472_v9 = vand.u32 4294901760, %v8461_v17 }
 0x138   :  { %2759 = vmatprep.mubr.f32.mxu0 %v8463_v27  ;;  %4620 = vmatpush3.msra.mxu0 %v8464_v53  ;;  %v4011_v3 = vpop.f32.mrf.mxu0  ;;  %v4087_v2 = vpop.f32.mrf.mxu1  ;;  %v8470_v46 = vld [vmem:[#allocation43_spill] sm:$0xff]  ;;  %v8473_v53 = vand.u32 4294901760, %v8463_v27  ;;  %v8477_v27 = vand.u32 4294901760, %v8469_v34 }
 0x139   :  { %2987 = vmatmul.mubr.f32.vlgmr.msra.gmra.mxu1 %v8465_v20  ;;  %4621 = vmatprep.subr.mxu0 %v8466_v5  ;;  %v6997_v15 = vadd.f32 %v3974_v40, %v3894_v23  ;;  %v4012_v42 = vadd.f32 %v4011_v3, %v4010_v54  ;;  %v8475_v20 = vld [vmem:[#allocation50_spill] sm:$0xff] }
 0x13a   :  { %4696 = vmatpush3.msra.mxu1 %v8467_v43  ;;  %2994 = vmatprep.mubr.f32.mxu1 %v8468_v50  ;;  %v4013_v14 = vpop.f32.mrf.mxu0  ;;  %v4088_v33 = vpop.f32.mrf.mxu1 }
 0x13b   :  { %2762 = vmatmul.mubr.f32.gmra.mxu0 %v8469_v34  ;;  %4697 = vmatprep.subr.mxu1 %v5969_v36  ;;  %v896_v38 = vadd.f32 %v4012_v42, %v6687_v59  ;;  %v4089_v1 = vadd.f32 %v4088_v33, %v4087_v2  ;;  %v8474_v59 = vld [vmem:[#allocation46_spill] sm:$0xff] }
 0x13c   :  { %2768 = vmatprep.mubr.f32.mxu0 %v8470_v46  ;;  %4698 = vmatpush3.msra.mxu1 %v8471_v41  ;;  %v4014_v23 = vpop.f32.mrf.mxu0  ;;  %v4090_v54 = vpop.f32.mrf.mxu1  ;;  %v8483_v41 = vld [vmem:[#allocation25_spill] sm:$0xff] }
 0x13d   :  { %2998 = vmatmul.mubr.f32.gmra.mxu1 %v8472_v9  ;;  %4699 = vmatprep.subr.mxu1 %v5989_v0  ;;  %v4015_v12 = vadd.f32 %v4014_v23, %v4013_v14  ;;  %v7010_v40 = vadd.f32 %v4089_v1, %v887_v35  ;;  %v8476_v0 = vand.u32 4294901760, %v6064_v30  ;;  %v8481_v14 = vld [vmem:[#allocation52_spill] sm:$0xff]  ;;  %v8484_v23 = vand.u32 4294901760, %v8483_v41  ;;  %v8500_v41 = vld [vmem:[#allocation75_spill] sm:$0xff] }
 0x13e   :  { %3005 = vmatprep.mubr.f32.mxu1 %v8473_v53  ;;  %4700 = vmatpush3.msra.mxu1 %v5995_v7  ;;  %v4016_v36 = vpop.f32.mrf.mxu0  ;;  %v4091_v3 = vpop.f32.mrf.mxu1  ;;  %v8478_v7 = vld [vmem:[#allocation36_spill] sm:$0xff]  ;;  %v8488_v53 = vld [vmem:[#allocation62_spill] sm:$0xff] }
 0x13f   :  { %2771 = vmatmul.mubr.f32.gmra.mxu0 %v8474_v59  ;;  %4701 = vmatprep.subr.mxu1 %v6005_v16  ;;  %v905_v2 = vadd.f32 %v4015_v12, %v6722_v58  ;;  %v4092_v17 = vadd.f32 %v4091_v3, %v4090_v54  ;;  %v8479_v42 = vand.u32 4294901760, %v8478_v7  ;;  %v8480_v16 = vand.u32 4294901760, %v8470_v46  ;;  %v8482_v1 = vld [vmem:[#allocation56_spill] sm:$0xff] }
 0x140   :  { %2777 = vmatprep.mubr.f32.mxu0 %v8475_v20  ;;  %4622 = vmatpush3.msra.mxu0 %v8476_v0  ;;  %v4017_v35 = vpop.f32.mrf.mxu0  ;;  %v4093_v5 = vpop.f32.mrf.mxu1  ;;  %v8485_v46 = vand.u32 4294901760, %v8474_v59 }
 0x141   :  { %3009 = vmatmul.mubr.f32.gmra.mxu1 %v8477_v27  ;;  %4623 = vmatprep.subr.mxu0 %v8479_v42  ;;  %v4018_v43 = vadd.f32 %v4017_v35, %v4016_v36  ;;  %v7025_v50 = vadd.f32 %v4092_v17, %v896_v38  ;;  %v8489_v17 = vld [vmem:[#allocation66_spill] sm:$0xff] }
 0x142   :  { %3016 = vmatprep.mubr.f32.mxu1 %v8480_v16  ;;  %4702 = vmatpush3.msra.mxu1 %v6033_v24  ;;  %v4019_v58 = vpop.f32.mrf.mxu0  ;;  %v4094_v30 = vpop.f32.mrf.mxu1  ;;  %v8486_v24 = vand.u32 4294901760, %v6116_v29  ;;  %v8490_v29 = vld [vmem:[#allocation27_spill] sm:$0xff] }
 0x143   :  { %2780 = vmatmul.mubr.f32.gmra.mxu0 %v8481_v14  ;;  %4703 = vmatprep.subr.mxu1 %v6035_v22  ;;  %v914_v34 = vadd.f32 %v4018_v43, %v6751_v25  ;;  %v4095_v33 = vadd.f32 %v4094_v30, %v4093_v5  ;;  %v8487_v22 = vand.u32 4294901760, %v8475_v20  ;;  %v8491_v0 = vand.u32 4294901760, %v8490_v29  ;;  %v8497_v43 = vld [vmem:[#allocation68_spill] sm:$0xff]  ;;  %v8508_v29 = vld [vmem:[#allocation78_spill] sm:$0xff] }
 0x144   :  { %2786 = vmatprep.mubr.f32.mxu0 %v8482_v1  ;;  %4624 = vmatpush3.msra.mxu0 %v8484_v23  ;;  %v4020_v38 = vpop.f32.mrf.mxu0  ;;  %v4096_v54 = vpop.f32.mrf.mxu1  ;;  %v8492_v20 = vand.u32 4294901760, %v8481_v14  ;;  %v8499_v30 = vld [vmem:[#allocation100_spill] sm:$0xff]  ;;  %v8501_v23 = vld [vmem:[#allocation34_spill] sm:$0xff] }
 0x145   :  { %3020 = vmatmul.mubr.f32.gmra.mxu1 %v8485_v46  ;;  %4625 = vmatprep.subr.mxu0 %v8486_v24  ;;  %v4021_v9 = vadd.f32 %v4020_v38, %v4019_v58  ;;  %v7040_v12 = vadd.f32 %v4095_v33, %v905_v2  ;;  %v8498_v58 = vld [vmem:[#allocation37_spill] sm:$0xff]  ;;  %v8502_v38 = vand.u32 4294901760, %v8501_v23  ;;  %v8504_v46 = vld [vmem:[#allocation38_spill] sm:$0xff] }
 0x146   :  { %3027 = vmatprep.mubr.f32.mxu1 %v8487_v22  ;;  %4704 = vmatpush3.msra.mxu1 %v6066_v28  ;;  %v4022_v25 = vpop.f32.mrf.mxu0  ;;  %v4097_v36 = vpop.f32.mrf.mxu1  ;;  %v8493_v28 = vld [vmem:[#allocation32_spill] sm:$0xff]  ;;  %v8505_v24 = vand.u32 4294901760, %v8504_v46 }
 0x147   :  { %2789 = vmatmul.mubr.f32.gmra.mxu0 %v8488_v53  ;;  %4705 = vmatprep.subr.mxu1 %v6079_v6  ;;  %v923_v59 = vadd.f32 %v4021_v9, %v6783_v57  ;;  %v4098_v3 = vadd.f32 %v4097_v36, %v4096_v54  ;;  %v8494_v5 = vand.u32 4294901760, %v8493_v28  ;;  %v8495_v6 = vand.u32 4294901760, %v8482_v1  ;;  %v8496_v57 = vld [vmem:[#allocation23_spill] sm:$0xff]  ;;  %v8511_v28 = vld [vmem:[#allocation82_spill] sm:$0xff]  ;;  %v8521_v46 = vld [vmem:[#allocation88_spill] sm:$0xff] }
 0x148   :  { %2795 = vmatprep.mubr.f32.mxu0 %v8489_v17  ;;  %4626 = vmatpush3.msra.mxu0 %v8491_v0  ;;  %v4023_v2 = vpop.f32.mrf.mxu0  ;;  %v4099_v35 = vpop.f32.mrf.mxu1  ;;  %v8503_v1 = vand.u32 4294901760, %v8488_v53  ;;  %v8507_v36 = vld [vmem:[#allocation31_spill] sm:$0xff] }
 0x149   :  { %3031 = vmatmul.mubr.f32.gmra.mxu1 %v8492_v20  ;;  %4627 = vmatprep.subr.mxu0 %v8494_v5  ;;  %v4024_v27 = vadd.f32 %v4023_v2, %v4022_v25  ;;  %v7055_v7 = vadd.f32 %v4098_v3, %v914_v34  ;;  %v8506_v25 = vand.u32 4294901760, %v8489_v17  ;;  %v8509_v2 = vld [vmem:[#allocation44_spill] sm:$0xff]  ;;  %v8512_v5 = vld [vmem:[#allocation5_spill] sm:$0xff]  ;;  %v8514_v17 = vand.u32 4294901760, %v8497_v43 }
 0x14a   :  { %3038 = vmatprep.mubr.f32.mxu1 %v8495_v6  ;;  %4706 = vmatpush3.msra.mxu1 %v8496_v57  ;;  %v4025_v42 = vpop.f32.mrf.mxu0  ;;  %v4100_v16 = vpop.f32.mrf.mxu1  ;;  %v8515_v57 = vld [vmem:[#allocation42_spill] sm:$0xff] }
 0x14b   :  { %2798 = vmatmul.mubr.f32.gmra.mxu0 %v8497_v43  ;;  %4707 = vmatprep.subr.mxu1 %v8498_v58  ;;  %v932_v14 = vadd.f32 %v4024_v27, %v8499_v30  ;;  %v4101_v33 = vadd.f32 %v4100_v16, %v4099_v35  ;;  %v8510_v35 = vld [vmem:[#allocation105_spill] sm:$0xff]  ;;  %v8513_v27 = vand.u32 4294901760, %v8512_v5  ;;  %v8517_v30 = vand.u32 4294901760, %v8500_v41 }
 0x14c   :  { %2804 = vmatprep.mubr.f32.mxu0 %v8500_v41  ;;  %4628 = vmatpush3.msra.mxu0 %v8502_v38  ;;  %v4026_v34 = vpop.f32.mrf.mxu0  ;;  %v4102_v54 = vpop.f32.mrf.mxu1  ;;  %v8519_v38 = vld [vmem:[#allocation86_spill] sm:$0xff]  ;;  %v8524_v41 = vand.u32 4294901760, %v8508_v29  ;;  %v8529_v5 = vld [vmem:[#allocation89_spill] sm:$0xff] }
 0x14d   :  { %3042 = vmatmul.mubr.f32.gmra.mxu1 %v8503_v1  ;;  %4629 = vmatprep.subr.mxu0 %v8505_v24  ;;  %v4027_v9 = vadd.f32 %v4026_v34, %v4025_v42  ;;  %v7070_v22 = vadd.f32 %v4101_v33, %v923_v59  ;;  %v8516_v42 = vand.u32 4294901760, %v8515_v57  ;;  %v8518_v33 = vld [vmem:[#allocation3_spill] sm:$0xff]  ;;  %v8522_v24 = vld [vmem:[#allocation45_spill] sm:$0xff]  ;;  %v8532_v57 = vld [vmem:[#allocation48_spill] sm:$0xff] }
 0x14e   :  { %3049 = vmatprep.mubr.f32.mxu1 %v8506_v25  ;;  %4708 = vmatpush3.msra.mxu1 %v8507_v36  ;;  %v4028_v3 = vpop.f32.mrf.mxu0  ;;  %v4103_v0 = vpop.f32.mrf.mxu1  ;;  %v8525_v36 = vld [vmem:[#allocation10_spill] sm:$0xff] }
 0x14f   :  { %2807 = vmatmul.mubr.f32.gmra.mxu0 %v8508_v29  ;;  %4709 = vmatprep.subr.mxu1 %v8509_v2  ;;  %v941_v53 = vadd.f32 %v4027_v9, %v8510_v35  ;;  %v4104_v20 = vadd.f32 %v4103_v0, %v4102_v54  ;;  %v8520_v54 = vld [vmem:[#allocation40_spill] sm:$0xff]  ;;  %v8523_v9 = vand.u32 4294901760, %v8522_v24  ;;  %v8527_v35 = vand.u32 4294901760, %v8511_v28 }
 0x150   :  { %2813 = vmatprep.mubr.f32.mxu0 %v8511_v28  ;;  %4630 = vmatpush3.msra.mxu0 %v8513_v27  ;;  %v4029_v59 = vpop.f32.mrf.mxu0  ;;  %v4105_v6 = vpop.f32.mrf.mxu1  ;;  %v8534_v28 = vand.u32 4294901760, %v8519_v38 }
 0x151   :  { %3053 = vmatmul.mubr.f32.gmra.mxu1 %v8514_v17  ;;  %4631 = vmatprep.subr.mxu0 %v8516_v42  ;;  %v4030_v16 = vadd.f32 %v4029_v59, %v4028_v3  ;;  %v7085_v58 = vadd.f32 %v4104_v20, %v932_v14  ;;  %v8526_v3 = vand.u32 4294901760, %v8525_v36  ;;  %v8530_v59 = vld [vmem:[#allocation8_spill] sm:$0xff]  ;;  %v8531_v17 = vld [vmem:[#allocation91_spill] sm:$0xff]  ;;  %v8533_v42 = vand.u32 4294901760, %v8532_v57 }
 0x152   :  { %3060 = vmatprep.mubr.f32.mxu1 %v8517_v30  ;;  %4710 = vmatpush3.msra.mxu1 %v8518_v33  ;;  %v4031_v23 = vpop.f32.mrf.mxu0  ;;  %v4106_v34 = vpop.f32.mrf.mxu1  ;;  %v8535_v30 = vand.u32 4294901760, %v8417_v56  ;;  %v8540_v56 = vld [vmem:[#allocation14_spill] sm:$0xff]  ;;  %v8543_v36 = vand.u32 4294901760, %v8426_v52  ;;  %v8548_v52 = vld [vmem:[#allocation4_spill] sm:$0xff] }
 0x153   :  { %2816 = vmatmul.mubr.f32.gmra.mxu0 %v8519_v38  ;;  %4711 = vmatprep.subr.mxu1 %v8520_v54  ;;  %v950_v43 = vadd.f32 %v4030_v16, %v6879_v21  ;;  %v4107_v1 = vadd.f32 %v4106_v34, %v4105_v6  ;;  %v8528_v21 = vld [vmem:[#allocation7_spill] sm:$0xff]  ;;  %v8536_v34 = vand.u32 4294901760, %v8521_v46 }
 0x154   :  { %2822 = vmatprep.mubr.f32.mxu0 %v8521_v46  ;;  %4632 = vmatpush3.msra.mxu0 %v8523_v9  ;;  %v4032_v14 = vpop.f32.mrf.mxu0  ;;  %v4108_v25 = vpop.f32.mrf.mxu1  ;;  %v8542_v46 = vand.u32 4294901760, %v8529_v5 }
 0x155   :  { %3064 = vmatmul.mubr.f32.gmra.mxu1 %v8524_v41  ;;  %4633 = vmatprep.subr.mxu0 %v8526_v3  ;;  %v4033_v0 = vadd.f32 %v4032_v14, %v4031_v23  ;;  %v7100_v2 = vadd.f32 %v4107_v1, %v941_v53  ;;  %v8538_v1 = vld [vmem:[#allocation92_spill] sm:$0xff]  ;;  %v8539_v14 = vld [vmem:[#allocation94_spill] sm:$0xff] }
 0x156   :  { %3071 = vmatprep.mubr.f32.mxu1 %v8527_v35  ;;  %4712 = vmatpush3.msra.mxu1 %v8528_v21  ;;  %v4034_v20 = vpop.f32.mrf.mxu0  ;;  %v4109_v27 = vpop.f32.mrf.mxu1  ;;  %v8545_v35 = vld [vmem:[#allocation96_spill] sm:$0xff] }
 0x157   :  { %2825 = vmatmul.mubr.f32.gmra.mxu0 %v8529_v5  ;;  %4713 = vmatprep.subr.mxu1 %v8530_v59  ;;  %v959_v29 = vadd.f32 %v4033_v0, %v6903_v37  ;;  %v4110_v6 = vadd.f32 %v4109_v27, %v4108_v25  ;;  %v8537_v37 = vld [vmem:[#allocation9_spill] sm:$0xff]  ;;  %v8541_v25 = vand.u32 4294901760, %v8540_v56  ;;  %v8547_v59 = vld [vmem:[#allocation98_spill] sm:$0xff] }
 0x158   :  { %2831 = vmatprep.mubr.f32.mxu0 %v8531_v17  ;;  %4634 = vmatpush3.msra.mxu0 %v8533_v42  ;;  %v4035_v53 = vpop.f32.mrf.mxu0  ;;  %v4111_v16 = vpop.f32.mrf.mxu1  ;;  %v8560_v56 = vld [vmem:[#allocation106_spill] sm:$0xff] }
 0x159   :  { %3075 = vmatmul.mubr.f32.gmra.mxu1 %v8534_v28  ;;  %4635 = vmatprep.subr.mxu0 %v8535_v30  ;;  %v4036_v33 = vadd.f32 %v4035_v53, %v4034_v20  ;;  %v7115_v23 = vadd.f32 %v4110_v6, %v950_v43  ;;  %v8546_v20 = vld [vmem:[#allocation54_spill] sm:$0xff]  ;;  %v8549_v6 = vand.u32 4294901760, %v8548_v52  ;;  %v8553_v28 = vld [vmem:[#allocation101_spill] sm:$0xff] }
 0x15a   :  { %3082 = vmatprep.mubr.f32.mxu1 %v8536_v34  ;;  %4714 = vmatpush3.msra.mxu1 %v8537_v37  ;;  %v4037_v54 = vpop.f32.mrf.mxu0  ;;  %v4112_v24 = vpop.f32.mrf.mxu1  ;;  %v8554_v37 = vld [vmem:[#allocation103_spill] sm:$0xff] }
 0x15b   :  { %2834 = vmatmul.mubr.f32.gmra.mxu0 %v8538_v1  ;;  %4715 = vmatprep.subr.mxu1 %v8420_v61  ;;  %v968_v38 = vadd.f32 %v4036_v33, %v6922_v13  ;;  %v4113_v9 = vadd.f32 %v4112_v24, %v4111_v16  ;;  %v8544_v61 = vand.u32 4294901760, %v8531_v17  ;;  %v8550_v17 = vand.u32 4294901760, %v8538_v1 }
 0x15c   :  { %2840 = vmatprep.mubr.f32.mxu0 %v8539_v14  ;;  %4636 = vmatpush3.msra.mxu0 %v8541_v25  ;;  %v4038_v43 = vpop.f32.mrf.mxu0  ;;  %v4114_v41 = vpop.f32.mrf.mxu1  ;;  %v8552_v16 = vand.u32 4294901760, %v8539_v14 }
 0x15d   :  { %3086 = vmatmul.mubr.f32.gmra.mxu1 %v8542_v46  ;;  %4637 = vmatprep.subr.mxu0 %v8543_v36  ;;  %v4039_v3 = vadd.f32 %v4038_v43, %v4037_v54  ;;  %v7130_v0 = vadd.f32 %v4113_v9, %v959_v29  ;;  %v8561_v46 = vld [vmem:[#allocation108_spill] sm:$0xff] }
 0x15e   :  { %3093 = vmatprep.mubr.f32.mxu1 %v8544_v61  ;;  %4716 = vmatpush3.msra.mxu1 %v8427_v8  ;;  %v4040_v13 = vpop.f32.mrf.mxu0  ;;  %v4115_v21 = vpop.f32.mrf.mxu1  ;;  %v8551_v8 = vand.u32 4294901760, %v8433_v32  ;;  %v8555_v32 = vld [vmem:[#allocation64_spill] sm:$0xff]  ;;  %v8563_v61 = vand.u32 4294901760, %v8553_v28 }
 0x15f   :  { %2843 = vmatmul.mubr.f32.gmra.mxu0 %v8545_v35  ;;  %4717 = vmatprep.subr.mxu1 %v8546_v20  ;;  %v977_v5 = vadd.f32 %v4039_v3, %v6937_v62  ;;  %v4116_v27 = vadd.f32 %v4115_v21, %v4114_v41  ;;  %v8556_v54 = vand.u32 4294901760, %v8555_v32 }
 0x160   :  { %2849 = vmatprep.mubr.f32.mxu0 %v8547_v59  ;;  %4638 = vmatpush3.msra.mxu0 %v8549_v6  ;;  %v4041_v29 = vpop.f32.mrf.mxu0  ;;  %v4117_v57 = vpop.f32.mrf.mxu1 }
 0x161   :  { %3097 = vmatmul.mubr.f32.gmra.mxu1 %v8550_v17  ;;  %4639 = vmatprep.subr.mxu0 %v8551_v8  ;;  %v4042_v42 = vadd.f32 %v4041_v29, %v4040_v13  ;;  %v7145_v53 = vadd.f32 %v4116_v27, %v968_v38  ;;  %v8557_v38 = vand.u32 4294901760, %v8545_v35 }
 0x162   :  { %3104 = vmatprep.mubr.f32.mxu1 %v8552_v16  ;;  %4718 = vmatpush3.msra.mxu1 %v8434_v11  ;;  %v4043_v62 = vpop.f32.mrf.mxu0  ;;  %v4118_v30 = vpop.f32.mrf.mxu1  ;;  %v8558_v11 = vand.u32 4294901760, %v8439_v47  ;;  %v8562_v47 = vand.u32 4294901760, %v8443_v49  ;;  %v8567_v49 = vld [vmem:[#allocation2_spill] sm:$0xff] }
 0x163   :  { %2852 = vmatmul.mubr.f32.gmra.mxu0 %v8553_v28  ;;  %4719 = vmatprep.subr.mxu1 %v8436_v19  ;;  %v986_v33 = vadd.f32 %v4042_v42, %v6948_v51  ;;  %v4119_v34 = vadd.f32 %v4118_v30, %v4117_v57  ;;  %v8559_v19 = vand.u32 4294901760, %v8547_v59  ;;  %v8569_v59 = vld [vmem:[#allocation17_spill] sm:$0xff]  ;;  %v8571_v57 = vand.u32 4294901760, %v8560_v56 }
 0x164   :  { %2858 = vmatprep.mubr.f32.mxu0 %v8554_v37  ;;  %4640 = vmatpush3.msra.mxu0 %v8556_v54  ;;  %v4044_v1 = vpop.f32.mrf.mxu0  ;;  %v4120_v24 = vpop.f32.mrf.mxu1  ;;  %v8570_v52 = vand.u32 4294901760, %v8569_v59  ;;  %v8574_v42 = vld [vmem:[#allocation57_spill] sm:$0xff] }
 0x165   :  { %3108 = vmatmul.mubr.f32.gmra.mxu1 %v8557_v38  ;;  %4641 = vmatprep.subr.mxu0 %v8558_v11  ;;  %v4045_v9 = vadd.f32 %v4044_v1, %v4043_v62  ;;  %v7160_v14 = vadd.f32 %v4119_v34, %v977_v5  ;;  %v8576_v30 = vld [vmem:[#allocation13_spill] sm:$0xff] }
 0x166   :  { %3115 = vmatprep.mubr.f32.mxu1 %v8559_v19  ;;  %4720 = vmatpush3.msra.mxu1 %v8440_v48  ;;  %v4046_v51 = vpop.f32.mrf.mxu0  ;;  %v4121_v25 = vpop.f32.mrf.mxu1  ;;  %v8564_v48 = vand.u32 4294901760, %v8444_v31  ;;  %v8568_v31 = vld [vmem:[#allocation110_spill] sm:$0xff] }
 0x167   :  { %2861 = vmatmul.mubr.f32.gmra.mxu0 %v8560_v56  ;;  %4721 = vmatprep.subr.mxu1 %v8442_v10  ;;  %v995_v43 = vadd.f32 %v4045_v9, %v6956_v63  ;;  %v4122_v41 = vadd.f32 %v4121_v25, %v4120_v24  ;;  %v8565_v10 = vand.u32 4294901760, %v8554_v37  ;;  %v8566_v63 = vand.u32 4294901760, %v8445_v4  ;;  %v8580_v24 = vld [vmem:[#allocation76_spill] sm:$0xff]  ;;  %v8582_v56 = vld [vmem:[#allocation18_spill] sm:$0xff] }
 0x168   :  { %2867 = vmatprep.mubr.f32.mxu0 %v8561_v46  ;;  %4642 = vmatpush3.msra.mxu0 %v8562_v47  ;;  %v4047_v36 = vpop.f32.mrf.mxu0  ;;  %v4123_v3 = vpop.f32.mrf.mxu1  ;;  %v8572_v4 = vand.u32 4294901760, %v8448_v18  ;;  %v8575_v18 = vld [vmem:[#allocation24_spill] sm:$0xff]  ;;  %v8577_v37 = vand.u32 4294901760, %v8567_v49  ;;  %v8578_v32 = vand.u32 4294901760, %v8568_v31  ;;  %v8581_v9 = vand.u32 4294901760, %v8574_v42 }
 0x169   :  { %3119 = vmatmul.mubr.f32.gmra.mxu1 %v8563_v61  ;;  %4643 = vmatprep.subr.mxu0 %v8564_v48  ;;  %v4048_v13 = vadd.f32 %v4047_v36, %v4046_v51  ;;  %v7175_v35 = vadd.f32 %v4122_v41, %v986_v33  ;;  %v8584_v36 = vld [vmem:[#allocation83_spill] sm:$0xff] }
 0x16a   :  { %3126 = vmatprep.mubr.f32.mxu1 %v8565_v10  ;;  %4644 = vmatpush3.msra.mxu0 %v8566_v63  ;;  %v4049_v21 = vpop.f32.mrf.mxu0  ;;  %v4124_v20 = vpop.f32.mrf.mxu1  ;;  %v8585_v10 = vld [vmem:[#allocation33_spill] sm:$0xff] }
 0x16b   :  { %2870 = vmatmul.mubr.f32.gmra.mxu0 %v8567_v49  ;;  %4722 = vmatpush3.msra.mxu1 %v8446_v45  ;;  %v1004_v5 = vadd.f32 %v4048_v13, %v6965_v60  ;;  %v4125_v27 = vadd.f32 %v4124_v20, %v4123_v3  ;;  %v8573_v45 = vand.u32 4294901760, %v8561_v46 }
 0x16c   :  { %2876 = vmatprep.mubr.f32.mxu0 %v8568_v31  ;;  %4645 = vmatprep.subr.mxu0 %v8570_v52  ;;  %v4050_v6 = vpop.f32.mrf.mxu0  ;;  %v4126_v29 = vpop.f32.mrf.mxu1 }
 0x16d   :  { %3130 = vmatmul.mubr.f32.gmra.mxu1 %v8571_v57  ;;  %4646 = vmatpush3.msra.mxu0 %v8572_v4  ;;  %v4051_v17 = vadd.f32 %v4050_v6, %v4049_v21  ;;  %v7191_v8 = vadd.f32 %v4125_v27, %v995_v43  ;;  %v8583_v43 = vld [vmem:[#allocation19_spill] sm:$0xff]  ;;  %v1780_v21 = vld [vmem:[%s7541_s2] sm:$0xff] }
 0x16e   :  { %3137 = vmatprep.mubr.f32.mxu1 %v8573_v45  ;;  %4723 = vmatprep.subr.mxu1 %v8449_v39  ;;  %v7196_v60 = vpop.f32.mrf.mxu0  ;;  %v4127_v16 = vpop.f32.mrf.mxu1  ;;  %v8586_v27 = vld [vmem:[#allocation35_spill] sm:$0xff] }
 0x16f   :  { %2879 = vmatmul.mubr.f32.gmra.mxu0 %v8574_v42  ;;  %4724 = vmatpush3.msra.mxu1 %v8450_v55  ;;  %v1013_v62 = vadd.f32 %v4051_v17, %v6980_v44  ;;  %v4128_v28 = vadd.f32 %v4127_v16, %v4126_v29  ;;  %v8579_v44 = vld [vmem:[#allocation74_spill] sm:$0xff]  ;;  %v8587_v29 = vld [vmem:[#allocation41_spill] sm:$0xff]  ;;  %v1781_v4 = vld [vmem:[%s7541_s2 + $0x8] sm:$0xff] }
 0x170   :  { %3318 = vmatprep.mubr.f32.mxu0 %v8575_v18  ;;  %4725 = vmatprep.subr.mxu1 %v8576_v30  ;;  %v7203_v33 = vpop.f32.mrf.mxu0  ;;  %v4129_v34 = vpop.f32.mrf.mxu1 }
 0x171   :  { %3141 = vmatmul.mubr.f32.gmra.mxu1 %v8577_v37  ;;  %v7207_v39 = vadd.f32 %v4128_v28, %v1004_v5  ;;  %v8589_v37 = vld [vmem:[#allocation51_spill] sm:$0xff] }
 0x172   :  { %3148 = vmatprep.mubr.f32.mxu1 %v8578_v32  ;;  %4726 = vmatpush3.msra.mxu1 %v8454_v26  ;;  %v4167_v55 = vpop.f32.mrf.mxu0  ;;  %v4130_v54 = vpop.f32.mrf.mxu1 }
 0x173   :  { %3320 = vmatmul.mubr.f32.vlgmr.msra.gmra.mxu0 %v8579_v44  ;;  %v4131_v1 = vadd.f32 %v4130_v54, %v4129_v34 }
 0x174   :  { %3325 = vmatprep.mubr.f32.mxu0 %v8580_v24  ;;  %v4168_v38 = vpop.f32.mrf.mxu0  ;;  %v7214_v11 = vpop.f32.mrf.mxu1 }
 0x175   :  { %3152 = vmatmul.mubr.f32.gmra.mxu1 %v8581_v9  ;;  %v7218_v19 = vadd.f32 %v4131_v1, %v1013_v62  ;;  %v4169_v25 = vadd.f32 %v4168_v38, %v4167_v55  ;;  %v1782_v55 = vld [vmem:[%s7541_s2 + $0x10] sm:$0xff]  ;;  %v8590_v9 = vld [vmem:[#allocation53_spill] sm:$0xff] }
 0x176   :  { %3527 = vmatprep.mubr.f32.mxu1 %v8575_v18  ;;  %v4170_v51 = vpop.f32.mrf.mxu0  ;;  %v7222_v26 = vpop.f32.mrf.mxu1 }
 0x177   :  { %3327 = vmatmul.mubr.f32.gmra.mxu0 %v8582_v56  ;;  %v1463_v61 = vadd.f32 %v4169_v25, %v7010_v40 }
 0x178   :  { %3332 = vmatprep.mubr.f32.mxu0 %v8583_v43  ;;  %v4171_v41 = vpop.f32.mrf.mxu0  ;;  %v4247_v46 = vpop.f32.mrf.mxu1 }
 0x179   :  { %3529 = vmatmul.mubr.f32.vlgmr.msra.gmra.mxu1 %v8579_v44  ;;  %v4172_v48 = vadd.f32 %v4171_v41, %v4170_v51 }
 0x17a   :  { %3534 = vmatprep.mubr.f32.mxu1 %v8580_v24  ;;  %v4173_v47 = vpop.f32.mrf.mxu0  ;;  %v4248_v3 = vpop.f32.mrf.mxu1 }
 0x17b   :  { %3334 = vmatmul.mubr.f32.gmra.mxu0 %v8584_v36  ;;  %v4249_v13 = vadd.f32 %v4248_v3, %v4247_v46  ;;  %v1470_v40 = vadd.f32 %v4172_v48, %v7025_v50  ;;  %v8588_v50 = vld [vmem:[#allocation47_spill] sm:$0xff]  ;;  %v8591_v46 = vld [vmem:[#allocation60_spill] sm:$0xff]  ;;  %v1783_v3 = vld [vmem:[%s7541_s2 + $0x18] sm:$0xff] }
 0x17c   :  { %3339 = vmatprep.mubr.f32.mxu0 %v8585_v10  ;;  %v4174_v63 = vpop.f32.mrf.mxu0  ;;  %v4250_v49 = vpop.f32.mrf.mxu1 }
 0x17d   :  { %3536 = vmatmul.mubr.f32.gmra.mxu1 %v8582_v56  ;;  %v1672_v20 = vadd.f32 %v4249_v13, %v1463_v61  ;;  %v4175_v59 = vadd.f32 %v4174_v63, %v4173_v47  ;;  %v8592_v63 = vld [vmem:[#allocation63_spill] sm:$0xff] }
 0x17e   :  { %3541 = vmatprep.mubr.f32.mxu1 %v8583_v43  ;;  %v4176_v5 = vpop.f32.mrf.mxu0  ;;  %v4251_v31 = vpop.f32.mrf.mxu1 }
 0x17f   :  { %3341 = vmatmul.mubr.f32.gmra.mxu0 %v8586_v27  ;;  %v1796_v52 = vsub.f32 %v1672_v20, %v1780_v21  ;;  %v4252_v6 = vadd.f32 %v4251_v31, %v4250_v49  ;;  %v1477_v28 = vadd.f32 %v4175_v59, %v7040_v12  ;;  %v8593_v31 = vld [vmem:[#allocation67_spill] sm:$0xff] }
 0x180   :  { %3346 = vmatprep.mubr.f32.mxu0 %v8587_v29  ;;  %v4177_v57 = vpop.f32.mrf.mxu0  ;;  %v4253_v17 = vpop.f32.mrf.mxu1 }
 0x181   :  { %3543 = vmatmul.mubr.f32.gmra.mxu1 %v8584_v36  ;;  %v1679_v45 = vadd.f32 %v4252_v6, %v1470_v40  ;;  %v1812_v42 = vmul.f32 %v1796_v52, %v1796_v52  ;;  %v4178_v18 = vadd.f32 %v4177_v57, %v4176_v5  ;;  %v1784_v52 = vld [vmem:[%s7541_s2 + $0x20] sm:$0xff] }
 0x182   :  { %3548 = vmatprep.mubr.f32.mxu1 %v8585_v10  ;;  %v4179_v16 = vpop.f32.mrf.mxu0  ;;  %v4254_v62 = vpop.f32.mrf.mxu1 }
 0x183   :  { %3348 = vmatmul.mubr.f32.gmra.mxu0 %v8588_v50  ;;  %v1797_v30 = vsub.f32 %v1679_v45, %v1781_v4  ;;  %v4255_v34 = vadd.f32 %v4254_v62, %v4253_v17  ;;  %v1829_v24 = vsel %vm1828_vm0, %v1812_v42, 0.0  ;;  %v1484_v56 = vadd.f32 %v4178_v18, %v7055_v7  ;;  %v8594_v17 = vld [vmem:[#allocation71_spill] sm:$0xff] }
 0x184   :  { %3353 = vmatprep.mubr.f32.mxu0 %v8589_v37  ;;  %v4180_v32 = vpop.f32.mrf.mxu0  ;;  %v4256_v44 = vpop.f32.mrf.mxu1 }
 0x185   :  { %3550 = vmatmul.mubr.f32.gmra.mxu1 %v8586_v27  ;;  %v1813_v54 = vmul.f32 %v1797_v30, %v1797_v30  ;;  %v1686_v1 = vadd.f32 %v4255_v34, %v1477_v28  ;;  %v4181_v12 = vadd.f32 %v4180_v32, %v4179_v16  ;;  %v8595_v28 = vld [vmem:[#allocation72_spill] sm:$0xff]  ;;  %v1785_v34 = vld [vmem:[%s7541_s2 + $0x28] sm:$0xff] }
 0x186   :  { %3555 = vmatprep.mubr.f32.mxu1 %v8587_v29  ;;  %v4182_v38 = vpop.f32.mrf.mxu0  ;;  %v4257_v51 = vpop.f32.mrf.mxu1 }
 0x187   :  { %3355 = vmatmul.mubr.f32.gmra.mxu0 %v8590_v9  ;;  %v1830_v25 = vsel %vm1828_vm0, %v1813_v54, 0.0  ;;  %v1798_v43 = vsub.f32 %v1686_v1, %v1782_v55  ;;  %v4258_v41 = vadd.f32 %v4257_v51, %v4256_v44  ;;  %v1491_v7 = vadd.f32 %v4181_v12, %v7070_v22  ;;  %v8596_v54 = vld [vmem:[#allocation77_spill] sm:$0xff]  ;;  %v8597_v51 = vld [vmem:[#allocation84_spill] sm:$0xff] }
 0x188   :  { %3360 = vmatprep.mubr.f32.mxu0 %v8591_v46  ;;  %v1831_v47 = vadd.f32 %v1830_v25, %v1829_v24  ;;  %v4183_v36 = vpop.f32.mrf.mxu0  ;;  %v4259_v61 = vpop.f32.mrf.mxu1 }
 0x189   :  { %3557 = vmatmul.mubr.f32.gmra.mxu1 %v8588_v50  ;;  %v1814_v48 = vmul.f32 %v1798_v43, %v1798_v43  ;;  %v1693_v13 = vadd.f32 %v4258_v41, %v1484_v56  ;;  %v4184_v20 = vadd.f32 %v4183_v36, %v4182_v38  ;;  %v1786_v43 = vld [vmem:[%s7541_s2 + $0x30] sm:$0xff] }
 0x18a   :  { %3562 = vmatprep.mubr.f32.mxu1 %v8589_v37  ;;  %v4185_v10 = vpop.f32.mrf.mxu0  ;;  %v4260_v21 = vpop.f32.mrf.mxu1 }
 0x18b   :  { %3362 = vmatmul.mubr.f32.gmra.mxu0 %v8592_v63  ;;  %v1832_v49 = vsel %vm1828_vm0, %v1814_v48, 0.0  ;;  %v1799_v5 = vsub.f32 %v1693_v13, %v1783_v3  ;;  %v4261_v27 = vadd.f32 %v4260_v21, %v4259_v61  ;;  %v1498_v42 = vadd.f32 %v4184_v20, %v7085_v58  ;;  %v8598_v3 = vld [vmem:[#allocation87_spill] sm:$0xff]  ;;  %v1787_v20 = vld [vmem:[%s7541_s2 + $0x38] sm:$0xff] }
 0x18c   :  { %3367 = vmatprep.mubr.f32.mxu0 %v8593_v31  ;;  %v1833_v40 = vadd.f32 %v1832_v49, %v1831_v47  ;;  %v4186_v59 = vpop.f32.mrf.mxu0  ;;  %v4262_v6 = vpop.f32.mrf.mxu1 }
 0x18d   :  { %3564 = vmatmul.mubr.f32.gmra.mxu1 %v8590_v9  ;;  %v1815_v22 = vmul.f32 %v1799_v5, %v1799_v5  ;;  %v1700_v29 = vadd.f32 %v4261_v27, %v1491_v7  ;;  %v4187_v57 = vadd.f32 %v4186_v59, %v4185_v10  ;;  %v8600_v59 = vld [vmem:[#allocation29_spill] sm:$0xff] }
 0x18e   :  { %3569 = vmatprep.mubr.f32.mxu1 %v8591_v46  ;;  %v4188_v4 = vpop.f32.mrf.mxu0  ;;  %v4263_v45 = vpop.f32.mrf.mxu1 }
 0x18f   :  { %3369 = vmatmul.mubr.f32.gmra.mxu0 %v8594_v17  ;;  %v1834_v16 = vsel %vm1828_vm0, %v1815_v22, 0.0  ;;  %v1800_v50 = vsub.f32 %v1700_v29, %v1784_v52  ;;  %v4264_v62 = vadd.f32 %v4263_v45, %v4262_v6  ;;  %v1505_v58 = vadd.f32 %v4187_v57, %v7100_v2 }
 0x190   :  { %3374 = vmatprep.mubr.f32.mxu0 %v8595_v28  ;;  %v1835_v18 = vadd.f32 %v1834_v16, %v1833_v40  ;;  %v4189_v30 = vpop.f32.mrf.mxu0  ;;  %v4265_v37 = vpop.f32.mrf.mxu1 }
 0x191   :  { %3571 = vmatmul.mubr.f32.gmra.mxu1 %v8592_v63  ;;  %v1816_v32 = vmul.f32 %v1800_v50, %v1800_v50  ;;  %v1707_v55 = vadd.f32 %v4264_v62, %v1498_v42  ;;  %v4190_v12 = vadd.f32 %v4189_v30, %v4188_v4  ;;  %v8599_v63 = vld [vmem:[#allocation28_spill] sm:$0xff]  ;;  %v8601_v4 = vld [vmem:[#allocation90_spill] sm:$0xff] }
 0x192   :  { %3576 = vmatprep.mubr.f32.mxu1 %v8593_v31  ;;  %v4191_v44 = vpop.f32.mrf.mxu0  ;;  %v4266_v1 = vpop.f32.mrf.mxu1  ;;  %v1788_v42 = vld [vmem:[%s7541_s2 + $0x40] sm:$0xff] }
 0x193   :  { %3376 = vmatmul.mubr.f32.gmra.mxu0 %v8596_v54  ;;  %v1836_v24 = vsel %vm1828_vm0, %v1816_v32, 0.0  ;;  %v1801_v38 = vsub.f32 %v1707_v55, %v1785_v34  ;;  %v4267_v9 = vadd.f32 %v4266_v1, %v4265_v37  ;;  %v1512_v48 = vadd.f32 %v4190_v12, %v7115_v23  ;;  %v1789_v1 = vld [vmem:[%s7541_s2 + $0x48] sm:$0xff] }
 0x194   :  { %3381 = vmatprep.mubr.f32.mxu0 %v8597_v51  ;;  %v1837_v56 = vadd.f32 %v1836_v24, %v1835_v18  ;;  %v4192_v25 = vpop.f32.mrf.mxu0  ;;  %v4268_v41 = vpop.f32.mrf.mxu1  ;;  %v8602_v18 = vld [vmem:[#allocation93_spill] sm:$0xff] }
 0x195   :  { %3578 = vmatmul.mubr.f32.gmra.mxu1 %v8594_v17  ;;  %v1817_v2 = vmul.f32 %v1801_v38, %v1801_v38  ;;  %v1714_v46 = vadd.f32 %v4267_v9, %v1505_v58  ;;  %v4193_v47 = vadd.f32 %v4192_v25, %v4191_v44  ;;  %v8603_v58 = vld [vmem:[#allocation95_spill] sm:$0xff] }
 0x196   :  { %3583 = vmatprep.mubr.f32.mxu1 %v8595_v28  ;;  %v4194_v36 = vpop.f32.mrf.mxu0  ;;  %v4269_v61 = vpop.f32.mrf.mxu1 }
 0x197   :  { %3383 = vmatmul.mubr.f32.gmra.mxu0 %v8598_v3  ;;  %v1838_v13 = vsel %vm1828_vm0, %v1817_v2, 0.0  ;;  %v1802_v7 = vsub.f32 %v1714_v46, %v1786_v43  ;;  %v4270_v10 = vadd.f32 %v4269_v61, %v4268_v41  ;;  %v1519_v23 = vadd.f32 %v4193_v47, %v7130_v0  ;;  %v8605_v46 = vld [vmem:[#allocation99_spill] sm:$0xff] }
 0x198   :  { %3388 = vmatprep.mubr.f32.mxu0 %v8599_v63  ;;  %v1839_v21 = vadd.f32 %v1838_v13, %v1837_v56  ;;  %v4195_v49 = vpop.f32.mrf.mxu0  ;;  %v4271_v5 = vpop.f32.mrf.mxu1 }
 0x199   :  { %3585 = vmatmul.mubr.f32.gmra.mxu1 %v8596_v54  ;;  %v1818_v27 = vmul.f32 %v1802_v7, %v1802_v7  ;;  %v1721_v31 = vadd.f32 %v4270_v10, %v1512_v48  ;;  %v4196_v22 = vadd.f32 %v4195_v49, %v4194_v36  ;;  %v8606_v10 = vld [vmem:[#allocation102_spill] sm:$0xff] }
 0x19a   :  { %3590 = vmatprep.mubr.f32.mxu1 %v8597_v51  ;;  %v4197_v40 = vpop.f32.mrf.mxu0  ;;  %v4272_v52 = vpop.f32.mrf.mxu1  ;;  %v8604_v51 = vld [vmem:[#allocation97_spill] sm:$0xff] }
 0x19b   :  { %3390 = vmatmul.mubr.f32.gmra.mxu0 %v8600_v59  ;;  %v1840_v6 = vsel %vm1828_vm0, %v1818_v27, 0.0  ;;  %v1803_v29 = vsub.f32 %v1721_v31, %v1787_v20  ;;  %v4273_v57 = vadd.f32 %v4272_v52, %v4271_v5  ;;  %v1526_v34 = vadd.f32 %v4196_v22, %v7145_v53  ;;  %v8607_v27 = vld [vmem:[#allocation104_spill] sm:$0xff] }
 0x19c   :  { %3395 = vmatprep.mubr.f32.mxu0 %v8601_v4  ;;  %v1841_v17 = vadd.f32 %v1840_v6, %v1839_v21  ;;  %v4198_v45 = vpop.f32.mrf.mxu0  ;;  %v4274_v16 = vpop.f32.mrf.mxu1 }
 0x19d   :  { %3592 = vmatmul.mubr.f32.gmra.mxu1 %v8598_v3  ;;  %v1819_v0 = vmul.f32 %v1803_v29, %v1803_v29  ;;  %v1728_v50 = vadd.f32 %v4273_v57, %v1519_v23  ;;  %v4199_v62 = vadd.f32 %v4198_v45, %v4197_v40  ;;  %v1790_v3 = vld [vmem:[%s7541_s2 + $0x50] sm:$0xff]  ;;  %v1791_v40 = vld [vmem:[%s7541_s2 + $0x58] sm:$0xff]  ;;  %v8608_v29 = vld [vmem:[#allocation107_spill] sm:$0xff] }
 0x19e   :  { %3597 = vmatprep.mubr.f32.mxu1 %v8599_v63  ;;  %v4200_v28 = vpop.f32.mrf.mxu0  ;;  %v4275_v30 = vpop.f32.mrf.mxu1 }
 0x19f   :  { %3397 = vmatmul.mubr.f32.gmra.mxu0 %v8602_v18  ;;  %v1842_v37 = vsel %vm1828_vm0, %v1819_v0, 0.0  ;;  %v1804_v32 = vsub.f32 %v1728_v50, %v1788_v42  ;;  %v4276_v55 = vadd.f32 %v4275_v30, %v4274_v16  ;;  %v1533_v53 = vadd.f32 %v4199_v62, %v7160_v14  ;;  %v8609_v16 = vld [vmem:[#allocation109_spill] sm:$0xff]  ;;  %v1792_v62 = vld [vmem:[%s7541_s2 + $0x60] sm:$0xff] }
 0x1a0   :  { %3402 = vmatprep.mubr.f32.mxu0 %v8603_v58  ;;  %v1843_v44 = vadd.f32 %v1842_v37, %v1841_v17  ;;  %v4201_v54 = vpop.f32.mrf.mxu0  ;;  %v4277_v24 = vpop.f32.mrf.mxu1  ;;  %v4054_v30 = vadd.f32 %v7203_v33, %v7196_v60  ;;  %v4134_v33 = vadd.f32 %v7222_v26, %v7214_v11 }
 0x1a1   :  { %3599 = vmatmul.mubr.f32.gmra.mxu1 %v8600_v59  ;;  %v1820_v12 = vmul.f32 %v1804_v32, %v1804_v32  ;;  %v1735_v38 = vadd.f32 %v4276_v55, %v1526_v34  ;;  %v4202_v43 = vadd.f32 %v4201_v54, %v4200_v28  ;;  %v8610_v32 = vld [vmem:[#allocation12_spill] sm:$0xff] }
 0x1a2   :  { %3604 = vmatprep.mubr.f32.mxu1 %v8601_v4  ;;  %v4203_v9 = vpop.f32.mrf.mxu0  ;;  %v4278_v56 = vpop.f32.mrf.mxu1 }
 0x1a3   :  { %3404 = vmatmul.mubr.f32.gmra.mxu0 %v8604_v51  ;;  %v1844_v25 = vsel %vm1828_vm0, %v1820_v12, 0.0  ;;  %v1805_v41 = vsub.f32 %v1735_v38, %v1789_v1  ;;  %v4279_v2 = vadd.f32 %v4278_v56, %v4277_v24  ;;  %v1540_v21 = vadd.f32 %v4202_v43, %v7175_v35  ;;  %v1793_v12 = vld [vmem:[%s7541_s2 + $0x68] sm:$0xff] }
 0x1a4   :  { %3409 = vmatprep.mubr.f32.mxu0 %v8605_v46  ;;  %v1845_v47 = vadd.f32 %v1844_v25, %v1843_v44  ;;  %v4204_v36 = vpop.f32.mrf.mxu0  ;;  %v4280_v61 = vpop.f32.mrf.mxu1 }
 0x1a5   :  { %3606 = vmatmul.mubr.f32.gmra.mxu1 %v8602_v18  ;;  %v1821_v14 = vmul.f32 %v1805_v41, %v1805_v41  ;;  %v1742_v48 = vadd.f32 %v4279_v2, %v1533_v53  ;;  %v4205_v13 = vadd.f32 %v4204_v36, %v4203_v9 }
 0x1a6   :  { %3611 = vmatprep.mubr.f32.mxu1 %v8603_v58  ;;  %v4206_v7 = vpop.f32.mrf.mxu0  ;;  %v4281_v63 = vpop.f32.mrf.mxu1 }
 0x1a7   :  { %3411 = vmatmul.mubr.f32.gmra.mxu0 %v8606_v10  ;;  %v1846_v49 = vsel %vm1828_vm0, %v1821_v14, 0.0  ;;  %v1806_v20 = vsub.f32 %v1742_v48, %v1790_v3  ;;  %v4282_v5 = vadd.f32 %v4281_v63, %v4280_v61  ;;  %v1547_v35 = vadd.f32 %v4205_v13, %v7191_v8 }
 0x1a8   :  { %3416 = vmatprep.mubr.f32.mxu0 %v8607_v27  ;;  %v1847_v31 = vadd.f32 %v1846_v49, %v1845_v47  ;;  %v4207_v23 = vpop.f32.mrf.mxu0  ;;  %v4283_v59 = vpop.f32.mrf.mxu1  ;;  %v1794_v47 = vld [vmem:[%s7541_s2 + $0x70] sm:$0xff] }
 0x1a9   :  { %3613 = vmatmul.mubr.f32.gmra.mxu1 %v8604_v51  ;;  %v1822_v52 = vmul.f32 %v1806_v20, %v1806_v20  ;;  %v1749_v6 = vadd.f32 %v4282_v5, %v1540_v21  ;;  %v4208_v17 = vadd.f32 %v4207_v23, %v4206_v7  ;;  %v1795_v20 = vld [vmem:[%s7541_s2 + $0x78] sm:$0xff] }
 0x1aa   :  { %3618 = vmatprep.mubr.f32.mxu1 %v8605_v46  ;;  %v4209_v22 = vpop.f32.mrf.mxu0  ;;  %v4284_v57 = vpop.f32.mrf.mxu1 }
 0x1ab   :  { %3418 = vmatmul.mubr.f32.gmra.mxu0 %v8608_v29  ;;  %v1848_v4 = vsel %vm1828_vm0, %v1822_v52, 0.0  ;;  %v1807_v45 = vsub.f32 %v1749_v6, %v1791_v40  ;;  %v4285_v42 = vadd.f32 %v4284_v57, %v4283_v59  ;;  %v1554_v58 = vadd.f32 %v4208_v17, %v7207_v39 }
 0x1ac   :  { %3423 = vmatprep.mubr.f32.mxu0 %v8609_v16  ;;  %v1849_v0 = vadd.f32 %v1848_v4, %v1847_v31  ;;  %v4210_v50 = vpop.f32.mrf.mxu0  ;;  %v4286_v28 = vpop.f32.mrf.mxu1  ;;  %v1022_v39 = vadd.f32 %v4054_v30, %v6997_v15 }
 0x1ad   :  { %3620 = vmatmul.mubr.f32.gmra.mxu1 %v8606_v10  ;;  %v1823_v8 = vmul.f32 %v1807_v45, %v1807_v45  ;;  %v1756_v18 = vadd.f32 %v4285_v42, %v1547_v35  ;;  %v4211_v34 = vadd.f32 %v4210_v50, %v4209_v22 }
 0x1ae   :  { %3625 = vmatprep.mubr.f32.mxu1 %v8607_v27  ;;  %v4212_v37 = vpop.f32.mrf.mxu0  ;;  %v4287_v55 = vpop.f32.mrf.mxu1  ;;  %v1295_v3 = vadd.f32 %v4134_v33, %v1022_v39 }
 0x1af   :  { %3425 = vmatmul.mubr.f32.gmra.mxu0 %v8610_v32  ;;  %v1850_v44 = vsel %vm1828_vm0, %v1823_v8, 0.0  ;;  %v1808_v54 = vsub.f32 %v1756_v18, %v1792_v62  ;;  %v4288_v1 = vadd.f32 %v4287_v55, %v4286_v28  ;;  %v1561_v51 = vadd.f32 %v4211_v34, %v7218_v19 }
 0x1b0   :  { %v4213_v24 = vpop.f32.mrf.mxu0  ;;  %v4289_v38 = vpop.f32.mrf.mxu1  ;;  %v1851_v60 = vadd.f32 %v1850_v44, %v1849_v0 }
 0x1b1   :  { %3627 = vmatmul.mubr.f32.gmra.mxu1 %v8608_v29  ;;  %v1824_v53 = vmul.f32 %v1808_v54, %v1808_v54  ;;  %v1763_v9 = vadd.f32 %v4288_v1, %v1554_v58  ;;  %v4214_v43 = vadd.f32 %v4213_v24, %v4212_v37 }
 0x1b2   :  { %3632 = vmatprep.mubr.f32.mxu1 %v8609_v16  ;;  %v4327_v56 = vpop.f32.mrf.mxu0  ;;  %v4290_v25 = vpop.f32.mrf.mxu1 }
 0x1b3   :  { %v1809_v41 = vsub.f32 %v1763_v9, %v1793_v12  ;;  %v4291_v2 = vadd.f32 %v4290_v25, %v4289_v38  ;;  %v1852_v46 = vsel %vm1828_vm0, %v1824_v53, 0.0  ;;  %v1568_v13 = vadd.f32 %v4214_v43, %v1295_v3 }
 0x1b4   :  { %v4328_v11 = vpop.f32.mrf.mxu0  ;;  %v4292_v26 = vpop.f32.mrf.mxu1  ;;  %v1853_v36 = vadd.f32 %v1852_v46, %v1851_v60 }
 0x1b5   :  { %3634 = vmatmul.mubr.f32.gmra.mxu1 %v8610_v32  ;;  %v1825_v15 = vmul.f32 %v1809_v41, %v1809_v41  ;;  %v1770_v61 = vadd.f32 %v4291_v2, %v1561_v51  ;;  %v4329_v19 = vadd.f32 %v4328_v11, %v4327_v56 }
 0x1b6   :  { %v4330_v14 = vpop.f32.mrf.mxu0  ;;  %v4293_v48 = vpop.f32.mrf.mxu1 }
 0x1b7   :  { %v1810_v7 = vsub.f32 %v1770_v61, %v1794_v47  ;;  %v4294_v10 = vadd.f32 %v4293_v48, %v4292_v26  ;;  %v1854_v63 = vsel %vm1828_vm0, %v1825_v15, 0.0 }
 0x1b8   :  { %v4331_v21 = vpop.f32.mrf.mxu0  ;;  %v4407_v49 = vpop.f32.mrf.mxu1  ;;  %v1855_v5 = vadd.f32 %v1854_v63, %v1853_v36 }
 0x1b9   :  { %v1777_v27 = vadd.f32 %v4294_v10, %v1568_v13  ;;  %v4332_v31 = vadd.f32 %v4331_v21, %v4330_v14  ;;  %v1826_v23 = vmul.f32 %v1810_v7, %v1810_v7 }
 0x1ba   :  { %v4333_v40 = vpop.f32.mrf.mxu0  ;;  %v4408_v59 = vpop.f32.mrf.mxu1 }
 0x1bb   :  { %v4409_v52 = vadd.f32 %v4408_v59, %v4407_v49  ;;  %v1811_v6 = vsub.f32 %v1777_v27, %v1795_v20  ;;  %v1856_v35 = vsel %vm1828_vm0, %v1826_v23, 0.0 }
 0x1bc   :  { %v4334_v22 = vpop.f32.mrf.mxu0  ;;  %v4410_v29 = vpop.f32.mrf.mxu1  ;;  %v1857_v57 = vadd.f32 %v1856_v35, %v1855_v5 }
 0x1bd   :  { %v4335_v4 = vadd.f32 %v4334_v22, %v4333_v40  ;;  %v7366_v17 = vadd.f32 %v4409_v52, %v4329_v19  ;;  %v1827_v45 = vmul.f32 %v1811_v6, %v1811_v6 }
 0x1be   :  { %v4336_v42 = vpop.f32.mrf.mxu0  ;;  %v4411_v16 = vpop.f32.mrf.mxu1 }
 0x1bf   :  { %v4412_v0 = vadd.f32 %v4411_v16, %v4410_v29  ;;  %v1858_v50 = vsel %vm1828_vm0, %v1827_v45, 0.0 }
 0x1c0   :  { %v4337_v62 = vpop.f32.mrf.mxu0  ;;  %v4413_v28 = vpop.f32.mrf.mxu1  ;;  %v1859_v8 = vadd.f32 %v1858_v50, %v1857_v57 }
 0x1c1   :  { %v4338_v18 = vadd.f32 %v4337_v62, %v4336_v42  ;;  %v7369_v30 = vadd.f32 %v4412_v0, %v4332_v31 }
 0x1c2   :  { %v4339_v34 = vpop.f32.mrf.mxu0  ;;  %v4414_v37 = vpop.f32.mrf.mxu1  ;;  %1860 = vadd.xlane.f32.xlu0 %v1859_v8 }
 0x1c3   :  { %v4415_v32 = vadd.f32 %v4414_v37, %v4413_v28 }
 0x1c4   :  { %v4340_v55 = vpop.f32.mrf.mxu0  ;;  %v4416_v58 = vpop.f32.mrf.mxu1 }
 0x1c5   :  { %v4341_v44 = vadd.f32 %v4340_v55, %v4339_v34  ;;  %v7371_v54 = vadd.f32 %v4415_v32, %v4335_v4 }
 0x1c6   :  { %v4342_v1 = vpop.f32.mrf.mxu0  ;;  %v4417_v24 = vpop.f32.mrf.mxu1 }
 0x1c7   :  { %v4418_v12 = vadd.f32 %v4417_v24, %v4416_v58 }
 0x1c8   :  { %v4343_v38 = vpop.f32.mrf.mxu0  ;;  %v4419_v60 = vpop.f32.mrf.mxu1 }
 0x1c9   :  { %v4344_v33 = vadd.f32 %v4343_v38, %v4342_v1  ;;  %v7373_v53 = vadd.f32 %v4418_v12, %v4338_v18 }
 0x1ca   :  { %v4345_v9 = vpop.f32.mrf.mxu0  ;;  %v4420_v39 = vpop.f32.mrf.mxu1 }
 0x1cb   :  { %v4421_v51 = vadd.f32 %v4420_v39, %v4419_v60 }
 0x1cc   :  { %v4346_v56 = vpop.f32.mrf.mxu0  ;;  %v4422_v25 = vpop.f32.mrf.mxu1 }
 0x1cd   :  { %v4347_v43 = vadd.f32 %v4346_v56, %v4345_v9  ;;  %v7375_v41 = vadd.f32 %v4421_v51, %v4341_v44 }
 0x1ce   :  { %v4348_v2 = vpop.f32.mrf.mxu0  ;;  %v4423_v46 = vpop.f32.mrf.mxu1 }
 0x1cf   :  { %v4424_v47 = vadd.f32 %v4423_v46, %v4422_v25 }
 0x1d0   :  { %v4349_v11 = vpop.f32.mrf.mxu0  ;;  %v4425_v26 = vpop.f32.mrf.mxu1 }
 0x1d1   :  { %v4350_v36 = vadd.f32 %v4349_v11, %v4348_v2  ;;  %v7377_v3 = vadd.f32 %v4424_v47, %v4344_v33 }
 0x1d2   :  { %v4351_v15 = vpop.f32.mrf.mxu0  ;;  %v4426_v61 = vpop.f32.mrf.mxu1 }
 0x1d3   :  { %v4427_v19 = vadd.f32 %v4426_v61, %v4425_v26 }
 0x1d4   :  { %v4352_v14 = vpop.f32.mrf.mxu0  ;;  %v4428_v48 = vpop.f32.mrf.mxu1 }
 0x1d5   :  { %v4353_v13 = vadd.f32 %v4352_v14, %v4351_v15  ;;  %v7379_v7 = vadd.f32 %v4427_v19, %v4347_v43 }
 0x1d6   :  { %v4354_v10 = vpop.f32.mrf.mxu0  ;;  %v4429_v63 = vpop.f32.mrf.mxu1 }
 0x1d7   :  { %v4430_v21 = vadd.f32 %v4429_v63, %v4428_v48 }
 0x1d8   :  { %v4355_v49 = vpop.f32.mrf.mxu0  ;;  %v4431_v20 = vpop.f32.mrf.mxu1 }
 0x1d9   :  { %v4356_v5 = vadd.f32 %v4355_v49, %v4354_v10  ;;  %v7381_v27 = vadd.f32 %v4430_v21, %v4350_v36 }
 0x1da   :  { %v4357_v31 = vpop.f32.mrf.mxu0  ;;  %v4432_v23 = vpop.f32.mrf.mxu1 }
 0x1db   :  { %v4433_v40 = vadd.f32 %v4432_v23, %v4431_v20 }
 0x1dc   :  { %v4358_v59 = vpop.f32.mrf.mxu0  ;;  %v4434_v52 = vpop.f32.mrf.mxu1 }
 0x1dd   :  { %v4359_v6 = vadd.f32 %v4358_v59, %v4357_v31  ;;  %v7383_v35 = vadd.f32 %v4433_v40, %v4353_v13 }
 0x1de   :  { %v4360_v22 = vpop.f32.mrf.mxu0  ;;  %v4435_v29 = vpop.f32.mrf.mxu1 }
 0x1df   :  { %v4436_v57 = vadd.f32 %v4435_v29, %v4434_v52 }
 0x1e0   :  { %v4361_v4 = vpop.f32.mrf.mxu0  ;;  %v4437_v45 = vpop.f32.mrf.mxu1 }
 0x1e1   :  { %v4362_v42 = vadd.f32 %v4361_v4, %v4360_v22  ;;  %v7385_v16 = vadd.f32 %v4436_v57, %v4356_v5 }
 0x1e2   :  { %v4363_v0 = vpop.f32.mrf.mxu0  ;;  %v4438_v50 = vpop.f32.mrf.mxu1 }
 0x1e3   :  { %v4439_v62 = vadd.f32 %v4438_v50, %v4437_v45 }
 0x1e4   :  { %v4364_v28 = vpop.f32.mrf.mxu0  ;;  %v4440_v8 = vpop.f32.mrf.mxu1 }
 0x1e5   :  { %v4365_v18 = vadd.f32 %v4364_v28, %v4363_v0  ;;  %v7387_v34 = vadd.f32 %v4439_v62, %v4359_v6 }
 0x1e6   :  { %v4366_v37 = vpop.f32.mrf.mxu0  ;;  %v4441_v32 = vpop.f32.mrf.mxu1 }
 0x1e7   :  { %v4442_v55 = vadd.f32 %v4441_v32, %v4440_v8 }
 0x1e8   :  { %v4367_v58 = vpop.f32.mrf.mxu0  ;;  %v4443_v44 = vpop.f32.mrf.mxu1 }
 0x1e9   :  { %v4368_v1 = vadd.f32 %v4367_v58, %v4366_v37  ;;  %v7389_v24 = vadd.f32 %v4442_v55, %v4362_v42 }
 0x1ea   :  { %v4444_v38 = vpop.f32.mrf.mxu1 }
 0x1eb   :  { %v4369_v12 = vpop.f32.mrf.mxu0  ;;  %v4445_v60 = vadd.f32 %v4444_v38, %v4443_v44 }
 0x1ec   :  { %v4446_v9 = vpop.f32.mrf.mxu1 }
 0x1ed   :  { %v4370_v33 = vpop.f32.mrf.mxu0  ;;  %v7391_v51 = vadd.f32 %v4445_v60, %v4365_v18 }
 0x1ee   :  { %v4371_v39 = vadd.f32 %v4370_v33, %v4369_v12  ;;  %v4447_v25 = vpop.f32.mrf.mxu1 }
 0x1ef   :  { %v4372_v56 = vpop.f32.mrf.mxu0  ;;  %v4448_v43 = vadd.f32 %v4447_v25, %v4446_v9 }
 0x1f1   :  { %v4373_v2 = vpop.f32.mrf.mxu0  ;;  %v4449_v46 = vpop.f32.mrf.mxu1  ;;  %v7393_v11 = vadd.f32 %v4448_v43, %v4368_v1 }
 0x1f2   :  { %v4374_v47 = vadd.f32 %v4373_v2, %v4372_v56 }
 0x1f3   :  { %v4487_v26 = vpop.f32.mrf.mxu0  ;;  %v4450_v36 = vpop.f32.mrf.mxu1 }
 0x1f4   :  { %v4451_v15 = vadd.f32 %v4450_v36, %v4449_v46 }
 0x1f5   :  { %v4488_v61 = vpop.f32.mrf.mxu0  ;;  %v4452_v19 = vpop.f32.mrf.mxu1 }
 0x1f6   :  { %v7395_v14 = vadd.f32 %v4451_v15, %v4371_v39  ;;  %v4489_v48 = vadd.f32 %v4488_v61, %v4487_v26 }
 0x1f7   :  { %v4490_v13 = vpop.f32.mrf.mxu0  ;;  %v4453_v10 = vpop.f32.mrf.mxu1 }
 0x1f8   :  { %v2746_v63 = vadd.f32 %v4489_v48, %v7366_v17  ;;  %v4454_v21 = vadd.f32 %v4453_v10, %v4452_v19 }
 0x1f9   :  { %v4491_v49 = vpop.f32.mrf.mxu0  ;;  %v4567_v20 = vpop.f32.mrf.mxu1 }
 0x1fa   :  { %v7398_v5 = vadd.f32 %v4454_v21, %v4374_v47  ;;  %v4492_v31 = vadd.f32 %v4491_v49, %v4490_v13 }
 0x1fb   :  { %v4493_v23 = vpop.f32.mrf.mxu0  ;;  %v4568_v40 = vpop.f32.mrf.mxu1 }
 0x1fc   :  { %v2755_v59 = vadd.f32 %v4492_v31, %v7369_v30  ;;  %v4569_v52 = vadd.f32 %v4568_v40, %v4567_v20 }
 0x1fd   :  { %v4494_v6 = vpop.f32.mrf.mxu0  ;;  %v4570_v22 = vpop.f32.mrf.mxu1 }
 0x1fe   :  { %v4495_v29 = vadd.f32 %v4494_v6, %v4493_v23  ;;  %v7401_v57 = vadd.f32 %v4569_v52, %v2746_v63 }
 0x1ff   :  { %v4496_v4 = vpop.f32.mrf.mxu0  ;;  %v4571_v45 = vpop.f32.mrf.mxu1 }
 0x200   :  { %v2764_v17 = vadd.f32 %v4495_v29, %v7371_v54  ;;  %v4572_v42 = vadd.f32 %v4571_v45, %v4570_v22 }
 0x201   :  { %v4497_v0 = vpop.f32.mrf.mxu0  ;;  %v4573_v50 = vpop.f32.mrf.mxu1 }
 0x202   :  { %v4498_v62 = vadd.f32 %v4497_v0, %v4496_v4  ;;  %v7404_v28 = vadd.f32 %v4572_v42, %v2755_v59 }
 0x203   :  { %v4499_v8 = vpop.f32.mrf.mxu0  ;;  %v4574_v18 = vpop.f32.mrf.mxu1 }
 0x204   :  { %v2773_v30 = vadd.f32 %v4498_v62, %v7373_v53  ;;  %v4575_v37 = vadd.f32 %v4574_v18, %v4573_v50 }
 0x205   :  { %v4500_v32 = vpop.f32.mrf.mxu0  ;;  %v4576_v55 = vpop.f32.mrf.mxu1 }
 0x206   :  { %v4501_v58 = vadd.f32 %v4500_v32, %v4499_v8  ;;  %v7407_v44 = vadd.f32 %v4575_v37, %v2764_v17 }
 0x207   :  { %v4502_v1 = vpop.f32.mrf.mxu0  ;;  %v4577_v12 = vpop.f32.mrf.mxu1 }
 0x208   :  { %v2782_v54 = vadd.f32 %v4501_v58, %v7375_v41  ;;  %v4578_v38 = vadd.f32 %v4577_v12, %v4576_v55 }
 0x209   :  { %v4503_v60 = vpop.f32.mrf.mxu0  ;;  %v4579_v33 = vpop.f32.mrf.mxu1 }
 0x20a   :  { %v4504_v9 = vadd.f32 %v4503_v60, %v4502_v1  ;;  %v7410_v39 = vadd.f32 %v4578_v38, %v2773_v30 }
 0x20b   :  { %v4505_v56 = vpop.f32.mrf.mxu0  ;;  %v4580_v25 = vpop.f32.mrf.mxu1 }
 0x20c   :  { %v2791_v53 = vadd.f32 %v4504_v9, %v7377_v3  ;;  %v4581_v43 = vadd.f32 %v4580_v25, %v4579_v33 }
 0x20d   :  { %v4506_v2 = vpop.f32.mrf.mxu0  ;;  %v4582_v46 = vpop.f32.mrf.mxu1 }
 0x20e   :  { %v4507_v47 = vadd.f32 %v4506_v2, %v4505_v56  ;;  %v7413_v26 = vadd.f32 %v4581_v43, %v2782_v54 }
 0x20f   :  { %v4508_v36 = vpop.f32.mrf.mxu0  ;;  %v4583_v15 = vpop.f32.mrf.mxu1 }
 0x210   :  { %v2800_v41 = vadd.f32 %v4507_v47, %v7379_v7  ;;  %v4584_v61 = vadd.f32 %v4583_v15, %v4582_v46 }
 0x211   :  { %v4509_v19 = vpop.f32.mrf.mxu0  ;;  %v4585_v48 = vpop.f32.mrf.mxu1 }
 0x212   :  { %v4510_v13 = vadd.f32 %v4509_v19, %v4508_v36  ;;  %v7416_v10 = vadd.f32 %v4584_v61, %v2791_v53 }
 0x213   :  { %v4511_v63 = vpop.f32.mrf.mxu0  ;;  %v4586_v21 = vpop.f32.mrf.mxu1 }
 0x214   :  { %v2809_v3 = vadd.f32 %v4510_v13, %v7381_v27  ;;  %v4587_v49 = vadd.f32 %v4586_v21, %v4585_v48 }
 0x215   :  { %v4512_v20 = vpop.f32.mrf.mxu0  ;;  %v4588_v31 = vpop.f32.mrf.mxu1 }
 0x216   :  { %v4513_v23 = vadd.f32 %v4512_v20, %v4511_v63  ;;  %v7419_v40 = vadd.f32 %v4587_v49, %v2800_v41 }
 0x217   :  { %v4514_v59 = vpop.f32.mrf.mxu0  ;;  %v4589_v52 = vpop.f32.mrf.mxu1 }
 0x218   :  { %v2818_v7 = vadd.f32 %v4513_v23, %v7383_v35  ;;  %v4590_v6 = vadd.f32 %v4589_v52, %v4588_v31 }
 0x219   :  { %v4515_v22 = vpop.f32.mrf.mxu0  ;;  %v4591_v29 = vpop.f32.mrf.mxu1 }
 0x21a   :  { %v4516_v4 = vadd.f32 %v4515_v22, %v4514_v59  ;;  %v7422_v45 = vadd.f32 %v4590_v6, %v2809_v3 }
 0x21b   :  { %v4517_v17 = vpop.f32.mrf.mxu0  ;;  %v4592_v42 = vpop.f32.mrf.mxu1 }
 0x21c   :  { %v2827_v27 = vadd.f32 %v4516_v4, %v7385_v16  ;;  %v4593_v0 = vadd.f32 %v4592_v42, %v4591_v29 }
 0x21d   :  { %v4518_v50 = vpop.f32.mrf.mxu0  ;;  %v4594_v62 = vpop.f32.mrf.mxu1 }
 0x21e   :  { %v4519_v8 = vadd.f32 %v4518_v50, %v4517_v17  ;;  %v7425_v18 = vadd.f32 %v4593_v0, %v2818_v7 }
 0x21f   :  { %v4520_v30 = vpop.f32.mrf.mxu0  ;;  %v4595_v37 = vpop.f32.mrf.mxu1 }
 0x220   :  { %v2836_v35 = vadd.f32 %v4519_v8, %v7387_v34  ;;  %v4596_v32 = vadd.f32 %v4595_v37, %v4594_v62 }
 0x221   :  { %v4521_v55 = vpop.f32.mrf.mxu0  ;;  %v4597_v58 = vpop.f32.mrf.mxu1 }
 0x222   :  { %v4522_v1 = vadd.f32 %v4521_v55, %v4520_v30  ;;  %v7428_v12 = vadd.f32 %v4596_v32, %v2827_v27 }
 0x223   :  { %v4523_v54 = vpop.f32.mrf.mxu0  ;;  %v4598_v38 = vpop.f32.mrf.mxu1 }
 0x224   :  { %v2845_v16 = vadd.f32 %v4522_v1, %v7389_v24  ;;  %v4599_v60 = vadd.f32 %v4598_v38, %v4597_v58 }
 0x225   :  { %v4524_v33 = vpop.f32.mrf.mxu0  ;;  %v4600_v9 = vpop.f32.mrf.mxu1 }
 0x226   :  { %v4525_v56 = vadd.f32 %v4524_v33, %v4523_v54  ;;  %v7431_v25 = vadd.f32 %v4599_v60, %v2836_v35  ;;  %v3799_v35 = vld [vmem:[%s7541_s2 + $0x80] sm:$0xff] }
 0x227   :  { %v4526_v53 = vpop.f32.mrf.mxu0  ;;  %v4601_v43 = vpop.f32.mrf.mxu1 }
 0x228   :  { %v2854_v34 = vadd.f32 %v4525_v56, %v7391_v51  ;;  %v4602_v2 = vadd.f32 %v4601_v43, %v4600_v9 }
 0x229   :  { %v4527_v46 = vpop.f32.mrf.mxu0  ;;  %v4603_v47 = vpop.f32.mrf.mxu1 }
 0x22a   :  { %v4528_v36 = vadd.f32 %v4527_v46, %v4526_v53  ;;  %v7434_v15 = vadd.f32 %v4602_v2, %v2845_v16 }
 0x22b   :  { %v4529_v41 = vpop.f32.mrf.mxu0  ;;  %v4604_v61 = vpop.f32.mrf.mxu1 }
 0x22c   :  { %v2863_v24 = vadd.f32 %v4528_v36, %v7393_v11  ;;  %v4605_v19 = vadd.f32 %v4604_v61, %v4603_v47 }
 0x22d   :  { %v4530_v48 = vpop.f32.mrf.mxu0  ;;  %v4606_v13 = vpop.f32.mrf.mxu1 }
 0x22e   :  { %v4531_v63 = vadd.f32 %v4530_v48, %v4529_v41  ;;  %v7437_v21 = vadd.f32 %v4605_v19, %v2854_v34 }
 0x22f   :  { %v7439_v3 = vpop.f32.mrf.mxu0  ;;  %v4607_v49 = vpop.f32.mrf.mxu1 }
 0x230   :  { %v2872_v51 = vadd.f32 %v4531_v63, %v7395_v14  ;;  %v4608_v20 = vadd.f32 %v4607_v49, %v4606_v13 }
 0x231   :  { %v7442_v31 = vpop.f32.mrf.mxu0  ;;  %v4609_v23 = vpop.f32.mrf.mxu1 }
 0x232   :  { %v7444_v59 = vadd.f32 %v4608_v20, %v2863_v24 }
 0x233   :  { %v4647_v52 = vpop.f32.mrf.mxu0  ;;  %v4610_v7 = vpop.f32.mrf.mxu1 }
 0x234   :  { %v4611_v11 = vadd.f32 %v4610_v7, %v4609_v23 }
 0x235   :  { %v4648_v6 = vpop.f32.mrf.mxu0  ;;  %v7446_v22 = vpop.f32.mrf.mxu1 }
 0x236   :  { %v7448_v29 = vadd.f32 %v4611_v11, %v2872_v51  ;;  %v4649_v42 = vadd.f32 %v4648_v6, %v4647_v52  ;;  %v3802_v11 = vld [vmem:[%s7541_s2 + $0x98] sm:$0xff] }
 0x237   :  { %v4650_v4 = vpop.f32.mrf.mxu0  ;;  %v7450_v17 = vpop.f32.mrf.mxu1 }
 0x238   :  { %v3322_v62 = vadd.f32 %v4649_v42, %v7401_v57  ;;  %v3800_v57 = vld [vmem:[%s7541_s2 + $0x88] sm:$0xff] }
 0x239   :  { %v4651_v27 = vpop.f32.mrf.mxu0  ;;  %v4727_v14 = vpop.f32.mrf.mxu1 }
 0x23a   :  { %v4652_v8 = vadd.f32 %v4651_v27, %v4650_v4 }
 0x23b   :  { %v4653_v0 = vpop.f32.mrf.mxu0  ;;  %v4728_v50 = vpop.f32.mrf.mxu1 }
 0x23c   :  { %v4729_v30 = vadd.f32 %v4728_v50, %v4727_v14  ;;  %v3329_v54 = vadd.f32 %v4652_v8, %v7404_v28  ;;  %v3801_v28 = vld [vmem:[%s7541_s2 + $0x90] sm:$0xff] }
 0x23d   :  { %v4654_v37 = vpop.f32.mrf.mxu0  ;;  %v4730_v32 = vpop.f32.mrf.mxu1 }
 0x23e   :  { %v3531_v55 = vadd.f32 %v4729_v30, %v3322_v62  ;;  %v4655_v38 = vadd.f32 %v4654_v37, %v4653_v0 }
 0x23f   :  { %v4656_v58 = vpop.f32.mrf.mxu0  ;;  %v4731_v1 = vpop.f32.mrf.mxu1 }
 0x240   :  { %v3656_v16 = vsub.f32 %v3531_v55, %v3799_v35  ;;  %v4732_v60 = vadd.f32 %v4731_v1, %v4730_v32  ;;  %v3336_v2 = vadd.f32 %v4655_v38, %v7407_v44  ;;  %v3803_v32 = vld [vmem:[%s7541_s2 + $0xa0] sm:$0xff] }
 0x241   :  { %v4657_v33 = vpop.f32.mrf.mxu0  ;;  %v4733_v9 = vpop.f32.mrf.mxu1 }
 0x242   :  { %v3538_v56 = vadd.f32 %v4732_v60, %v3329_v54  ;;  %v3672_v53 = vmul.f32 %v3656_v16, %v3656_v16  ;;  %v4658_v46 = vadd.f32 %v4657_v33, %v4656_v58 }
 0x243   :  { %v4659_v43 = vpop.f32.mrf.mxu0  ;;  %v4734_v34 = vpop.f32.mrf.mxu1 }
 0x244   :  { %v3657_v47 = vsub.f32 %v3538_v56, %v3800_v57  ;;  %v4735_v36 = vadd.f32 %v4734_v34, %v4733_v9  ;;  %v3688_v48 = vsel %vm1828_vm0, %v3672_v53, 0.0  ;;  %v3343_v51 = vadd.f32 %v4658_v46, %v7410_v39 }
 0x245   :  { %v4660_v41 = vpop.f32.mrf.mxu0  ;;  %v4736_v61 = vpop.f32.mrf.mxu1 }
 0x246   :  { %v3673_v24 = vmul.f32 %v3657_v47, %v3657_v47  ;;  %v3545_v19 = vadd.f32 %v4735_v36, %v3336_v2  ;;  %v4661_v13 = vadd.f32 %v4660_v41, %v4659_v43  ;;  %v3804_v2 = vld [vmem:[%s7541_s2 + $0xa8] sm:$0xff] }
 0x247   :  { %v4662_v63 = vpop.f32.mrf.mxu0  ;;  %v4737_v49 = vpop.f32.mrf.mxu1 }
 0x248   :  { %v3689_v44 = vsel %vm1828_vm0, %v3673_v24, 0.0  ;;  %v3658_v20 = vsub.f32 %v3545_v19, %v3801_v28  ;;  %v4738_v23 = vadd.f32 %v4737_v49, %v4736_v61  ;;  %v3350_v27 = vadd.f32 %v4661_v13, %v7413_v26 }
 0x249   :  { %v3690_v52 = vadd.f32 %v3689_v44, %v3688_v48  ;;  %v4663_v7 = vpop.f32.mrf.mxu0  ;;  %v4739_v6 = vpop.f32.mrf.mxu1 }
 0x24a   :  { %v3674_v4 = vmul.f32 %v3658_v20, %v3658_v20  ;;  %v3552_v42 = vadd.f32 %v4738_v23, %v3343_v51  ;;  %v4664_v39 = vadd.f32 %v4663_v7, %v4662_v63  ;;  %v3805_v51 = vld [vmem:[%s7541_s2 + $0xb0] sm:$0xff] }
 0x24b   :  { %v4665_v14 = vpop.f32.mrf.mxu0  ;;  %v4740_v0 = vpop.f32.mrf.mxu1 }
 0x24c   :  { %v3691_v50 = vsel %vm1828_vm0, %v3674_v4, 0.0  ;;  %v3659_v62 = vsub.f32 %v3552_v42, %v3802_v11  ;;  %v4741_v8 = vadd.f32 %v4740_v0, %v4739_v6  ;;  %v1861_v30 = vpop.xlane.xlu0 %1860  ;;  %v3357_v33 = vadd.f32 %v4664_v39, %v7416_v10  ;;  %v3806_v39 = vld [vmem:[%s7541_s2 + $0xb8] sm:$0xff] }
 0x24d   :  { %v3692_v37 = vadd.f32 %v3691_v50, %v3690_v52  ;;  %v4666_v35 = vpop.f32.mrf.mxu0  ;;  %v1862_v55 = vrot.slane %v1861_v30, 4  ;;  %v4742_v58 = vpop.f32.mrf.mxu1 }
 0x24e   :  { %v3675_v1 = vmul.f32 %v3659_v62, %v3659_v62  ;;  %v3559_v54 = vadd.f32 %v4741_v8, %v3350_v27  ;;  %v4667_v38 = vadd.f32 %v4666_v35, %v4665_v14 }
 0x24f   :  { %v1863_v26 = vadd.f32 %v1862_v55, %v1861_v30  ;;  %v4668_v16 = vpop.f32.mrf.mxu0  ;;  %v4743_v60 = vpop.f32.mrf.mxu1 }
 0x250   :  { %v3693_v57 = vsel %vm1828_vm0, %v3675_v1, 0.0  ;;  %v3660_v9 = vsub.f32 %v3559_v54, %v3803_v32  ;;  %v4744_v56 = vadd.f32 %v4743_v60, %v4742_v58  ;;  %v3364_v41 = vadd.f32 %v4667_v38, %v7419_v40 }
 0x251   :  { %v3694_v53 = vadd.f32 %v3693_v57, %v3692_v37  ;;  %v1864_v43 = vrot.slane %v1863_v26, 2  ;;  %v4669_v34 = vpop.f32.mrf.mxu0  ;;  %v4745_v46 = vpop.f32.mrf.mxu1 }
 0x252   :  { %v3676_v47 = vmul.f32 %v3660_v9, %v3660_v9  ;;  %v3566_v36 = vadd.f32 %v4744_v56, %v3357_v33  ;;  %v4670_v19 = vadd.f32 %v4669_v34, %v4668_v16 }
 0x253   :  { %v4671_v28 = vpop.f32.mrf.mxu0  ;;  %v4746_v61 = vpop.f32.mrf.mxu1  ;;  %v1865_v24 = vadd.f32 %v1864_v43, %v1863_v26  ;;  %v3807_v26 = vld [vmem:[%s7541_s2 + $0xc0] sm:$0xff] }
 0x254   :  { %v3695_v10 = vsel %vm1828_vm0, %v3676_v47, 0.0  ;;  %v3661_v48 = vsub.f32 %v3566_v36, %v3804_v2  ;;  %v4747_v13 = vadd.f32 %v4746_v61, %v4745_v46  ;;  %v3371_v4 = vadd.f32 %v4670_v19, %v7422_v45  ;;  %v3808_v47 = vld [vmem:[%s7541_s2 + $0xc8] sm:$0xff] }
 0x255   :  { %v3696_v63 = vadd.f32 %v3695_v10, %v3694_v53  ;;  %v4672_v49 = vpop.f32.mrf.mxu0  ;;  %v4748_v44 = vpop.f32.mrf.mxu1  ;;  %v1866_v20 = vrot.slane %v1865_v24, 1 }
 0x256   :  { %v3677_v23 = vmul.f32 %v3661_v48, %v3661_v48  ;;  %v3573_v52 = vadd.f32 %v4747_v13, %v3364_v41  ;;  %v4673_v7 = vadd.f32 %v4672_v49, %v4671_v28 }
 0x257   :  { %v4674_v40 = vpop.f32.mrf.mxu0  ;;  %v4749_v11 = vpop.f32.mrf.mxu1  ;;  %v1867_v6 = vadd.f32 %v1866_v20, %v1865_v24 }
 0x258   :  { %v3697_v42 = vsel %vm1828_vm0, %v3677_v23, 0.0  ;;  %v3662_v27 = vsub.f32 %v3573_v52, %v3805_v51  ;;  %v4750_v14 = vadd.f32 %v4749_v11, %v4748_v44  ;;  %v3378_v37 = vadd.f32 %v4673_v7, %v7425_v18  ;;  %v3809_v51 = vld [vmem:[%s7541_s2 + $0xd0] sm:$0xff] }
 0x259   :  { %v3698_v0 = vadd.f32 %v3697_v42, %v3696_v63  ;;  %v4675_v50 = vpop.f32.mrf.mxu0  ;;  %4775 = vpush %v1867_v6  ;;  %v4751_v62 = vpop.f32.mrf.mxu1 }
 0x25a   :  { %v3678_v8 = vmul.f32 %v3662_v27, %v3662_v27  ;;  %v3580_v30 = vadd.f32 %v4750_v14, %v3371_v4  ;;  %v4676_v55 = vadd.f32 %v4675_v50, %v4674_v40  ;;  %v3810_v14 = vld [vmem:[%s7541_s2 + $0xd8] sm:$0xff] }
 0x25b   :  { %v4677_v35 = vpop.f32.mrf.mxu0  ;;  %v4752_v32 = vpop.f32.mrf.mxu1 }
 0x25c   :  { %v3699_v45 = vsel %vm1828_vm0, %v3678_v8, 0.0  ;;  %v3663_v58 = vsub.f32 %v3580_v30, %v3806_v39  ;;  %v4753_v1 = vadd.f32 %v4752_v32, %v4751_v62  ;;  %v3385_v18 = vadd.f32 %v4676_v55, %v7428_v12 }
 0x25d   :  { %v3700_v54 = vadd.f32 %v3699_v45, %v3698_v0  ;;  %v4678_v38 = vpop.f32.mrf.mxu0  ;;  %v4754_v16 = vpop.f32.mrf.mxu1 }
 0x25e   :  { %v3679_v60 = vmul.f32 %v3663_v58, %v3663_v58  ;;  %v3587_v33 = vadd.f32 %v4753_v1, %v3378_v37  ;;  %v4679_v57 = vadd.f32 %v4678_v38, %v4677_v35  ;;  %v3811_v58 = vld [vmem:[%s7541_s2 + $0xe0] sm:$0xff] }
 0x25f   :  { %v4680_v9 = vpop.f32.mrf.mxu0  ;;  %v4755_v56 = vpop.f32.mrf.mxu1 }
 0x260   :  { %v3701_v53 = vsel %vm1828_vm0, %v3679_v60, 0.0  ;;  %v3664_v43 = vsub.f32 %v3587_v33, %v3807_v26  ;;  %v4756_v34 = vadd.f32 %v4755_v56, %v4754_v16  ;;  %v3392_v61 = vadd.f32 %v4679_v57, %v7431_v25 }
 0x261   :  { %v3702_v2 = vadd.f32 %v3701_v53, %v3700_v54  ;;  %v4681_v46 = vpop.f32.mrf.mxu0  ;;  %v4757_v36 = vpop.f32.mrf.mxu1  ;;  %v4534_v26 = vadd.f32 %v7442_v31, %v7439_v3 }
 0x262   :  { %v3680_v41 = vmul.f32 %v3664_v43, %v3664_v43  ;;  %v3594_v28 = vadd.f32 %v4756_v34, %v3385_v18  ;;  %v4682_v12 = vadd.f32 %v4681_v46, %v4680_v9  ;;  %v3812_v43 = vld [vmem:[%s7541_s2 + $0xe8] sm:$0xff] }
 0x263   :  { %v4683_v24 = vpop.f32.mrf.mxu0  ;;  %v4758_v10 = vpop.f32.mrf.mxu1  ;;  %v2881_v46 = vadd.f32 %v4534_v26, %v7398_v5 }
 0x264   :  { %v3703_v19 = vsel %vm1828_vm0, %v3680_v41, 0.0  ;;  %v3665_v48 = vsub.f32 %v3594_v28, %v3808_v47  ;;  %v4759_v13 = vadd.f32 %v4758_v10, %v4757_v36  ;;  %v3399_v25 = vadd.f32 %v4682_v12, %v7434_v15 }
 0x265   :  { %v3704_v63 = vadd.f32 %v3703_v19, %v3702_v2  ;;  %v4684_v49 = vpop.f32.mrf.mxu0  ;;  %v4760_v44 = vpop.f32.mrf.mxu1  ;;  %v4614_v2 = vadd.f32 %v7450_v17, %v7446_v22 }
 0x266   :  { %v3681_v20 = vmul.f32 %v3665_v48, %v3665_v48  ;;  %v3601_v23 = vadd.f32 %v4759_v13, %v3392_v61  ;;  %v4685_v52 = vadd.f32 %v4684_v49, %v4683_v24  ;;  %v3813_v24 = vld [vmem:[%s7541_s2 + $0xf0] sm:$0xff]  ;;  %v3814_v49 = vld [vmem:[%s7541_s2 + $0xf8] sm:$0xff] }
 0x267   :  { %v4686_v7 = vpop.f32.mrf.mxu0  ;;  %v4761_v40 = vpop.f32.mrf.mxu1  ;;  %v3154_v12 = vadd.f32 %v4614_v2, %v2881_v46 }
 0x268   :  { %v3705_v11 = vsel %vm1828_vm0, %v3681_v20, 0.0  ;;  %v3666_v6 = vsub.f32 %v3601_v23, %v3809_v51  ;;  %v4762_v4 = vadd.f32 %v4761_v40, %v4760_v44  ;;  %v3406_v62 = vadd.f32 %v4685_v52, %v7437_v21 }
 0x269   :  { %v3706_v42 = vadd.f32 %v3705_v11, %v3704_v63  ;;  %v4687_v27 = vpop.f32.mrf.mxu0  ;;  %v4763_v0 = vpop.f32.mrf.mxu1 }
 0x26a   :  { %v3682_v50 = vmul.f32 %v3666_v6, %v3666_v6  ;;  %v3608_v39 = vadd.f32 %v4762_v4, %v3399_v25  ;;  %v4688_v15 = vadd.f32 %v4687_v27, %v4686_v7 }
 0x26b   :  { %v4689_v8 = vpop.f32.mrf.mxu0  ;;  %v4764_v30 = vpop.f32.mrf.mxu1 }
 0x26c   :  { %v3707_v37 = vsel %vm1828_vm0, %v3682_v50, 0.0  ;;  %v3667_v35 = vsub.f32 %v3608_v39, %v3810_v14  ;;  %v4765_v32 = vadd.f32 %v4764_v30, %v4763_v0  ;;  %v3413_v33 = vadd.f32 %v4688_v15, %v7444_v59 }
 0x26d   :  { %v3708_v45 = vadd.f32 %v3707_v37, %v3706_v42  ;;  %v4690_v55 = vpop.f32.mrf.mxu0  ;;  %v4766_v1 = vpop.f32.mrf.mxu1 }
 0x26e   :  { %v3683_v54 = vmul.f32 %v3667_v35, %v3667_v35  ;;  %v3615_v38 = vadd.f32 %v4765_v32, %v3406_v62  ;;  %v4691_v21 = vadd.f32 %v4690_v55, %v4689_v8 }
 0x26f   :  { %v4692_v16 = vpop.f32.mrf.mxu0  ;;  %v4767_v60 = vpop.f32.mrf.mxu1 }
 0x270   :  { %v3709_v57 = vsel %vm1828_vm0, %v3683_v54, 0.0  ;;  %v3668_v9 = vsub.f32 %v3615_v38, %v3811_v58  ;;  %v4768_v56 = vadd.f32 %v4767_v60, %v4766_v1  ;;  %v3420_v59 = vadd.f32 %v4691_v21, %v7448_v29 }
 0x271   :  { %v3710_v18 = vadd.f32 %v3709_v57, %v3708_v45  ;;  %v4693_v53 = vpop.f32.mrf.mxu0  ;;  %v4769_v34 = vpop.f32.mrf.mxu1 }
 0x272   :  { %v3684_v3 = vmul.f32 %v3668_v9, %v3668_v9  ;;  %v3622_v31 = vadd.f32 %v4768_v56, %v3413_v33  ;;  %v4694_v41 = vadd.f32 %v4693_v53, %v4692_v16 }
 0x273   :  { %v4770_v47 = vpop.f32.mrf.mxu1 }
 0x274   :  { %v3711_v36 = vsel %vm1828_vm0, %v3684_v3, 0.0  ;;  %v3669_v28 = vsub.f32 %v3622_v31, %v3812_v43  ;;  %v4771_v61 = vadd.f32 %v4770_v47, %v4769_v34  ;;  %v3427_v13 = vadd.f32 %v4694_v41, %v3154_v12 }
 0x275   :  { %v4772_v10 = vpop.f32.mrf.mxu1  ;;  %v3712_v19 = vadd.f32 %v3711_v36, %v3710_v18 }
 0x276   :  { %v3685_v22 = vmul.f32 %v3669_v28, %v3669_v28  ;;  %v3629_v17 = vadd.f32 %v4771_v61, %v3420_v59 }
 0x277   :  { %v4773_v48 = vpop.f32.mrf.mxu1 }
 0x278   :  { %v3670_v5 = vsub.f32 %v3629_v17, %v3813_v24  ;;  %v4774_v63 = vadd.f32 %v4773_v48, %v4772_v10  ;;  %v3713_v29 = vsel %vm1828_vm0, %v3685_v22, 0.0 }
 0x279   :  { %v3714_v51 = vadd.f32 %v3713_v29, %v3712_v19 }
 0x27a   :  { %v3686_v44 = vmul.f32 %v3670_v5, %v3670_v5  ;;  %v3636_v20 = vadd.f32 %v4774_v63, %v3427_v13 }
 0x27c   :  { %v3671_v23 = vsub.f32 %v3636_v20, %v3814_v49  ;;  %v3715_v52 = vsel %vm1828_vm0, %v3686_v44, 0.0 }
 0x27d   :  { %v3716_v7 = vadd.f32 %v3715_v52, %v3714_v51 }
 0x27e   :  { %v3687_v40 = vmul.f32 %v3671_v23, %v3671_v23 }
 0x280   :  { %v3717_v25 = vsel %vm1828_vm0, %v3687_v40, 0.0 }
 0x281   :  { %v3718_v11 = vadd.f32 %v3717_v25, %v3716_v7 }
 0x283   :  { %3719 = vadd.xlane.f32.xlu0 %v3718_v11 }
 0x28a   :  { %s4776_s2 = spop %4775 }
 0x28b   :  { %v1869_v39 = vstv %s4776_s2 }
 0x30c   :  { %v3720_v6 = vpop.xlane.xlu0 %3719 }
 0x30d   :  { %v3721_v4 = vrot.slane %v3720_v6, 4 }
 0x30f   :  { %v3722_v42 = vadd.f32 %v3721_v4, %v3720_v6 }
 0x311   :  { %v3723_v27 = vrot.slane %v3722_v42, 2 }
 0x313   :  { %v3724_v14 = vadd.f32 %v3723_v27, %v3722_v42 }
 0x315   :  { %v3725_v0 = vrot.slane %v3724_v14, 1 }
 0x317   :  { %v3726_v50 = vadd.f32 %v3725_v0, %v3724_v14 }
 0x319   :  { %4777 = vpush %v3726_v50 }
 0x34a   :  { %s4778_s27 = spop %4777 }
 0x34b   :  { %v3728_v62 = vstv %s4778_s27 }
 0x34c   :  { %v3729_v8 = vadd.f32 %v3728_v62, %v1869_v39 }
 0x34e   :  { %3730 = vst [vmem:[%s7542_s3] sm:$0x1] %v3729_v8 }

</bundles_post_ra>
